<compile_context>
chip_gen: v7x
topology: tpu7x:2x2x1
jax: 0.10.0
libtpu: 0.0.40
codegen_flags: <defaults>
</compile_context>

<pallas_src>
import math

import jax
import jax.numpy as jnp
from jax import lax
from jax.experimental import pallas as pl
from jax.experimental.pallas import tpu as pltpu


def encoder_kernel(
    feat_ref,    # (1, N, in_size)        VMEM
    dist_ref,    # (1, dsize, N, N)       VMEM, distance-feature planes
    wd_ref,      # (depth*heads, dsize)   SMEM, distance -> logit-bias weights
    wp_ref, bp_ref,                       # preprocessor Linear(in_size, size)
    wq_ref, wk_ref, wv_ref,               # (depth*heads, size, head_dim)
    wo_ref,                               # (depth*heads, head_dim, size)
    bo_ref,                               # (depth, 1, size)
    w1_ref, b1_ref,                       # (depth, size, hidden), (depth, 1, hidden)
    w2_ref, b2_ref,                       # (depth, hidden, hidden), (depth, 1, hidden)
    w3_ref, b3_ref,                       # (depth, hidden, size), (depth, 1, size)
    out_ref,     # (1, N, size)
):
    N = feat_ref.shape[1]
    dsize = dist_ref.shape[1]
    depth = w1_ref.shape[0]
    dh, size, head_dim = wq_ref.shape
    heads = dh // depth
    scale = 1.0 / math.sqrt(head_dim)

    x = feat_ref[0]                                   # (N, in_size)
    d_all = dist_ref[0]                               # (dsize, N, N), loaded once
    d_planes = [d_all[dd] for dd in range(dsize)]     # dsize x (N, N)

    # ---- preprocessor: Linear(in_size, size) ----
    out = jnp.dot(x, wp_ref[...], preferred_element_type=jnp.float32) + bp_ref[...]

    for blk in range(depth):
        # pre_norm path with batch_norm=False: LayerNorms are identity,
        # dropout is eval-mode identity.
        normed = out

        # ---- structured multi-head attention, residual ----
        acc = jnp.zeros((N, size), jnp.float32)
        for h in range(heads):
            idx = blk * heads + h
            q = jnp.dot(normed, wq_ref[idx], preferred_element_type=jnp.float32)
            k = jnp.dot(normed, wk_ref[idx], preferred_element_type=jnp.float32)
            v = jnp.dot(normed, wv_ref[idx], preferred_element_type=jnp.float32)
            # q @ k^T without materializing a transpose.
            logits = lax.dot_general(
                q, k, (((1,), (1,)), ((), ())),
                preferred_element_type=jnp.float32) * scale
            # Structured part: additive pairwise-distance bias as SMEM-scalar
            # FMAs on lane-resident (N, N) planes.
            for dd in range(dsize):
                logits = logits + wd_ref[idx, dd] * d_planes[dd]
            m = jnp.max(logits, axis=-1, keepdims=True)
            e = jnp.exp(logits - m)
            p = e * pl.reciprocal(jnp.sum(e, axis=-1, keepdims=True), approx=True)
            o_h = jnp.dot(p, v, preferred_element_type=jnp.float32)       # (N, hd)
            # Per-head output projection accumulates directly into (N, size):
            # no concat, no lane slicing.
            acc = acc + jnp.dot(o_h, wo_ref[idx],
                                preferred_element_type=jnp.float32)
        out = out + acc + bo_ref[blk]

        # ---- local MLP (3 linears, ReLU between), residual ----
        h1 = jnp.maximum(
            jnp.dot(out, w1_ref[blk], preferred_element_type=jnp.float32)
            + b1_ref[blk], 0.0)
        h2 = jnp.maximum(
            jnp.dot(h1, w2_ref[blk], preferred_element_type=jnp.float32)
            + b2_ref[blk], 0.0)
        out = out + (jnp.dot(h2, w3_ref[blk], preferred_element_type=jnp.float32)
                     + b3_ref[blk])

    out_ref[0] = out


def structured_transformer_encoder(features, distances, params):
    """features: (B, N, in_size); distances: (B, N, N, distance_size)."""
    B, N, in_size = features.shape
    dsize = distances.shape[-1]
    size = params["wp"].shape[1]

    # Layout plumbing only: make distance channels plane-major so each (N, N)
    # plane is a dense lane tile inside the kernel.
    dist_t = jnp.transpose(distances, (0, 3, 1, 2))      # (B, dsize, N, N)

    weight_names = ("wp", "bp", "wq", "wk", "wv", "wo", "bo",
                    "w1", "b1", "w2", "b2", "w3", "b3")
    weights = tuple(params[k] for k in weight_names)

    def rep_spec(x):
        nd = x.ndim
        return pl.BlockSpec(x.shape, lambda b, _nd=nd: (0,) * _nd)

    in_specs = (
        [pl.BlockSpec((1, N, in_size), lambda b: (b, 0, 0)),
         pl.BlockSpec((1, dsize, N, N), lambda b: (b, 0, 0, 0)),
         pl.BlockSpec(memory_space=pltpu.MemorySpace.SMEM)]
        + [rep_spec(w) for w in weights]
    )

    return pl.pallas_call(
        encoder_kernel,
        grid=(B,),
        in_specs=in_specs,
        out_specs=pl.BlockSpec((1, N, size), lambda b: (b, 0, 0)),
        out_shape=jax.ShapeDtypeStruct((B, N, size), jnp.float32),
        compiler_params=pltpu.CompilerParams(
            dimension_semantics=("parallel",)),
    )(features, dist_t, params["wd"], *weights)


def init_params(key, in_size, size, dsize, heads, head_dim, hidden, depth):
    def uni(k, shape, fan_in):
        bound = 1.0 / math.sqrt(fan_in)
        return jax.random.uniform(k, shape, jnp.float32, -bound, bound)

    ks = iter(jax.random.split(key, 20))
    p = {}
    # preprocessor Linear(in_size, size)
    p["wp"] = uni(next(ks), (in_size, size), in_size)
    p["bp"] = uni(next(ks), (1, size), in_size)
    # attention projections, (depth*heads) stacked on the leading axis
    p["wq"] = uni(next(ks), (depth * heads, size, head_dim), size)
    p["wk"] = uni(next(ks), (depth * heads, size, head_dim), size)
    p["wv"] = uni(next(ks), (depth * heads, size, head_dim), size)
    p["wd"] = uni(next(ks), (depth * heads, dsize), dsize)          # SMEM
    p["wo"] = uni(next(ks), (depth * heads, head_dim, size), heads * head_dim)
    p["bo"] = uni(next(ks), (depth, 1, size), heads * head_dim)
    # local MLP (size -> hidden -> hidden -> size)
    p["w1"] = uni(next(ks), (depth, size, hidden), size)
    p["b1"] = uni(next(ks), (depth, 1, hidden), size)
    p["w2"] = uni(next(ks), (depth, hidden, hidden), hidden)
    p["b2"] = uni(next(ks), (depth, 1, hidden), hidden)
    p["w3"] = uni(next(ks), (depth, hidden, size), hidden)
    p["b3"] = uni(next(ks), (depth, 1, size), hidden)
    return p


if __name__ == "__main__":
    # small, module-consistent shapes:
    #   batch=2, seq=16 residues, in_size=16, size=32,
    #   distance_size=8, attention_size=32 (heads=4 x head_dim=8),
    #   hidden_size=32, depth=2 blocks, mlp_depth=3.
    B, N, in_size, size = 2, 16, 16, 32
    dsize, heads, head_dim, hidden, depth = 8, 4, 8, 32, 2

    key = jax.random.PRNGKey(0)
    kf, kd, kp = jax.random.split(key, 3)
    features = jax.random.normal(kf, (B, N, in_size), jnp.float32)
    # structure: pairwise distance features (e.g. RBF-encoded CA-CA distances)
    distances = jax.random.normal(kd, (B, N, N, dsize), jnp.float32)
    params = init_params(kp, in_size, size, dsize, heads, head_dim, hidden, depth)

    out = structured_transformer_encoder(features, distances, params)
    out = jax.block_until_ready(out)

    assert out.shape == (B, N, size)
    assert bool(jnp.all(jnp.isfinite(out)))
    print("KERNEL_OK")
</pallas_src>

<mosaic_0001>
module attributes {stable_mosaic.version = 11 : i64} {
  func.func @encoder_kernel(%arg0: i32, %arg1: memref<1x16x16xf32, #tpu.memory_space<vmem>>, %arg2: memref<1x8x16x16xf32, #tpu.memory_space<vmem>>, %arg3: memref<8x8xf32, #tpu.memory_space<smem>>, %arg4: memref<16x32xf32, #tpu.memory_space<vmem>>, %arg5: memref<1x32xf32, #tpu.memory_space<vmem>>, %arg6: memref<8x32x8xf32, #tpu.memory_space<vmem>>, %arg7: memref<8x32x8xf32, #tpu.memory_space<vmem>>, %arg8: memref<8x32x8xf32, #tpu.memory_space<vmem>>, %arg9: memref<8x8x32xf32, #tpu.memory_space<vmem>>, %arg10: memref<2x1x32xf32, #tpu.memory_space<vmem>>, %arg11: memref<2x32x32xf32, #tpu.memory_space<vmem>>, %arg12: memref<2x1x32xf32, #tpu.memory_space<vmem>>, %arg13: memref<2x32x32xf32, #tpu.memory_space<vmem>>, %arg14: memref<2x1x32xf32, #tpu.memory_space<vmem>>, %arg15: memref<2x32x32xf32, #tpu.memory_space<vmem>>, %arg16: memref<2x1x32xf32, #tpu.memory_space<vmem>>, %arg17: memref<1x16x32xf32, #tpu.memory_space<vmem>>) attributes {dimension_semantics = [#tpu.dimension_semantics<parallel>], iteration_bounds = array<i64: 2>, scalar_prefetch = 0 : i64, scratch_operands = 0 : i64, tpu.core_type = #tpu.core_type<tc>, window_params = [{transform_indices = @transform_0, window_bounds = array<i64: 1, 16, 16>}, {transform_indices = @transform_1, window_bounds = array<i64: 1, 8, 16, 16>}, {transform_indices = @transform_2, window_bounds = array<i64: 8, 8>}, {pipeline_mode = #tpu.pipeline_mode<synchronous>, transform_indices = @transform_3, window_bounds = array<i64: 16, 32>}, {pipeline_mode = #tpu.pipeline_mode<synchronous>, transform_indices = @transform_4, window_bounds = array<i64: 1, 32>}, {pipeline_mode = #tpu.pipeline_mode<synchronous>, transform_indices = @transform_5, window_bounds = array<i64: 8, 32, 8>}, {pipeline_mode = #tpu.pipeline_mode<synchronous>, transform_indices = @transform_6, window_bounds = array<i64: 8, 32, 8>}, {pipeline_mode = #tpu.pipeline_mode<synchronous>, transform_indices = @transform_7, window_bounds = array<i64: 8, 32, 8>}, {pipeline_mode = #tpu.pipeline_mode<synchronous>, transform_indices = @transform_8, window_bounds = array<i64: 8, 8, 32>}, {pipeline_mode = #tpu.pipeline_mode<synchronous>, transform_indices = @transform_9, window_bounds = array<i64: 2, 1, 32>}, {pipeline_mode = #tpu.pipeline_mode<synchronous>, transform_indices = @transform_10, window_bounds = array<i64: 2, 32, 32>}, {pipeline_mode = #tpu.pipeline_mode<synchronous>, transform_indices = @transform_11, window_bounds = array<i64: 2, 1, 32>}, {pipeline_mode = #tpu.pipeline_mode<synchronous>, transform_indices = @transform_12, window_bounds = array<i64: 2, 32, 32>}, {pipeline_mode = #tpu.pipeline_mode<synchronous>, transform_indices = @transform_13, window_bounds = array<i64: 2, 1, 32>}, {pipeline_mode = #tpu.pipeline_mode<synchronous>, transform_indices = @transform_14, window_bounds = array<i64: 2, 32, 32>}, {pipeline_mode = #tpu.pipeline_mode<synchronous>, transform_indices = @transform_15, window_bounds = array<i64: 2, 1, 32>}, {transform_indices = @transform_16, window_bounds = array<i64: 1, 16, 32>}]} {
    %c0 = arith.constant 0 : index
    %c0_0 = arith.constant 0 : index
    %c0_1 = arith.constant 0 : index
    %0 = vector.load %arg1[%c0, %c0_0, %c0_1] : memref<1x16x16xf32, #tpu.memory_space<vmem>>, vector<1x16x16xf32>
    %1 = vector.shape_cast %0 : vector<1x16x16xf32> to vector<16x16xf32>
    %c0_2 = arith.constant 0 : index
    %c0_3 = arith.constant 0 : index
    %c0_4 = arith.constant 0 : index
    %c0_5 = arith.constant 0 : index
    %2 = vector.load %arg2[%c0_2, %c0_3, %c0_4, %c0_5] : memref<1x8x16x16xf32, #tpu.memory_space<vmem>>, vector<1x8x16x16xf32>
    %3 = vector.shape_cast %2 : vector<1x8x16x16xf32> to vector<8x16x16xf32>
    %4 = vector.extract_strided_slice %3 {offsets = [0, 0, 0], sizes = [1, 16, 16], strides = [1, 1, 1]} : vector<8x16x16xf32> to vector<1x16x16xf32>
    %5 = vector.shape_cast %4 : vector<1x16x16xf32> to vector<16x16xf32>
    %6 = vector.extract_strided_slice %3 {offsets = [1, 0, 0], sizes = [1, 16, 16], strides = [1, 1, 1]} : vector<8x16x16xf32> to vector<1x16x16xf32>
    %7 = vector.shape_cast %6 : vector<1x16x16xf32> to vector<16x16xf32>
    %8 = vector.extract_strided_slice %3 {offsets = [2, 0, 0], sizes = [1, 16, 16], strides = [1, 1, 1]} : vector<8x16x16xf32> to vector<1x16x16xf32>
    %9 = vector.shape_cast %8 : vector<1x16x16xf32> to vector<16x16xf32>
    %10 = vector.extract_strided_slice %3 {offsets = [3, 0, 0], sizes = [1, 16, 16], strides = [1, 1, 1]} : vector<8x16x16xf32> to vector<1x16x16xf32>
    %11 = vector.shape_cast %10 : vector<1x16x16xf32> to vector<16x16xf32>
    %12 = vector.extract_strided_slice %3 {offsets = [4, 0, 0], sizes = [1, 16, 16], strides = [1, 1, 1]} : vector<8x16x16xf32> to vector<1x16x16xf32>
    %13 = vector.shape_cast %12 : vector<1x16x16xf32> to vector<16x16xf32>
    %14 = vector.extract_strided_slice %3 {offsets = [5, 0, 0], sizes = [1, 16, 16], strides = [1, 1, 1]} : vector<8x16x16xf32> to vector<1x16x16xf32>
    %15 = vector.shape_cast %14 : vector<1x16x16xf32> to vector<16x16xf32>
    %16 = vector.extract_strided_slice %3 {offsets = [6, 0, 0], sizes = [1, 16, 16], strides = [1, 1, 1]} : vector<8x16x16xf32> to vector<1x16x16xf32>
    %17 = vector.shape_cast %16 : vector<1x16x16xf32> to vector<16x16xf32>
    %18 = vector.extract_strided_slice %3 {offsets = [7, 0, 0], sizes = [1, 16, 16], strides = [1, 1, 1]} : vector<8x16x16xf32> to vector<1x16x16xf32>
    %19 = vector.shape_cast %18 : vector<1x16x16xf32> to vector<16x16xf32>
    %c0_6 = arith.constant 0 : index
    %c0_7 = arith.constant 0 : index
    %20 = vector.load %arg4[%c0_6, %c0_7] : memref<16x32xf32, #tpu.memory_space<vmem>>, vector<16x32xf32>
    %cst = arith.constant dense<0.000000e+00> : vector<16x32xf32>
    %21 = tpu.matmul %1, %20, %cst {dimension_numbers = #tpu.dot_dimension_numbers<[1], [0], [0], [1], [0, 0, 1, 1], [], []>} : vector<16x16xf32>, vector<16x32xf32>, vector<16x32xf32> -> vector<16x32xf32>
    %c0_8 = arith.constant 0 : index
    %c0_9 = arith.constant 0 : index
    %22 = vector.load %arg5[%c0_8, %c0_9] : memref<1x32xf32, #tpu.memory_space<vmem>>, vector<1x32xf32>
    %23 = vector.broadcast %22 : vector<1x32xf32> to vector<16x32xf32>
    %24 = arith.addf %21, %23 : vector<16x32xf32>
    %cst_10 = arith.constant 0.000000e+00 : f32
    %25 = vector.broadcast %cst_10 : f32 to vector<16x32xf32>
    %c0_11 = arith.constant 0 : index
    %c0_12 = arith.constant 0 : index
    %c0_13 = arith.constant 0 : index
    %26 = vector.load %arg6[%c0_11, %c0_12, %c0_13] : memref<8x32x8xf32, #tpu.memory_space<vmem>>, vector<1x32x8xf32>
    %27 = vector.shape_cast %26 : vector<1x32x8xf32> to vector<32x8xf32>
    %cst_14 = arith.constant dense<0.000000e+00> : vector<16x8xf32>
    %28 = tpu.matmul %24, %27, %cst_14 {dimension_numbers = #tpu.dot_dimension_numbers<[1], [0], [0], [1], [0, 0, 1, 1], [], []>} : vector<16x32xf32>, vector<32x8xf32>, vector<16x8xf32> -> vector<16x8xf32>
    %c0_15 = arith.constant 0 : index
    %c0_16 = arith.constant 0 : index
    %c0_17 = arith.constant 0 : index
    %29 = vector.load %arg7[%c0_15, %c0_16, %c0_17] : memref<8x32x8xf32, #tpu.memory_space<vmem>>, vector<1x32x8xf32>
    %30 = vector.shape_cast %29 : vector<1x32x8xf32> to vector<32x8xf32>
    %cst_18 = arith.constant dense<0.000000e+00> : vector<16x8xf32>
    %31 = tpu.matmul %24, %30, %cst_18 {dimension_numbers = #tpu.dot_dimension_numbers<[1], [0], [0], [1], [0, 0, 1, 1], [], []>} : vector<16x32xf32>, vector<32x8xf32>, vector<16x8xf32> -> vector<16x8xf32>
    %c0_19 = arith.constant 0 : index
    %c0_20 = arith.constant 0 : index
    %c0_21 = arith.constant 0 : index
    %32 = vector.load %arg8[%c0_19, %c0_20, %c0_21] : memref<8x32x8xf32, #tpu.memory_space<vmem>>, vector<1x32x8xf32>
    %33 = vector.shape_cast %32 : vector<1x32x8xf32> to vector<32x8xf32>
    %cst_22 = arith.constant dense<0.000000e+00> : vector<16x8xf32>
    %34 = tpu.matmul %24, %33, %cst_22 {dimension_numbers = #tpu.dot_dimension_numbers<[1], [0], [0], [1], [0, 0, 1, 1], [], []>} : vector<16x32xf32>, vector<32x8xf32>, vector<16x8xf32> -> vector<16x8xf32>
    %cst_23 = arith.constant dense<0.000000e+00> : vector<16x16xf32>
    %35 = tpu.matmul %28, %31, %cst_23 {dimension_numbers = #tpu.dot_dimension_numbers<[1], [1], [0], [0], [0, 0, 1, 0], [], []>} : vector<16x8xf32>, vector<16x8xf32>, vector<16x16xf32> -> vector<16x16xf32>
    %cst_24 = arith.constant 0.353553385 : f32
    %36 = vector.broadcast %cst_24 : f32 to vector<16x16xf32>
    %37 = arith.mulf %35, %36 : vector<16x16xf32>
    %c0_25 = arith.constant 0 : index
    %c0_26 = arith.constant 0 : index
    %38 = memref.load %arg3[%c0_25, %c0_26] : memref<8x8xf32, #tpu.memory_space<smem>>
    %39 = vector.broadcast %38 : f32 to vector<16x16xf32>
    %40 = arith.mulf %39, %5 : vector<16x16xf32>
    %41 = arith.addf %37, %40 : vector<16x16xf32>
    %c0_27 = arith.constant 0 : index
    %c1 = arith.constant 1 : index
    %42 = memref.load %arg3[%c0_27, %c1] : memref<8x8xf32, #tpu.memory_space<smem>>
    %43 = vector.broadcast %42 : f32 to vector<16x16xf32>
    %44 = arith.mulf %43, %7 : vector<16x16xf32>
    %45 = arith.addf %41, %44 : vector<16x16xf32>
    %c0_28 = arith.constant 0 : index
    %c2 = arith.constant 2 : index
    %46 = memref.load %arg3[%c0_28, %c2] : memref<8x8xf32, #tpu.memory_space<smem>>
    %47 = vector.broadcast %46 : f32 to vector<16x16xf32>
    %48 = arith.mulf %47, %9 : vector<16x16xf32>
    %49 = arith.addf %45, %48 : vector<16x16xf32>
    %c0_29 = arith.constant 0 : index
    %c3 = arith.constant 3 : index
    %50 = memref.load %arg3[%c0_29, %c3] : memref<8x8xf32, #tpu.memory_space<smem>>
    %51 = vector.broadcast %50 : f32 to vector<16x16xf32>
    %52 = arith.mulf %51, %11 : vector<16x16xf32>
    %53 = arith.addf %49, %52 : vector<16x16xf32>
    %c0_30 = arith.constant 0 : index
    %c4 = arith.constant 4 : index
    %54 = memref.load %arg3[%c0_30, %c4] : memref<8x8xf32, #tpu.memory_space<smem>>
    %55 = vector.broadcast %54 : f32 to vector<16x16xf32>
    %56 = arith.mulf %55, %13 : vector<16x16xf32>
    %57 = arith.addf %53, %56 : vector<16x16xf32>
    %c0_31 = arith.constant 0 : index
    %c5 = arith.constant 5 : index
    %58 = memref.load %arg3[%c0_31, %c5] : memref<8x8xf32, #tpu.memory_space<smem>>
    %59 = vector.broadcast %58 : f32 to vector<16x16xf32>
    %60 = arith.mulf %59, %15 : vector<16x16xf32>
    %61 = arith.addf %57, %60 : vector<16x16xf32>
    %c0_32 = arith.constant 0 : index
    %c6 = arith.constant 6 : index
    %62 = memref.load %arg3[%c0_32, %c6] : memref<8x8xf32, #tpu.memory_space<smem>>
    %63 = vector.broadcast %62 : f32 to vector<16x16xf32>
    %64 = arith.mulf %63, %17 : vector<16x16xf32>
    %65 = arith.addf %61, %64 : vector<16x16xf32>
    %c0_33 = arith.constant 0 : index
    %c7 = arith.constant 7 : index
    %66 = memref.load %arg3[%c0_33, %c7] : memref<8x8xf32, #tpu.memory_space<smem>>
    %67 = vector.broadcast %66 : f32 to vector<16x16xf32>
    %68 = arith.mulf %67, %19 : vector<16x16xf32>
    %69 = arith.addf %65, %68 : vector<16x16xf32>
    %cst_34 = arith.constant dense<0xFF800000> : vector<16xf32>
    %70 = vector.multi_reduction <maximumf>, %69, %cst_34 [1] : vector<16x16xf32> to vector<16xf32>
    %71 = vector.shape_cast %70 : vector<16xf32> to vector<16x1xf32>
    %72 = vector.broadcast %71 : vector<16x1xf32> to vector<16x16xf32>
    %73 = arith.subf %69, %72 : vector<16x16xf32>
    %74 = math.exp %73 : vector<16x16xf32>
    %cst_35 = arith.constant dense<0.000000e+00> : vector<16xf32>
    %75 = vector.multi_reduction <add>, %74, %cst_35 [1] : vector<16x16xf32> to vector<16xf32>
    %76 = vector.shape_cast %75 : vector<16xf32> to vector<16x1xf32>
    %77 = tpu.reciprocal %76 {approx = true} : vector<16x1xf32> -> vector<16x1xf32>
    %78 = vector.broadcast %77 : vector<16x1xf32> to vector<16x16xf32>
    %79 = arith.mulf %74, %78 : vector<16x16xf32>
    %cst_36 = arith.constant dense<0.000000e+00> : vector<16x8xf32>
    %80 = tpu.matmul %79, %34, %cst_36 {dimension_numbers = #tpu.dot_dimension_numbers<[1], [0], [0], [1], [0, 0, 1, 1], [], []>} : vector<16x16xf32>, vector<16x8xf32>, vector<16x8xf32> -> vector<16x8xf32>
    %c0_37 = arith.constant 0 : index
    %c0_38 = arith.constant 0 : index
    %c0_39 = arith.constant 0 : index
    %81 = vector.load %arg9[%c0_37, %c0_38, %c0_39] : memref<8x8x32xf32, #tpu.memory_space<vmem>>, vector<1x8x32xf32>
    %82 = vector.shape_cast %81 : vector<1x8x32xf32> to vector<8x32xf32>
    %cst_40 = arith.constant dense<0.000000e+00> : vector<16x32xf32>
    %83 = tpu.matmul %80, %82, %cst_40 {dimension_numbers = #tpu.dot_dimension_numbers<[1], [0], [0], [1], [0, 0, 1, 1], [], []>} : vector<16x8xf32>, vector<8x32xf32>, vector<16x32xf32> -> vector<16x32xf32>
    %84 = arith.addf %25, %83 : vector<16x32xf32>
    %c1_41 = arith.constant 1 : index
    %c0_42 = arith.constant 0 : index
    %c0_43 = arith.constant 0 : index
    %85 = vector.load %arg6[%c1_41, %c0_42, %c0_43] : memref<8x32x8xf32, #tpu.memory_space<vmem>>, vector<1x32x8xf32>
    %86 = vector.shape_cast %85 : vector<1x32x8xf32> to vector<32x8xf32>
    %cst_44 = arith.constant dense<0.000000e+00> : vector<16x8xf32>
    %87 = tpu.matmul %24, %86, %cst_44 {dimension_numbers = #tpu.dot_dimension_numbers<[1], [0], [0], [1], [0, 0, 1, 1], [], []>} : vector<16x32xf32>, vector<32x8xf32>, vector<16x8xf32> -> vector<16x8xf32>
    %c1_45 = arith.constant 1 : index
    %c0_46 = arith.constant 0 : index
    %c0_47 = arith.constant 0 : index
    %88 = vector.load %arg7[%c1_45, %c0_46, %c0_47] : memref<8x32x8xf32, #tpu.memory_space<vmem>>, vector<1x32x8xf32>
    %89 = vector.shape_cast %88 : vector<1x32x8xf32> to vector<32x8xf32>
    %cst_48 = arith.constant dense<0.000000e+00> : vector<16x8xf32>
    %90 = tpu.matmul %24, %89, %cst_48 {dimension_numbers = #tpu.dot_dimension_numbers<[1], [0], [0], [1], [0, 0, 1, 1], [], []>} : vector<16x32xf32>, vector<32x8xf32>, vector<16x8xf32> -> vector<16x8xf32>
    %c1_49 = arith.constant 1 : index
    %c0_50 = arith.constant 0 : index
    %c0_51 = arith.constant 0 : index
    %91 = vector.load %arg8[%c1_49, %c0_50, %c0_51] : memref<8x32x8xf32, #tpu.memory_space<vmem>>, vector<1x32x8xf32>
    %92 = vector.shape_cast %91 : vector<1x32x8xf32> to vector<32x8xf32>
    %cst_52 = arith.constant dense<0.000000e+00> : vector<16x8xf32>
    %93 = tpu.matmul %24, %92, %cst_52 {dimension_numbers = #tpu.dot_dimension_numbers<[1], [0], [0], [1], [0, 0, 1, 1], [], []>} : vector<16x32xf32>, vector<32x8xf32>, vector<16x8xf32> -> vector<16x8xf32>
    %cst_53 = arith.constant dense<0.000000e+00> : vector<16x16xf32>
    %94 = tpu.matmul %87, %90, %cst_53 {dimension_numbers = #tpu.dot_dimension_numbers<[1], [1], [0], [0], [0, 0, 1, 0], [], []>} : vector<16x8xf32>, vector<16x8xf32>, vector<16x16xf32> -> vector<16x16xf32>
    %cst_54 = arith.constant 0.353553385 : f32
    %95 = vector.broadcast %cst_54 : f32 to vector<16x16xf32>
    %96 = arith.mulf %94, %95 : vector<16x16xf32>
    %c1_55 = arith.constant 1 : index
    %c0_56 = arith.constant 0 : index
    %97 = memref.load %arg3[%c1_55, %c0_56] : memref<8x8xf32, #tpu.memory_space<smem>>
    %98 = vector.broadcast %97 : f32 to vector<16x16xf32>
    %99 = arith.mulf %98, %5 : vector<16x16xf32>
    %100 = arith.addf %96, %99 : vector<16x16xf32>
    %c1_57 = arith.constant 1 : index
    %c1_58 = arith.constant 1 : index
    %101 = memref.load %arg3[%c1_57, %c1_58] : memref<8x8xf32, #tpu.memory_space<smem>>
    %102 = vector.broadcast %101 : f32 to vector<16x16xf32>
    %103 = arith.mulf %102, %7 : vector<16x16xf32>
    %104 = arith.addf %100, %103 : vector<16x16xf32>
    %c1_59 = arith.constant 1 : index
    %c2_60 = arith.constant 2 : index
    %105 = memref.load %arg3[%c1_59, %c2_60] : memref<8x8xf32, #tpu.memory_space<smem>>
    %106 = vector.broadcast %105 : f32 to vector<16x16xf32>
    %107 = arith.mulf %106, %9 : vector<16x16xf32>
    %108 = arith.addf %104, %107 : vector<16x16xf32>
    %c1_61 = arith.constant 1 : index
    %c3_62 = arith.constant 3 : index
    %109 = memref.load %arg3[%c1_61, %c3_62] : memref<8x8xf32, #tpu.memory_space<smem>>
    %110 = vector.broadcast %109 : f32 to vector<16x16xf32>
    %111 = arith.mulf %110, %11 : vector<16x16xf32>
    %112 = arith.addf %108, %111 : vector<16x16xf32>
    %c1_63 = arith.constant 1 : index
    %c4_64 = arith.constant 4 : index
    %113 = memref.load %arg3[%c1_63, %c4_64] : memref<8x8xf32, #tpu.memory_space<smem>>
    %114 = vector.broadcast %113 : f32 to vector<16x16xf32>
    %115 = arith.mulf %114, %13 : vector<16x16xf32>
    %116 = arith.addf %112, %115 : vector<16x16xf32>
    %c1_65 = arith.constant 1 : index
    %c5_66 = arith.constant 5 : index
    %117 = memref.load %arg3[%c1_65, %c5_66] : memref<8x8xf32, #tpu.memory_space<smem>>
    %118 = vector.broadcast %117 : f32 to vector<16x16xf32>
    %119 = arith.mulf %118, %15 : vector<16x16xf32>
    %120 = arith.addf %116, %119 : vector<16x16xf32>
    %c1_67 = arith.constant 1 : index
    %c6_68 = arith.constant 6 : index
    %121 = memref.load %arg3[%c1_67, %c6_68] : memref<8x8xf32, #tpu.memory_space<smem>>
    %122 = vector.broadcast %121 : f32 to vector<16x16xf32>
    %123 = arith.mulf %122, %17 : vector<16x16xf32>
    %124 = arith.addf %120, %123 : vector<16x16xf32>
    %c1_69 = arith.constant 1 : index
    %c7_70 = arith.constant 7 : index
    %125 = memref.load %arg3[%c1_69, %c7_70] : memref<8x8xf32, #tpu.memory_space<smem>>
    %126 = vector.broadcast %125 : f32 to vector<16x16xf32>
    %127 = arith.mulf %126, %19 : vector<16x16xf32>
    %128 = arith.addf %124, %127 : vector<16x16xf32>
    %cst_71 = arith.constant dense<0xFF800000> : vector<16xf32>
    %129 = vector.multi_reduction <maximumf>, %128, %cst_71 [1] : vector<16x16xf32> to vector<16xf32>
    %130 = vector.shape_cast %129 : vector<16xf32> to vector<16x1xf32>
    %131 = vector.broadcast %130 : vector<16x1xf32> to vector<16x16xf32>
    %132 = arith.subf %128, %131 : vector<16x16xf32>
    %133 = math.exp %132 : vector<16x16xf32>
    %cst_72 = arith.constant dense<0.000000e+00> : vector<16xf32>
    %134 = vector.multi_reduction <add>, %133, %cst_72 [1] : vector<16x16xf32> to vector<16xf32>
    %135 = vector.shape_cast %134 : vector<16xf32> to vector<16x1xf32>
    %136 = tpu.reciprocal %135 {approx = true} : vector<16x1xf32> -> vector<16x1xf32>
    %137 = vector.broadcast %136 : vector<16x1xf32> to vector<16x16xf32>
    %138 = arith.mulf %133, %137 : vector<16x16xf32>
    %cst_73 = arith.constant dense<0.000000e+00> : vector<16x8xf32>
    %139 = tpu.matmul %138, %93, %cst_73 {dimension_numbers = #tpu.dot_dimension_numbers<[1], [0], [0], [1], [0, 0, 1, 1], [], []>} : vector<16x16xf32>, vector<16x8xf32>, vector<16x8xf32> -> vector<16x8xf32>
    %c1_74 = arith.constant 1 : index
    %c0_75 = arith.constant 0 : index
    %c0_76 = arith.constant 0 : index
    %140 = vector.load %arg9[%c1_74, %c0_75, %c0_76] : memref<8x8x32xf32, #tpu.memory_space<vmem>>, vector<1x8x32xf32>
    %141 = vector.shape_cast %140 : vector<1x8x32xf32> to vector<8x32xf32>
    %cst_77 = arith.constant dense<0.000000e+00> : vector<16x32xf32>
    %142 = tpu.matmul %139, %141, %cst_77 {dimension_numbers = #tpu.dot_dimension_numbers<[1], [0], [0], [1], [0, 0, 1, 1], [], []>} : vector<16x8xf32>, vector<8x32xf32>, vector<16x32xf32> -> vector<16x32xf32>
    %143 = arith.addf %84, %142 : vector<16x32xf32>
    %c2_78 = arith.constant 2 : index
    %c0_79 = arith.constant 0 : index
    %c0_80 = arith.constant 0 : index
    %144 = vector.load %arg6[%c2_78, %c0_79, %c0_80] : memref<8x32x8xf32, #tpu.memory_space<vmem>>, vector<1x32x8xf32>
    %145 = vector.shape_cast %144 : vector<1x32x8xf32> to vector<32x8xf32>
    %cst_81 = arith.constant dense<0.000000e+00> : vector<16x8xf32>
    %146 = tpu.matmul %24, %145, %cst_81 {dimension_numbers = #tpu.dot_dimension_numbers<[1], [0], [0], [1], [0, 0, 1, 1], [], []>} : vector<16x32xf32>, vector<32x8xf32>, vector<16x8xf32> -> vector<16x8xf32>
    %c2_82 = arith.constant 2 : index
    %c0_83 = arith.constant 0 : index
    %c0_84 = arith.constant 0 : index
    %147 = vector.load %arg7[%c2_82, %c0_83, %c0_84] : memref<8x32x8xf32, #tpu.memory_space<vmem>>, vector<1x32x8xf32>
    %148 = vector.shape_cast %147 : vector<1x32x8xf32> to vector<32x8xf32>
    %cst_85 = arith.constant dense<0.000000e+00> : vector<16x8xf32>
    %149 = tpu.matmul %24, %148, %cst_85 {dimension_numbers = #tpu.dot_dimension_numbers<[1], [0], [0], [1], [0, 0, 1, 1], [], []>} : vector<16x32xf32>, vector<32x8xf32>, vector<16x8xf32> -> vector<16x8xf32>
    %c2_86 = arith.constant 2 : index
    %c0_87 = arith.constant 0 : index
    %c0_88 = arith.constant 0 : index
    %150 = vector.load %arg8[%c2_86, %c0_87, %c0_88] : memref<8x32x8xf32, #tpu.memory_space<vmem>>, vector<1x32x8xf32>
    %151 = vector.shape_cast %150 : vector<1x32x8xf32> to vector<32x8xf32>
    %cst_89 = arith.constant dense<0.000000e+00> : vector<16x8xf32>
    %152 = tpu.matmul %24, %151, %cst_89 {dimension_numbers = #tpu.dot_dimension_numbers<[1], [0], [0], [1], [0, 0, 1, 1], [], []>} : vector<16x32xf32>, vector<32x8xf32>, vector<16x8xf32> -> vector<16x8xf32>
    %cst_90 = arith.constant dense<0.000000e+00> : vector<16x16xf32>
    %153 = tpu.matmul %146, %149, %cst_90 {dimension_numbers = #tpu.dot_dimension_numbers<[1], [1], [0], [0], [0, 0, 1, 0], [], []>} : vector<16x8xf32>, vector<16x8xf32>, vector<16x16xf32> -> vector<16x16xf32>
    %cst_91 = arith.constant 0.353553385 : f32
    %154 = vector.broadcast %cst_91 : f32 to vector<16x16xf32>
    %155 = arith.mulf %153, %154 : vector<16x16xf32>
    %c2_92 = arith.constant 2 : index
    %c0_93 = arith.constant 0 : index
    %156 = memref.load %arg3[%c2_92, %c0_93] : memref<8x8xf32, #tpu.memory_space<smem>>
    %157 = vector.broadcast %156 : f32 to vector<16x16xf32>
    %158 = arith.mulf %157, %5 : vector<16x16xf32>
    %159 = arith.addf %155, %158 : vector<16x16xf32>
    %c2_94 = arith.constant 2 : index
    %c1_95 = arith.constant 1 : index
    %160 = memref.load %arg3[%c2_94, %c1_95] : memref<8x8xf32, #tpu.memory_space<smem>>
    %161 = vector.broadcast %160 : f32 to vector<16x16xf32>
    %162 = arith.mulf %161, %7 : vector<16x16xf32>
    %163 = arith.addf %159, %162 : vector<16x16xf32>
    %c2_96 = arith.constant 2 : index
    %c2_97 = arith.constant 2 : index
    %164 = memref.load %arg3[%c2_96, %c2_97] : memref<8x8xf32, #tpu.memory_space<smem>>
    %165 = vector.broadcast %164 : f32 to vector<16x16xf32>
    %166 = arith.mulf %165, %9 : vector<16x16xf32>
    %167 = arith.addf %163, %166 : vector<16x16xf32>
    %c2_98 = arith.constant 2 : index
    %c3_99 = arith.constant 3 : index
    %168 = memref.load %arg3[%c2_98, %c3_99] : memref<8x8xf32, #tpu.memory_space<smem>>
    %169 = vector.broadcast %168 : f32 to vector<16x16xf32>
    %170 = arith.mulf %169, %11 : vector<16x16xf32>
    %171 = arith.addf %167, %170 : vector<16x16xf32>
    %c2_100 = arith.constant 2 : index
    %c4_101 = arith.constant 4 : index
    %172 = memref.load %arg3[%c2_100, %c4_101] : memref<8x8xf32, #tpu.memory_space<smem>>
    %173 = vector.broadcast %172 : f32 to vector<16x16xf32>
    %174 = arith.mulf %173, %13 : vector<16x16xf32>
    %175 = arith.addf %171, %174 : vector<16x16xf32>
    %c2_102 = arith.constant 2 : index
    %c5_103 = arith.constant 5 : index
    %176 = memref.load %arg3[%c2_102, %c5_103] : memref<8x8xf32, #tpu.memory_space<smem>>
    %177 = vector.broadcast %176 : f32 to vector<16x16xf32>
    %178 = arith.mulf %177, %15 : vector<16x16xf32>
    %179 = arith.addf %175, %178 : vector<16x16xf32>
    %c2_104 = arith.constant 2 : index
    %c6_105 = arith.constant 6 : index
    %180 = memref.load %arg3[%c2_104, %c6_105] : memref<8x8xf32, #tpu.memory_space<smem>>
    %181 = vector.broadcast %180 : f32 to vector<16x16xf32>
    %182 = arith.mulf %181, %17 : vector<16x16xf32>
    %183 = arith.addf %179, %182 : vector<16x16xf32>
    %c2_106 = arith.constant 2 : index
    %c7_107 = arith.constant 7 : index
    %184 = memref.load %arg3[%c2_106, %c7_107] : memref<8x8xf32, #tpu.memory_space<smem>>
    %185 = vector.broadcast %184 : f32 to vector<16x16xf32>
    %186 = arith.mulf %185, %19 : vector<16x16xf32>
    %187 = arith.addf %183, %186 : vector<16x16xf32>
    %cst_108 = arith.constant dense<0xFF800000> : vector<16xf32>
    %188 = vector.multi_reduction <maximumf>, %187, %cst_108 [1] : vector<16x16xf32> to vector<16xf32>
    %189 = vector.shape_cast %188 : vector<16xf32> to vector<16x1xf32>
    %190 = vector.broadcast %189 : vector<16x1xf32> to vector<16x16xf32>
    %191 = arith.subf %187, %190 : vector<16x16xf32>
    %192 = math.exp %191 : vector<16x16xf32>
    %cst_109 = arith.constant dense<0.000000e+00> : vector<16xf32>
    %193 = vector.multi_reduction <add>, %192, %cst_109 [1] : vector<16x16xf32> to vector<16xf32>
    %194 = vector.shape_cast %193 : vector<16xf32> to vector<16x1xf32>
    %195 = tpu.reciprocal %194 {approx = true} : vector<16x1xf32> -> vector<16x1xf32>
    %196 = vector.broadcast %195 : vector<16x1xf32> to vector<16x16xf32>
    %197 = arith.mulf %192, %196 : vector<16x16xf32>
    %cst_110 = arith.constant dense<0.000000e+00> : vector<16x8xf32>
    %198 = tpu.matmul %197, %152, %cst_110 {dimension_numbers = #tpu.dot_dimension_numbers<[1], [0], [0], [1], [0, 0, 1, 1], [], []>} : vector<16x16xf32>, vector<16x8xf32>, vector<16x8xf32> -> vector<16x8xf32>
    %c2_111 = arith.constant 2 : index
    %c0_112 = arith.constant 0 : index
    %c0_113 = arith.constant 0 : index
    %199 = vector.load %arg9[%c2_111, %c0_112, %c0_113] : memref<8x8x32xf32, #tpu.memory_space<vmem>>, vector<1x8x32xf32>
    %200 = vector.shape_cast %199 : vector<1x8x32xf32> to vector<8x32xf32>
    %cst_114 = arith.constant dense<0.000000e+00> : vector<16x32xf32>
    %201 = tpu.matmul %198, %200, %cst_114 {dimension_numbers = #tpu.dot_dimension_numbers<[1], [0], [0], [1], [0, 0, 1, 1], [], []>} : vector<16x8xf32>, vector<8x32xf32>, vector<16x32xf32> -> vector<16x32xf32>
    %202 = arith.addf %143, %201 : vector<16x32xf32>
    %c3_115 = arith.constant 3 : index
    %c0_116 = arith.constant 0 : index
    %c0_117 = arith.constant 0 : index
    %203 = vector.load %arg6[%c3_115, %c0_116, %c0_117] : memref<8x32x8xf32, #tpu.memory_space<vmem>>, vector<1x32x8xf32>
    %204 = vector.shape_cast %203 : vector<1x32x8xf32> to vector<32x8xf32>
    %cst_118 = arith.constant dense<0.000000e+00> : vector<16x8xf32>
    %205 = tpu.matmul %24, %204, %cst_118 {dimension_numbers = #tpu.dot_dimension_numbers<[1], [0], [0], [1], [0, 0, 1, 1], [], []>} : vector<16x32xf32>, vector<32x8xf32>, vector<16x8xf32> -> vector<16x8xf32>
    %c3_119 = arith.constant 3 : index
    %c0_120 = arith.constant 0 : index
    %c0_121 = arith.constant 0 : index
    %206 = vector.load %arg7[%c3_119, %c0_120, %c0_121] : memref<8x32x8xf32, #tpu.memory_space<vmem>>, vector<1x32x8xf32>
    %207 = vector.shape_cast %206 : vector<1x32x8xf32> to vector<32x8xf32>
    %cst_122 = arith.constant dense<0.000000e+00> : vector<16x8xf32>
    %208 = tpu.matmul %24, %207, %cst_122 {dimension_numbers = #tpu.dot_dimension_numbers<[1], [0], [0], [1], [0, 0, 1, 1], [], []>} : vector<16x32xf32>, vector<32x8xf32>, vector<16x8xf32> -> vector<16x8xf32>
    %c3_123 = arith.constant 3 : index
    %c0_124 = arith.constant 0 : index
    %c0_125 = arith.constant 0 : index
    %209 = vector.load %arg8[%c3_123, %c0_124, %c0_125] : memref<8x32x8xf32, #tpu.memory_space<vmem>>, vector<1x32x8xf32>
    %210 = vector.shape_cast %209 : vector<1x32x8xf32> to vector<32x8xf32>
    %cst_126 = arith.constant dense<0.000000e+00> : vector<16x8xf32>
    %211 = tpu.matmul %24, %210, %cst_126 {dimension_numbers = #tpu.dot_dimension_numbers<[1], [0], [0], [1], [0, 0, 1, 1], [], []>} : vector<16x32xf32>, vector<32x8xf32>, vector<16x8xf32> -> vector<16x8xf32>
    %cst_127 = arith.constant dense<0.000000e+00> : vector<16x16xf32>
    %212 = tpu.matmul %205, %208, %cst_127 {dimension_numbers = #tpu.dot_dimension_numbers<[1], [1], [0], [0], [0, 0, 1, 0], [], []>} : vector<16x8xf32>, vector<16x8xf32>, vector<16x16xf32> -> vector<16x16xf32>
    %cst_128 = arith.constant 0.353553385 : f32
    %213 = vector.broadcast %cst_128 : f32 to vector<16x16xf32>
    %214 = arith.mulf %212, %213 : vector<16x16xf32>
    %c3_129 = arith.constant 3 : index
    %c0_130 = arith.constant 0 : index
    %215 = memref.load %arg3[%c3_129, %c0_130] : memref<8x8xf32, #tpu.memory_space<smem>>
    %216 = vector.broadcast %215 : f32 to vector<16x16xf32>
    %217 = arith.mulf %216, %5 : vector<16x16xf32>
    %218 = arith.addf %214, %217 : vector<16x16xf32>
    %c3_131 = arith.constant 3 : index
    %c1_132 = arith.constant 1 : index
    %219 = memref.load %arg3[%c3_131, %c1_132] : memref<8x8xf32, #tpu.memory_space<smem>>
    %220 = vector.broadcast %219 : f32 to vector<16x16xf32>
    %221 = arith.mulf %220, %7 : vector<16x16xf32>
    %222 = arith.addf %218, %221 : vector<16x16xf32>
    %c3_133 = arith.constant 3 : index
    %c2_134 = arith.constant 2 : index
    %223 = memref.load %arg3[%c3_133, %c2_134] : memref<8x8xf32, #tpu.memory_space<smem>>
    %224 = vector.broadcast %223 : f32 to vector<16x16xf32>
    %225 = arith.mulf %224, %9 : vector<16x16xf32>
    %226 = arith.addf %222, %225 : vector<16x16xf32>
    %c3_135 = arith.constant 3 : index
    %c3_136 = arith.constant 3 : index
    %227 = memref.load %arg3[%c3_135, %c3_136] : memref<8x8xf32, #tpu.memory_space<smem>>
    %228 = vector.broadcast %227 : f32 to vector<16x16xf32>
    %229 = arith.mulf %228, %11 : vector<16x16xf32>
    %230 = arith.addf %226, %229 : vector<16x16xf32>
    %c3_137 = arith.constant 3 : index
    %c4_138 = arith.constant 4 : index
    %231 = memref.load %arg3[%c3_137, %c4_138] : memref<8x8xf32, #tpu.memory_space<smem>>
    %232 = vector.broadcast %231 : f32 to vector<16x16xf32>
    %233 = arith.mulf %232, %13 : vector<16x16xf32>
    %234 = arith.addf %230, %233 : vector<16x16xf32>
    %c3_139 = arith.constant 3 : index
    %c5_140 = arith.constant 5 : index
    %235 = memref.load %arg3[%c3_139, %c5_140] : memref<8x8xf32, #tpu.memory_space<smem>>
    %236 = vector.broadcast %235 : f32 to vector<16x16xf32>
    %237 = arith.mulf %236, %15 : vector<16x16xf32>
    %238 = arith.addf %234, %237 : vector<16x16xf32>
    %c3_141 = arith.constant 3 : index
    %c6_142 = arith.constant 6 : index
    %239 = memref.load %arg3[%c3_141, %c6_142] : memref<8x8xf32, #tpu.memory_space<smem>>
    %240 = vector.broadcast %239 : f32 to vector<16x16xf32>
    %241 = arith.mulf %240, %17 : vector<16x16xf32>
    %242 = arith.addf %238, %241 : vector<16x16xf32>
    %c3_143 = arith.constant 3 : index
    %c7_144 = arith.constant 7 : index
    %243 = memref.load %arg3[%c3_143, %c7_144] : memref<8x8xf32, #tpu.memory_space<smem>>
    %244 = vector.broadcast %243 : f32 to vector<16x16xf32>
    %245 = arith.mulf %244, %19 : vector<16x16xf32>
    %246 = arith.addf %242, %245 : vector<16x16xf32>
    %cst_145 = arith.constant dense<0xFF800000> : vector<16xf32>
    %247 = vector.multi_reduction <maximumf>, %246, %cst_145 [1] : vector<16x16xf32> to vector<16xf32>
    %248 = vector.shape_cast %247 : vector<16xf32> to vector<16x1xf32>
    %249 = vector.broadcast %248 : vector<16x1xf32> to vector<16x16xf32>
    %250 = arith.subf %246, %249 : vector<16x16xf32>
    %251 = math.exp %250 : vector<16x16xf32>
    %cst_146 = arith.constant dense<0.000000e+00> : vector<16xf32>
    %252 = vector.multi_reduction <add>, %251, %cst_146 [1] : vector<16x16xf32> to vector<16xf32>
    %253 = vector.shape_cast %252 : vector<16xf32> to vector<16x1xf32>
    %254 = tpu.reciprocal %253 {approx = true} : vector<16x1xf32> -> vector<16x1xf32>
    %255 = vector.broadcast %254 : vector<16x1xf32> to vector<16x16xf32>
    %256 = arith.mulf %251, %255 : vector<16x16xf32>
    %cst_147 = arith.constant dense<0.000000e+00> : vector<16x8xf32>
    %257 = tpu.matmul %256, %211, %cst_147 {dimension_numbers = #tpu.dot_dimension_numbers<[1], [0], [0], [1], [0, 0, 1, 1], [], []>} : vector<16x16xf32>, vector<16x8xf32>, vector<16x8xf32> -> vector<16x8xf32>
    %c3_148 = arith.constant 3 : index
    %c0_149 = arith.constant 0 : index
    %c0_150 = arith.constant 0 : index
    %258 = vector.load %arg9[%c3_148, %c0_149, %c0_150] : memref<8x8x32xf32, #tpu.memory_space<vmem>>, vector<1x8x32xf32>
    %259 = vector.shape_cast %258 : vector<1x8x32xf32> to vector<8x32xf32>
    %cst_151 = arith.constant dense<0.000000e+00> : vector<16x32xf32>
    %260 = tpu.matmul %257, %259, %cst_151 {dimension_numbers = #tpu.dot_dimension_numbers<[1], [0], [0], [1], [0, 0, 1, 1], [], []>} : vector<16x8xf32>, vector<8x32xf32>, vector<16x32xf32> -> vector<16x32xf32>
    %261 = arith.addf %202, %260 : vector<16x32xf32>
    %262 = arith.addf %24, %261 : vector<16x32xf32>
    %c0_152 = arith.constant 0 : index
    %c0_153 = arith.constant 0 : index
    %c0_154 = arith.constant 0 : index
    %263 = vector.load %arg10[%c0_152, %c0_153, %c0_154] : memref<2x1x32xf32, #tpu.memory_space<vmem>>, vector<1x1x32xf32>
    %264 = vector.shape_cast %263 : vector<1x1x32xf32> to vector<1x32xf32>
    %265 = vector.broadcast %264 : vector<1x32xf32> to vector<16x32xf32>
    %266 = arith.addf %262, %265 : vector<16x32xf32>
    %c0_155 = arith.constant 0 : index
    %c0_156 = arith.constant 0 : index
    %c0_157 = arith.constant 0 : index
    %267 = vector.load %arg11[%c0_155, %c0_156, %c0_157] : memref<2x32x32xf32, #tpu.memory_space<vmem>>, vector<1x32x32xf32>
    %268 = vector.shape_cast %267 : vector<1x32x32xf32> to vector<32x32xf32>
    %cst_158 = arith.constant dense<0.000000e+00> : vector<16x32xf32>
    %269 = tpu.matmul %266, %268, %cst_158 {dimension_numbers = #tpu.dot_dimension_numbers<[1], [0], [0], [1], [0, 0, 1, 1], [], []>} : vector<16x32xf32>, vector<32x32xf32>, vector<16x32xf32> -> vector<16x32xf32>
    %c0_159 = arith.constant 0 : index
    %c0_160 = arith.constant 0 : index
    %c0_161 = arith.constant 0 : index
    %270 = vector.load %arg12[%c0_159, %c0_160, %c0_161] : memref<2x1x32xf32, #tpu.memory_space<vmem>>, vector<1x1x32xf32>
    %271 = vector.shape_cast %270 : vector<1x1x32xf32> to vector<1x32xf32>
    %272 = vector.broadcast %271 : vector<1x32xf32> to vector<16x32xf32>
    %273 = arith.addf %269, %272 : vector<16x32xf32>
    %cst_162 = arith.constant 0.000000e+00 : f32
    %274 = vector.broadcast %cst_162 : f32 to vector<16x32xf32>
    %275 = arith.maximumf %273, %274 : vector<16x32xf32>
    %c0_163 = arith.constant 0 : index
    %c0_164 = arith.constant 0 : index
    %c0_165 = arith.constant 0 : index
    %276 = vector.load %arg13[%c0_163, %c0_164, %c0_165] : memref<2x32x32xf32, #tpu.memory_space<vmem>>, vector<1x32x32xf32>
    %277 = vector.shape_cast %276 : vector<1x32x32xf32> to vector<32x32xf32>
    %cst_166 = arith.constant dense<0.000000e+00> : vector<16x32xf32>
    %278 = tpu.matmul %275, %277, %cst_166 {dimension_numbers = #tpu.dot_dimension_numbers<[1], [0], [0], [1], [0, 0, 1, 1], [], []>} : vector<16x32xf32>, vector<32x32xf32>, vector<16x32xf32> -> vector<16x32xf32>
    %c0_167 = arith.constant 0 : index
    %c0_168 = arith.constant 0 : index
    %c0_169 = arith.constant 0 : index
    %279 = vector.load %arg14[%c0_167, %c0_168, %c0_169] : memref<2x1x32xf32, #tpu.memory_space<vmem>>, vector<1x1x32xf32>
    %280 = vector.shape_cast %279 : vector<1x1x32xf32> to vector<1x32xf32>
    %281 = vector.broadcast %280 : vector<1x32xf32> to vector<16x32xf32>
    %282 = arith.addf %278, %281 : vector<16x32xf32>
    %cst_170 = arith.constant 0.000000e+00 : f32
    %283 = vector.broadcast %cst_170 : f32 to vector<16x32xf32>
    %284 = arith.maximumf %282, %283 : vector<16x32xf32>
    %c0_171 = arith.constant 0 : index
    %c0_172 = arith.constant 0 : index
    %c0_173 = arith.constant 0 : index
    %285 = vector.load %arg15[%c0_171, %c0_172, %c0_173] : memref<2x32x32xf32, #tpu.memory_space<vmem>>, vector<1x32x32xf32>
    %286 = vector.shape_cast %285 : vector<1x32x32xf32> to vector<32x32xf32>
    %cst_174 = arith.constant dense<0.000000e+00> : vector<16x32xf32>
    %287 = tpu.matmul %284, %286, %cst_174 {dimension_numbers = #tpu.dot_dimension_numbers<[1], [0], [0], [1], [0, 0, 1, 1], [], []>} : vector<16x32xf32>, vector<32x32xf32>, vector<16x32xf32> -> vector<16x32xf32>
    %c0_175 = arith.constant 0 : index
    %c0_176 = arith.constant 0 : index
    %c0_177 = arith.constant 0 : index
    %288 = vector.load %arg16[%c0_175, %c0_176, %c0_177] : memref<2x1x32xf32, #tpu.memory_space<vmem>>, vector<1x1x32xf32>
    %289 = vector.shape_cast %288 : vector<1x1x32xf32> to vector<1x32xf32>
    %290 = vector.broadcast %289 : vector<1x32xf32> to vector<16x32xf32>
    %291 = arith.addf %287, %290 : vector<16x32xf32>
    %292 = arith.addf %266, %291 : vector<16x32xf32>
    %cst_178 = arith.constant 0.000000e+00 : f32
    %293 = vector.broadcast %cst_178 : f32 to vector<16x32xf32>
    %c4_179 = arith.constant 4 : index
    %c0_180 = arith.constant 0 : index
    %c0_181 = arith.constant 0 : index
    %294 = vector.load %arg6[%c4_179, %c0_180, %c0_181] : memref<8x32x8xf32, #tpu.memory_space<vmem>>, vector<1x32x8xf32>
    %295 = vector.shape_cast %294 : vector<1x32x8xf32> to vector<32x8xf32>
    %cst_182 = arith.constant dense<0.000000e+00> : vector<16x8xf32>
    %296 = tpu.matmul %292, %295, %cst_182 {dimension_numbers = #tpu.dot_dimension_numbers<[1], [0], [0], [1], [0, 0, 1, 1], [], []>} : vector<16x32xf32>, vector<32x8xf32>, vector<16x8xf32> -> vector<16x8xf32>
    %c4_183 = arith.constant 4 : index
    %c0_184 = arith.constant 0 : index
    %c0_185 = arith.constant 0 : index
    %297 = vector.load %arg7[%c4_183, %c0_184, %c0_185] : memref<8x32x8xf32, #tpu.memory_space<vmem>>, vector<1x32x8xf32>
    %298 = vector.shape_cast %297 : vector<1x32x8xf32> to vector<32x8xf32>
    %cst_186 = arith.constant dense<0.000000e+00> : vector<16x8xf32>
    %299 = tpu.matmul %292, %298, %cst_186 {dimension_numbers = #tpu.dot_dimension_numbers<[1], [0], [0], [1], [0, 0, 1, 1], [], []>} : vector<16x32xf32>, vector<32x8xf32>, vector<16x8xf32> -> vector<16x8xf32>
    %c4_187 = arith.constant 4 : index
    %c0_188 = arith.constant 0 : index
    %c0_189 = arith.constant 0 : index
    %300 = vector.load %arg8[%c4_187, %c0_188, %c0_189] : memref<8x32x8xf32, #tpu.memory_space<vmem>>, vector<1x32x8xf32>
    %301 = vector.shape_cast %300 : vector<1x32x8xf32> to vector<32x8xf32>
    %cst_190 = arith.constant dense<0.000000e+00> : vector<16x8xf32>
    %302 = tpu.matmul %292, %301, %cst_190 {dimension_numbers = #tpu.dot_dimension_numbers<[1], [0], [0], [1], [0, 0, 1, 1], [], []>} : vector<16x32xf32>, vector<32x8xf32>, vector<16x8xf32> -> vector<16x8xf32>
    %cst_191 = arith.constant dense<0.000000e+00> : vector<16x16xf32>
    %303 = tpu.matmul %296, %299, %cst_191 {dimension_numbers = #tpu.dot_dimension_numbers<[1], [1], [0], [0], [0, 0, 1, 0], [], []>} : vector<16x8xf32>, vector<16x8xf32>, vector<16x16xf32> -> vector<16x16xf32>
    %cst_192 = arith.constant 0.353553385 : f32
    %304 = vector.broadcast %cst_192 : f32 to vector<16x16xf32>
    %305 = arith.mulf %303, %304 : vector<16x16xf32>
    %c4_193 = arith.constant 4 : index
    %c0_194 = arith.constant 0 : index
    %306 = memref.load %arg3[%c4_193, %c0_194] : memref<8x8xf32, #tpu.memory_space<smem>>
    %307 = vector.broadcast %306 : f32 to vector<16x16xf32>
    %308 = arith.mulf %307, %5 : vector<16x16xf32>
    %309 = arith.addf %305, %308 : vector<16x16xf32>
    %c4_195 = arith.constant 4 : index
    %c1_196 = arith.constant 1 : index
    %310 = memref.load %arg3[%c4_195, %c1_196] : memref<8x8xf32, #tpu.memory_space<smem>>
    %311 = vector.broadcast %310 : f32 to vector<16x16xf32>
    %312 = arith.mulf %311, %7 : vector<16x16xf32>
    %313 = arith.addf %309, %312 : vector<16x16xf32>
    %c4_197 = arith.constant 4 : index
    %c2_198 = arith.constant 2 : index
    %314 = memref.load %arg3[%c4_197, %c2_198] : memref<8x8xf32, #tpu.memory_space<smem>>
    %315 = vector.broadcast %314 : f32 to vector<16x16xf32>
    %316 = arith.mulf %315, %9 : vector<16x16xf32>
    %317 = arith.addf %313, %316 : vector<16x16xf32>
    %c4_199 = arith.constant 4 : index
    %c3_200 = arith.constant 3 : index
    %318 = memref.load %arg3[%c4_199, %c3_200] : memref<8x8xf32, #tpu.memory_space<smem>>
    %319 = vector.broadcast %318 : f32 to vector<16x16xf32>
    %320 = arith.mulf %319, %11 : vector<16x16xf32>
    %321 = arith.addf %317, %320 : vector<16x16xf32>
    %c4_201 = arith.constant 4 : index
    %c4_202 = arith.constant 4 : index
    %322 = memref.load %arg3[%c4_201, %c4_202] : memref<8x8xf32, #tpu.memory_space<smem>>
    %323 = vector.broadcast %322 : f32 to vector<16x16xf32>
    %324 = arith.mulf %323, %13 : vector<16x16xf32>
    %325 = arith.addf %321, %324 : vector<16x16xf32>
    %c4_203 = arith.constant 4 : index
    %c5_204 = arith.constant 5 : index
    %326 = memref.load %arg3[%c4_203, %c5_204] : memref<8x8xf32, #tpu.memory_space<smem>>
    %327 = vector.broadcast %326 : f32 to vector<16x16xf32>
    %328 = arith.mulf %327, %15 : vector<16x16xf32>
    %329 = arith.addf %325, %328 : vector<16x16xf32>
    %c4_205 = arith.constant 4 : index
    %c6_206 = arith.constant 6 : index
    %330 = memref.load %arg3[%c4_205, %c6_206] : memref<8x8xf32, #tpu.memory_space<smem>>
    %331 = vector.broadcast %330 : f32 to vector<16x16xf32>
    %332 = arith.mulf %331, %17 : vector<16x16xf32>
    %333 = arith.addf %329, %332 : vector<16x16xf32>
    %c4_207 = arith.constant 4 : index
    %c7_208 = arith.constant 7 : index
    %334 = memref.load %arg3[%c4_207, %c7_208] : memref<8x8xf32, #tpu.memory_space<smem>>
    %335 = vector.broadcast %334 : f32 to vector<16x16xf32>
    %336 = arith.mulf %335, %19 : vector<16x16xf32>
    %337 = arith.addf %333, %336 : vector<16x16xf32>
    %cst_209 = arith.constant dense<0xFF800000> : vector<16xf32>
    %338 = vector.multi_reduction <maximumf>, %337, %cst_209 [1] : vector<16x16xf32> to vector<16xf32>
    %339 = vector.shape_cast %338 : vector<16xf32> to vector<16x1xf32>
    %340 = vector.broadcast %339 : vector<16x1xf32> to vector<16x16xf32>
    %341 = arith.subf %337, %340 : vector<16x16xf32>
    %342 = math.exp %341 : vector<16x16xf32>
    %cst_210 = arith.constant dense<0.000000e+00> : vector<16xf32>
    %343 = vector.multi_reduction <add>, %342, %cst_210 [1] : vector<16x16xf32> to vector<16xf32>
    %344 = vector.shape_cast %343 : vector<16xf32> to vector<16x1xf32>
    %345 = tpu.reciprocal %344 {approx = true} : vector<16x1xf32> -> vector<16x1xf32>
    %346 = vector.broadcast %345 : vector<16x1xf32> to vector<16x16xf32>
    %347 = arith.mulf %342, %346 : vector<16x16xf32>
    %cst_211 = arith.constant dense<0.000000e+00> : vector<16x8xf32>
    %348 = tpu.matmul %347, %302, %cst_211 {dimension_numbers = #tpu.dot_dimension_numbers<[1], [0], [0], [1], [0, 0, 1, 1], [], []>} : vector<16x16xf32>, vector<16x8xf32>, vector<16x8xf32> -> vector<16x8xf32>
    %c4_212 = arith.constant 4 : index
    %c0_213 = arith.constant 0 : index
    %c0_214 = arith.constant 0 : index
    %349 = vector.load %arg9[%c4_212, %c0_213, %c0_214] : memref<8x8x32xf32, #tpu.memory_space<vmem>>, vector<1x8x32xf32>
    %350 = vector.shape_cast %349 : vector<1x8x32xf32> to vector<8x32xf32>
    %cst_215 = arith.constant dense<0.000000e+00> : vector<16x32xf32>
    %351 = tpu.matmul %348, %350, %cst_215 {dimension_numbers = #tpu.dot_dimension_numbers<[1], [0], [0], [1], [0, 0, 1, 1], [], []>} : vector<16x8xf32>, vector<8x32xf32>, vector<16x32xf32> -> vector<16x32xf32>
    %352 = arith.addf %293, %351 : vector<16x32xf32>
    %c5_216 = arith.constant 5 : index
    %c0_217 = arith.constant 0 : index
    %c0_218 = arith.constant 0 : index
    %353 = vector.load %arg6[%c5_216, %c0_217, %c0_218] : memref<8x32x8xf32, #tpu.memory_space<vmem>>, vector<1x32x8xf32>
    %354 = vector.shape_cast %353 : vector<1x32x8xf32> to vector<32x8xf32>
    %cst_219 = arith.constant dense<0.000000e+00> : vector<16x8xf32>
    %355 = tpu.matmul %292, %354, %cst_219 {dimension_numbers = #tpu.dot_dimension_numbers<[1], [0], [0], [1], [0, 0, 1, 1], [], []>} : vector<16x32xf32>, vector<32x8xf32>, vector<16x8xf32> -> vector<16x8xf32>
    %c5_220 = arith.constant 5 : index
    %c0_221 = arith.constant 0 : index
    %c0_222 = arith.constant 0 : index
    %356 = vector.load %arg7[%c5_220, %c0_221, %c0_222] : memref<8x32x8xf32, #tpu.memory_space<vmem>>, vector<1x32x8xf32>
    %357 = vector.shape_cast %356 : vector<1x32x8xf32> to vector<32x8xf32>
    %cst_223 = arith.constant dense<0.000000e+00> : vector<16x8xf32>
    %358 = tpu.matmul %292, %357, %cst_223 {dimension_numbers = #tpu.dot_dimension_numbers<[1], [0], [0], [1], [0, 0, 1, 1], [], []>} : vector<16x32xf32>, vector<32x8xf32>, vector<16x8xf32> -> vector<16x8xf32>
    %c5_224 = arith.constant 5 : index
    %c0_225 = arith.constant 0 : index
    %c0_226 = arith.constant 0 : index
    %359 = vector.load %arg8[%c5_224, %c0_225, %c0_226] : memref<8x32x8xf32, #tpu.memory_space<vmem>>, vector<1x32x8xf32>
    %360 = vector.shape_cast %359 : vector<1x32x8xf32> to vector<32x8xf32>
    %cst_227 = arith.constant dense<0.000000e+00> : vector<16x8xf32>
    %361 = tpu.matmul %292, %360, %cst_227 {dimension_numbers = #tpu.dot_dimension_numbers<[1], [0], [0], [1], [0, 0, 1, 1], [], []>} : vector<16x32xf32>, vector<32x8xf32>, vector<16x8xf32> -> vector<16x8xf32>
    %cst_228 = arith.constant dense<0.000000e+00> : vector<16x16xf32>
    %362 = tpu.matmul %355, %358, %cst_228 {dimension_numbers = #tpu.dot_dimension_numbers<[1], [1], [0], [0], [0, 0, 1, 0], [], []>} : vector<16x8xf32>, vector<16x8xf32>, vector<16x16xf32> -> vector<16x16xf32>
    %cst_229 = arith.constant 0.353553385 : f32
    %363 = vector.broadcast %cst_229 : f32 to vector<16x16xf32>
    %364 = arith.mulf %362, %363 : vector<16x16xf32>
    %c5_230 = arith.constant 5 : index
    %c0_231 = arith.constant 0 : index
    %365 = memref.load %arg3[%c5_230, %c0_231] : memref<8x8xf32, #tpu.memory_space<smem>>
    %366 = vector.broadcast %365 : f32 to vector<16x16xf32>
    %367 = arith.mulf %366, %5 : vector<16x16xf32>
    %368 = arith.addf %364, %367 : vector<16x16xf32>
    %c5_232 = arith.constant 5 : index
    %c1_233 = arith.constant 1 : index
    %369 = memref.load %arg3[%c5_232, %c1_233] : memref<8x8xf32, #tpu.memory_space<smem>>
    %370 = vector.broadcast %369 : f32 to vector<16x16xf32>
    %371 = arith.mulf %370, %7 : vector<16x16xf32>
    %372 = arith.addf %368, %371 : vector<16x16xf32>
    %c5_234 = arith.constant 5 : index
    %c2_235 = arith.constant 2 : index
    %373 = memref.load %arg3[%c5_234, %c2_235] : memref<8x8xf32, #tpu.memory_space<smem>>
    %374 = vector.broadcast %373 : f32 to vector<16x16xf32>
    %375 = arith.mulf %374, %9 : vector<16x16xf32>
    %376 = arith.addf %372, %375 : vector<16x16xf32>
    %c5_236 = arith.constant 5 : index
    %c3_237 = arith.constant 3 : index
    %377 = memref.load %arg3[%c5_236, %c3_237] : memref<8x8xf32, #tpu.memory_space<smem>>
    %378 = vector.broadcast %377 : f32 to vector<16x16xf32>
    %379 = arith.mulf %378, %11 : vector<16x16xf32>
    %380 = arith.addf %376, %379 : vector<16x16xf32>
    %c5_238 = arith.constant 5 : index
    %c4_239 = arith.constant 4 : index
    %381 = memref.load %arg3[%c5_238, %c4_239] : memref<8x8xf32, #tpu.memory_space<smem>>
    %382 = vector.broadcast %381 : f32 to vector<16x16xf32>
    %383 = arith.mulf %382, %13 : vector<16x16xf32>
    %384 = arith.addf %380, %383 : vector<16x16xf32>
    %c5_240 = arith.constant 5 : index
    %c5_241 = arith.constant 5 : index
    %385 = memref.load %arg3[%c5_240, %c5_241] : memref<8x8xf32, #tpu.memory_space<smem>>
    %386 = vector.broadcast %385 : f32 to vector<16x16xf32>
    %387 = arith.mulf %386, %15 : vector<16x16xf32>
    %388 = arith.addf %384, %387 : vector<16x16xf32>
    %c5_242 = arith.constant 5 : index
    %c6_243 = arith.constant 6 : index
    %389 = memref.load %arg3[%c5_242, %c6_243] : memref<8x8xf32, #tpu.memory_space<smem>>
    %390 = vector.broadcast %389 : f32 to vector<16x16xf32>
    %391 = arith.mulf %390, %17 : vector<16x16xf32>
    %392 = arith.addf %388, %391 : vector<16x16xf32>
    %c5_244 = arith.constant 5 : index
    %c7_245 = arith.constant 7 : index
    %393 = memref.load %arg3[%c5_244, %c7_245] : memref<8x8xf32, #tpu.memory_space<smem>>
    %394 = vector.broadcast %393 : f32 to vector<16x16xf32>
    %395 = arith.mulf %394, %19 : vector<16x16xf32>
    %396 = arith.addf %392, %395 : vector<16x16xf32>
    %cst_246 = arith.constant dense<0xFF800000> : vector<16xf32>
    %397 = vector.multi_reduction <maximumf>, %396, %cst_246 [1] : vector<16x16xf32> to vector<16xf32>
    %398 = vector.shape_cast %397 : vector<16xf32> to vector<16x1xf32>
    %399 = vector.broadcast %398 : vector<16x1xf32> to vector<16x16xf32>
    %400 = arith.subf %396, %399 : vector<16x16xf32>
    %401 = math.exp %400 : vector<16x16xf32>
    %cst_247 = arith.constant dense<0.000000e+00> : vector<16xf32>
    %402 = vector.multi_reduction <add>, %401, %cst_247 [1] : vector<16x16xf32> to vector<16xf32>
    %403 = vector.shape_cast %402 : vector<16xf32> to vector<16x1xf32>
    %404 = tpu.reciprocal %403 {approx = true} : vector<16x1xf32> -> vector<16x1xf32>
    %405 = vector.broadcast %404 : vector<16x1xf32> to vector<16x16xf32>
    %406 = arith.mulf %401, %405 : vector<16x16xf32>
    %cst_248 = arith.constant dense<0.000000e+00> : vector<16x8xf32>
    %407 = tpu.matmul %406, %361, %cst_248 {dimension_numbers = #tpu.dot_dimension_numbers<[1], [0], [0], [1], [0, 0, 1, 1], [], []>} : vector<16x16xf32>, vector<16x8xf32>, vector<16x8xf32> -> vector<16x8xf32>
    %c5_249 = arith.constant 5 : index
    %c0_250 = arith.constant 0 : index
    %c0_251 = arith.constant 0 : index
    %408 = vector.load %arg9[%c5_249, %c0_250, %c0_251] : memref<8x8x32xf32, #tpu.memory_space<vmem>>, vector<1x8x32xf32>
    %409 = vector.shape_cast %408 : vector<1x8x32xf32> to vector<8x32xf32>
    %cst_252 = arith.constant dense<0.000000e+00> : vector<16x32xf32>
    %410 = tpu.matmul %407, %409, %cst_252 {dimension_numbers = #tpu.dot_dimension_numbers<[1], [0], [0], [1], [0, 0, 1, 1], [], []>} : vector<16x8xf32>, vector<8x32xf32>, vector<16x32xf32> -> vector<16x32xf32>
    %411 = arith.addf %352, %410 : vector<16x32xf32>
    %c6_253 = arith.constant 6 : index
    %c0_254 = arith.constant 0 : index
    %c0_255 = arith.constant 0 : index
    %412 = vector.load %arg6[%c6_253, %c0_254, %c0_255] : memref<8x32x8xf32, #tpu.memory_space<vmem>>, vector<1x32x8xf32>
    %413 = vector.shape_cast %412 : vector<1x32x8xf32> to vector<32x8xf32>
    %cst_256 = arith.constant dense<0.000000e+00> : vector<16x8xf32>
    %414 = tpu.matmul %292, %413, %cst_256 {dimension_numbers = #tpu.dot_dimension_numbers<[1], [0], [0], [1], [0, 0, 1, 1], [], []>} : vector<16x32xf32>, vector<32x8xf32>, vector<16x8xf32> -> vector<16x8xf32>
    %c6_257 = arith.constant 6 : index
    %c0_258 = arith.constant 0 : index
    %c0_259 = arith.constant 0 : index
    %415 = vector.load %arg7[%c6_257, %c0_258, %c0_259] : memref<8x32x8xf32, #tpu.memory_space<vmem>>, vector<1x32x8xf32>
    %416 = vector.shape_cast %415 : vector<1x32x8xf32> to vector<32x8xf32>
    %cst_260 = arith.constant dense<0.000000e+00> : vector<16x8xf32>
    %417 = tpu.matmul %292, %416, %cst_260 {dimension_numbers = #tpu.dot_dimension_numbers<[1], [0], [0], [1], [0, 0, 1, 1], [], []>} : vector<16x32xf32>, vector<32x8xf32>, vector<16x8xf32> -> vector<16x8xf32>
    %c6_261 = arith.constant 6 : index
    %c0_262 = arith.constant 0 : index
    %c0_263 = arith.constant 0 : index
    %418 = vector.load %arg8[%c6_261, %c0_262, %c0_263] : memref<8x32x8xf32, #tpu.memory_space<vmem>>, vector<1x32x8xf32>
    %419 = vector.shape_cast %418 : vector<1x32x8xf32> to vector<32x8xf32>
    %cst_264 = arith.constant dense<0.000000e+00> : vector<16x8xf32>
    %420 = tpu.matmul %292, %419, %cst_264 {dimension_numbers = #tpu.dot_dimension_numbers<[1], [0], [0], [1], [0, 0, 1, 1], [], []>} : vector<16x32xf32>, vector<32x8xf32>, vector<16x8xf32> -> vector<16x8xf32>
    %cst_265 = arith.constant dense<0.000000e+00> : vector<16x16xf32>
    %421 = tpu.matmul %414, %417, %cst_265 {dimension_numbers = #tpu.dot_dimension_numbers<[1], [1], [0], [0], [0, 0, 1, 0], [], []>} : vector<16x8xf32>, vector<16x8xf32>, vector<16x16xf32> -> vector<16x16xf32>
    %cst_266 = arith.constant 0.353553385 : f32
    %422 = vector.broadcast %cst_266 : f32 to vector<16x16xf32>
    %423 = arith.mulf %421, %422 : vector<16x16xf32>
    %c6_267 = arith.constant 6 : index
    %c0_268 = arith.constant 0 : index
    %424 = memref.load %arg3[%c6_267, %c0_268] : memref<8x8xf32, #tpu.memory_space<smem>>
    %425 = vector.broadcast %424 : f32 to vector<16x16xf32>
    %426 = arith.mulf %425, %5 : vector<16x16xf32>
    %427 = arith.addf %423, %426 : vector<16x16xf32>
    %c6_269 = arith.constant 6 : index
    %c1_270 = arith.constant 1 : index
    %428 = memref.load %arg3[%c6_269, %c1_270] : memref<8x8xf32, #tpu.memory_space<smem>>
    %429 = vector.broadcast %428 : f32 to vector<16x16xf32>
    %430 = arith.mulf %429, %7 : vector<16x16xf32>
    %431 = arith.addf %427, %430 : vector<16x16xf32>
    %c6_271 = arith.constant 6 : index
    %c2_272 = arith.constant 2 : index
    %432 = memref.load %arg3[%c6_271, %c2_272] : memref<8x8xf32, #tpu.memory_space<smem>>
    %433 = vector.broadcast %432 : f32 to vector<16x16xf32>
    %434 = arith.mulf %433, %9 : vector<16x16xf32>
    %435 = arith.addf %431, %434 : vector<16x16xf32>
    %c6_273 = arith.constant 6 : index
    %c3_274 = arith.constant 3 : index
    %436 = memref.load %arg3[%c6_273, %c3_274] : memref<8x8xf32, #tpu.memory_space<smem>>
    %437 = vector.broadcast %436 : f32 to vector<16x16xf32>
    %438 = arith.mulf %437, %11 : vector<16x16xf32>
    %439 = arith.addf %435, %438 : vector<16x16xf32>
    %c6_275 = arith.constant 6 : index
    %c4_276 = arith.constant 4 : index
    %440 = memref.load %arg3[%c6_275, %c4_276] : memref<8x8xf32, #tpu.memory_space<smem>>
    %441 = vector.broadcast %440 : f32 to vector<16x16xf32>
    %442 = arith.mulf %441, %13 : vector<16x16xf32>
    %443 = arith.addf %439, %442 : vector<16x16xf32>
    %c6_277 = arith.constant 6 : index
    %c5_278 = arith.constant 5 : index
    %444 = memref.load %arg3[%c6_277, %c5_278] : memref<8x8xf32, #tpu.memory_space<smem>>
    %445 = vector.broadcast %444 : f32 to vector<16x16xf32>
    %446 = arith.mulf %445, %15 : vector<16x16xf32>
    %447 = arith.addf %443, %446 : vector<16x16xf32>
    %c6_279 = arith.constant 6 : index
    %c6_280 = arith.constant 6 : index
    %448 = memref.load %arg3[%c6_279, %c6_280] : memref<8x8xf32, #tpu.memory_space<smem>>
    %449 = vector.broadcast %448 : f32 to vector<16x16xf32>
    %450 = arith.mulf %449, %17 : vector<16x16xf32>
    %451 = arith.addf %447, %450 : vector<16x16xf32>
    %c6_281 = arith.constant 6 : index
    %c7_282 = arith.constant 7 : index
    %452 = memref.load %arg3[%c6_281, %c7_282] : memref<8x8xf32, #tpu.memory_space<smem>>
    %453 = vector.broadcast %452 : f32 to vector<16x16xf32>
    %454 = arith.mulf %453, %19 : vector<16x16xf32>
    %455 = arith.addf %451, %454 : vector<16x16xf32>
    %cst_283 = arith.constant dense<0xFF800000> : vector<16xf32>
    %456 = vector.multi_reduction <maximumf>, %455, %cst_283 [1] : vector<16x16xf32> to vector<16xf32>
    %457 = vector.shape_cast %456 : vector<16xf32> to vector<16x1xf32>
    %458 = vector.broadcast %457 : vector<16x1xf32> to vector<16x16xf32>
    %459 = arith.subf %455, %458 : vector<16x16xf32>
    %460 = math.exp %459 : vector<16x16xf32>
    %cst_284 = arith.constant dense<0.000000e+00> : vector<16xf32>
    %461 = vector.multi_reduction <add>, %460, %cst_284 [1] : vector<16x16xf32> to vector<16xf32>
    %462 = vector.shape_cast %461 : vector<16xf32> to vector<16x1xf32>
    %463 = tpu.reciprocal %462 {approx = true} : vector<16x1xf32> -> vector<16x1xf32>
    %464 = vector.broadcast %463 : vector<16x1xf32> to vector<16x16xf32>
    %465 = arith.mulf %460, %464 : vector<16x16xf32>
    %cst_285 = arith.constant dense<0.000000e+00> : vector<16x8xf32>
    %466 = tpu.matmul %465, %420, %cst_285 {dimension_numbers = #tpu.dot_dimension_numbers<[1], [0], [0], [1], [0, 0, 1, 1], [], []>} : vector<16x16xf32>, vector<16x8xf32>, vector<16x8xf32> -> vector<16x8xf32>
    %c6_286 = arith.constant 6 : index
    %c0_287 = arith.constant 0 : index
    %c0_288 = arith.constant 0 : index
    %467 = vector.load %arg9[%c6_286, %c0_287, %c0_288] : memref<8x8x32xf32, #tpu.memory_space<vmem>>, vector<1x8x32xf32>
    %468 = vector.shape_cast %467 : vector<1x8x32xf32> to vector<8x32xf32>
    %cst_289 = arith.constant dense<0.000000e+00> : vector<16x32xf32>
    %469 = tpu.matmul %466, %468, %cst_289 {dimension_numbers = #tpu.dot_dimension_numbers<[1], [0], [0], [1], [0, 0, 1, 1], [], []>} : vector<16x8xf32>, vector<8x32xf32>, vector<16x32xf32> -> vector<16x32xf32>
    %470 = arith.addf %411, %469 : vector<16x32xf32>
    %c7_290 = arith.constant 7 : index
    %c0_291 = arith.constant 0 : index
    %c0_292 = arith.constant 0 : index
    %471 = vector.load %arg6[%c7_290, %c0_291, %c0_292] : memref<8x32x8xf32, #tpu.memory_space<vmem>>, vector<1x32x8xf32>
    %472 = vector.shape_cast %471 : vector<1x32x8xf32> to vector<32x8xf32>
    %cst_293 = arith.constant dense<0.000000e+00> : vector<16x8xf32>
    %473 = tpu.matmul %292, %472, %cst_293 {dimension_numbers = #tpu.dot_dimension_numbers<[1], [0], [0], [1], [0, 0, 1, 1], [], []>} : vector<16x32xf32>, vector<32x8xf32>, vector<16x8xf32> -> vector<16x8xf32>
    %c7_294 = arith.constant 7 : index
    %c0_295 = arith.constant 0 : index
    %c0_296 = arith.constant 0 : index
    %474 = vector.load %arg7[%c7_294, %c0_295, %c0_296] : memref<8x32x8xf32, #tpu.memory_space<vmem>>, vector<1x32x8xf32>
    %475 = vector.shape_cast %474 : vector<1x32x8xf32> to vector<32x8xf32>
    %cst_297 = arith.constant dense<0.000000e+00> : vector<16x8xf32>
    %476 = tpu.matmul %292, %475, %cst_297 {dimension_numbers = #tpu.dot_dimension_numbers<[1], [0], [0], [1], [0, 0, 1, 1], [], []>} : vector<16x32xf32>, vector<32x8xf32>, vector<16x8xf32> -> vector<16x8xf32>
    %c7_298 = arith.constant 7 : index
    %c0_299 = arith.constant 0 : index
    %c0_300 = arith.constant 0 : index
    %477 = vector.load %arg8[%c7_298, %c0_299, %c0_300] : memref<8x32x8xf32, #tpu.memory_space<vmem>>, vector<1x32x8xf32>
    %478 = vector.shape_cast %477 : vector<1x32x8xf32> to vector<32x8xf32>
    %cst_301 = arith.constant dense<0.000000e+00> : vector<16x8xf32>
    %479 = tpu.matmul %292, %478, %cst_301 {dimension_numbers = #tpu.dot_dimension_numbers<[1], [0], [0], [1], [0, 0, 1, 1], [], []>} : vector<16x32xf32>, vector<32x8xf32>, vector<16x8xf32> -> vector<16x8xf32>
    %cst_302 = arith.constant dense<0.000000e+00> : vector<16x16xf32>
    %480 = tpu.matmul %473, %476, %cst_302 {dimension_numbers = #tpu.dot_dimension_numbers<[1], [1], [0], [0], [0, 0, 1, 0], [], []>} : vector<16x8xf32>, vector<16x8xf32>, vector<16x16xf32> -> vector<16x16xf32>
    %cst_303 = arith.constant 0.353553385 : f32
    %481 = vector.broadcast %cst_303 : f32 to vector<16x16xf32>
    %482 = arith.mulf %480, %481 : vector<16x16xf32>
    %c7_304 = arith.constant 7 : index
    %c0_305 = arith.constant 0 : index
    %483 = memref.load %arg3[%c7_304, %c0_305] : memref<8x8xf32, #tpu.memory_space<smem>>
    %484 = vector.broadcast %483 : f32 to vector<16x16xf32>
    %485 = arith.mulf %484, %5 : vector<16x16xf32>
    %486 = arith.addf %482, %485 : vector<16x16xf32>
    %c7_306 = arith.constant 7 : index
    %c1_307 = arith.constant 1 : index
    %487 = memref.load %arg3[%c7_306, %c1_307] : memref<8x8xf32, #tpu.memory_space<smem>>
    %488 = vector.broadcast %487 : f32 to vector<16x16xf32>
    %489 = arith.mulf %488, %7 : vector<16x16xf32>
    %490 = arith.addf %486, %489 : vector<16x16xf32>
    %c7_308 = arith.constant 7 : index
    %c2_309 = arith.constant 2 : index
    %491 = memref.load %arg3[%c7_308, %c2_309] : memref<8x8xf32, #tpu.memory_space<smem>>
    %492 = vector.broadcast %491 : f32 to vector<16x16xf32>
    %493 = arith.mulf %492, %9 : vector<16x16xf32>
    %494 = arith.addf %490, %493 : vector<16x16xf32>
    %c7_310 = arith.constant 7 : index
    %c3_311 = arith.constant 3 : index
    %495 = memref.load %arg3[%c7_310, %c3_311] : memref<8x8xf32, #tpu.memory_space<smem>>
    %496 = vector.broadcast %495 : f32 to vector<16x16xf32>
    %497 = arith.mulf %496, %11 : vector<16x16xf32>
    %498 = arith.addf %494, %497 : vector<16x16xf32>
    %c7_312 = arith.constant 7 : index
    %c4_313 = arith.constant 4 : index
    %499 = memref.load %arg3[%c7_312, %c4_313] : memref<8x8xf32, #tpu.memory_space<smem>>
    %500 = vector.broadcast %499 : f32 to vector<16x16xf32>
    %501 = arith.mulf %500, %13 : vector<16x16xf32>
    %502 = arith.addf %498, %501 : vector<16x16xf32>
    %c7_314 = arith.constant 7 : index
    %c5_315 = arith.constant 5 : index
    %503 = memref.load %arg3[%c7_314, %c5_315] : memref<8x8xf32, #tpu.memory_space<smem>>
    %504 = vector.broadcast %503 : f32 to vector<16x16xf32>
    %505 = arith.mulf %504, %15 : vector<16x16xf32>
    %506 = arith.addf %502, %505 : vector<16x16xf32>
    %c7_316 = arith.constant 7 : index
    %c6_317 = arith.constant 6 : index
    %507 = memref.load %arg3[%c7_316, %c6_317] : memref<8x8xf32, #tpu.memory_space<smem>>
    %508 = vector.broadcast %507 : f32 to vector<16x16xf32>
    %509 = arith.mulf %508, %17 : vector<16x16xf32>
    %510 = arith.addf %506, %509 : vector<16x16xf32>
    %c7_318 = arith.constant 7 : index
    %c7_319 = arith.constant 7 : index
    %511 = memref.load %arg3[%c7_318, %c7_319] : memref<8x8xf32, #tpu.memory_space<smem>>
    %512 = vector.broadcast %511 : f32 to vector<16x16xf32>
    %513 = arith.mulf %512, %19 : vector<16x16xf32>
    %514 = arith.addf %510, %513 : vector<16x16xf32>
    %cst_320 = arith.constant dense<0xFF800000> : vector<16xf32>
    %515 = vector.multi_reduction <maximumf>, %514, %cst_320 [1] : vector<16x16xf32> to vector<16xf32>
    %516 = vector.shape_cast %515 : vector<16xf32> to vector<16x1xf32>
    %517 = vector.broadcast %516 : vector<16x1xf32> to vector<16x16xf32>
    %518 = arith.subf %514, %517 : vector<16x16xf32>
    %519 = math.exp %518 : vector<16x16xf32>
    %cst_321 = arith.constant dense<0.000000e+00> : vector<16xf32>
    %520 = vector.multi_reduction <add>, %519, %cst_321 [1] : vector<16x16xf32> to vector<16xf32>
    %521 = vector.shape_cast %520 : vector<16xf32> to vector<16x1xf32>
    %522 = tpu.reciprocal %521 {approx = true} : vector<16x1xf32> -> vector<16x1xf32>
    %523 = vector.broadcast %522 : vector<16x1xf32> to vector<16x16xf32>
    %524 = arith.mulf %519, %523 : vector<16x16xf32>
    %cst_322 = arith.constant dense<0.000000e+00> : vector<16x8xf32>
    %525 = tpu.matmul %524, %479, %cst_322 {dimension_numbers = #tpu.dot_dimension_numbers<[1], [0], [0], [1], [0, 0, 1, 1], [], []>} : vector<16x16xf32>, vector<16x8xf32>, vector<16x8xf32> -> vector<16x8xf32>
    %c7_323 = arith.constant 7 : index
    %c0_324 = arith.constant 0 : index
    %c0_325 = arith.constant 0 : index
    %526 = vector.load %arg9[%c7_323, %c0_324, %c0_325] : memref<8x8x32xf32, #tpu.memory_space<vmem>>, vector<1x8x32xf32>
    %527 = vector.shape_cast %526 : vector<1x8x32xf32> to vector<8x32xf32>
    %cst_326 = arith.constant dense<0.000000e+00> : vector<16x32xf32>
    %528 = tpu.matmul %525, %527, %cst_326 {dimension_numbers = #tpu.dot_dimension_numbers<[1], [0], [0], [1], [0, 0, 1, 1], [], []>} : vector<16x8xf32>, vector<8x32xf32>, vector<16x32xf32> -> vector<16x32xf32>
    %529 = arith.addf %470, %528 : vector<16x32xf32>
    %530 = arith.addf %292, %529 : vector<16x32xf32>
    %c1_327 = arith.constant 1 : index
    %c0_328 = arith.constant 0 : index
    %c0_329 = arith.constant 0 : index
    %531 = vector.load %arg10[%c1_327, %c0_328, %c0_329] : memref<2x1x32xf32, #tpu.memory_space<vmem>>, vector<1x1x32xf32>
    %532 = vector.shape_cast %531 : vector<1x1x32xf32> to vector<1x32xf32>
    %533 = vector.broadcast %532 : vector<1x32xf32> to vector<16x32xf32>
    %534 = arith.addf %530, %533 : vector<16x32xf32>
    %c1_330 = arith.constant 1 : index
    %c0_331 = arith.constant 0 : index
    %c0_332 = arith.constant 0 : index
    %535 = vector.load %arg11[%c1_330, %c0_331, %c0_332] : memref<2x32x32xf32, #tpu.memory_space<vmem>>, vector<1x32x32xf32>
    %536 = vector.shape_cast %535 : vector<1x32x32xf32> to vector<32x32xf32>
    %cst_333 = arith.constant dense<0.000000e+00> : vector<16x32xf32>
    %537 = tpu.matmul %534, %536, %cst_333 {dimension_numbers = #tpu.dot_dimension_numbers<[1], [0], [0], [1], [0, 0, 1, 1], [], []>} : vector<16x32xf32>, vector<32x32xf32>, vector<16x32xf32> -> vector<16x32xf32>
    %c1_334 = arith.constant 1 : index
    %c0_335 = arith.constant 0 : index
    %c0_336 = arith.constant 0 : index
    %538 = vector.load %arg12[%c1_334, %c0_335, %c0_336] : memref<2x1x32xf32, #tpu.memory_space<vmem>>, vector<1x1x32xf32>
    %539 = vector.shape_cast %538 : vector<1x1x32xf32> to vector<1x32xf32>
    %540 = vector.broadcast %539 : vector<1x32xf32> to vector<16x32xf32>
    %541 = arith.addf %537, %540 : vector<16x32xf32>
    %cst_337 = arith.constant 0.000000e+00 : f32
    %542 = vector.broadcast %cst_337 : f32 to vector<16x32xf32>
    %543 = arith.maximumf %541, %542 : vector<16x32xf32>
    %c1_338 = arith.constant 1 : index
    %c0_339 = arith.constant 0 : index
    %c0_340 = arith.constant 0 : index
    %544 = vector.load %arg13[%c1_338, %c0_339, %c0_340] : memref<2x32x32xf32, #tpu.memory_space<vmem>>, vector<1x32x32xf32>
    %545 = vector.shape_cast %544 : vector<1x32x32xf32> to vector<32x32xf32>
    %cst_341 = arith.constant dense<0.000000e+00> : vector<16x32xf32>
    %546 = tpu.matmul %543, %545, %cst_341 {dimension_numbers = #tpu.dot_dimension_numbers<[1], [0], [0], [1], [0, 0, 1, 1], [], []>} : vector<16x32xf32>, vector<32x32xf32>, vector<16x32xf32> -> vector<16x32xf32>
    %c1_342 = arith.constant 1 : index
    %c0_343 = arith.constant 0 : index
    %c0_344 = arith.constant 0 : index
    %547 = vector.load %arg14[%c1_342, %c0_343, %c0_344] : memref<2x1x32xf32, #tpu.memory_space<vmem>>, vector<1x1x32xf32>
    %548 = vector.shape_cast %547 : vector<1x1x32xf32> to vector<1x32xf32>
    %549 = vector.broadcast %548 : vector<1x32xf32> to vector<16x32xf32>
    %550 = arith.addf %546, %549 : vector<16x32xf32>
    %cst_345 = arith.constant 0.000000e+00 : f32
    %551 = vector.broadcast %cst_345 : f32 to vector<16x32xf32>
    %552 = arith.maximumf %550, %551 : vector<16x32xf32>
    %c1_346 = arith.constant 1 : index
    %c0_347 = arith.constant 0 : index
    %c0_348 = arith.constant 0 : index
    %553 = vector.load %arg15[%c1_346, %c0_347, %c0_348] : memref<2x32x32xf32, #tpu.memory_space<vmem>>, vector<1x32x32xf32>
    %554 = vector.shape_cast %553 : vector<1x32x32xf32> to vector<32x32xf32>
    %cst_349 = arith.constant dense<0.000000e+00> : vector<16x32xf32>
    %555 = tpu.matmul %552, %554, %cst_349 {dimension_numbers = #tpu.dot_dimension_numbers<[1], [0], [0], [1], [0, 0, 1, 1], [], []>} : vector<16x32xf32>, vector<32x32xf32>, vector<16x32xf32> -> vector<16x32xf32>
    %c1_350 = arith.constant 1 : index
    %c0_351 = arith.constant 0 : index
    %c0_352 = arith.constant 0 : index
    %556 = vector.load %arg16[%c1_350, %c0_351, %c0_352] : memref<2x1x32xf32, #tpu.memory_space<vmem>>, vector<1x1x32xf32>
    %557 = vector.shape_cast %556 : vector<1x1x32xf32> to vector<1x32xf32>
    %558 = vector.broadcast %557 : vector<1x32xf32> to vector<16x32xf32>
    %559 = arith.addf %555, %558 : vector<16x32xf32>
    %560 = arith.addf %534, %559 : vector<16x32xf32>
    %c0_353 = arith.constant 0 : index
    %c0_354 = arith.constant 0 : index
    %c0_355 = arith.constant 0 : index
    %561 = vector.load %arg17[%c0_353, %c0_354, %c0_355] : memref<1x16x32xf32, #tpu.memory_space<vmem>>, vector<1x16x32xf32>
    %562 = vector.shape_cast %561 : vector<1x16x32xf32> to vector<16x32xf32>
    %563 = vector.shape_cast %560 : vector<16x32xf32> to vector<1x16x32xf32>
    tpu.vector_store %arg17[%c0_353, %c0_354, %c0_355], %563 {strides = array<i32>} : memref<1x16x32xf32, #tpu.memory_space<vmem>>, vector<1x16x32xf32>,
    return
  }
  func.func @transform_0(%arg0: i32) -> (i32, i32, i32) {
    %c0_i32 = arith.constant 0 : i32
    %c0_i32_0 = arith.constant 0 : i32
    %c0_i32_1 = arith.constant 0 : i32
    return %arg0, %c0_i32, %c0_i32_0 : i32, i32, i32
  }
  func.func @transform_1(%arg0: i32) -> (i32, i32, i32, i32) {
    %c0_i32 = arith.constant 0 : i32
    %c0_i32_0 = arith.constant 0 : i32
    %c0_i32_1 = arith.constant 0 : i32
    %c0_i32_2 = arith.constant 0 : i32
    return %arg0, %c0_i32, %c0_i32_0, %c0_i32_1 : i32, i32, i32, i32
  }
  func.func @transform_2(%arg0: i32) -> (i32, i32) {
    %c0_i32 = arith.constant 0 : i32
    %c0_i32_0 = arith.constant 0 : i32
    %c0_i32_1 = arith.constant 0 : i32
    return %c0_i32, %c0_i32_0 : i32, i32
  }
  func.func @transform_3(%arg0: i32) -> (i32, i32) {
    %c0_i32 = arith.constant 0 : i32
    %c0_i32_0 = arith.constant 0 : i32
    %c0_i32_1 = arith.constant 0 : i32
    return %c0_i32, %c0_i32_0 : i32, i32
  }
  func.func @transform_4(%arg0: i32) -> (i32, i32) {
    %c0_i32 = arith.constant 0 : i32
    %c0_i32_0 = arith.constant 0 : i32
    %c0_i32_1 = arith.constant 0 : i32
    return %c0_i32, %c0_i32_0 : i32, i32
  }
  func.func @transform_5(%arg0: i32) -> (i32, i32, i32) {
    %c0_i32 = arith.constant 0 : i32
    %c0_i32_0 = arith.constant 0 : i32
    %c0_i32_1 = arith.constant 0 : i32
    %c0_i32_2 = arith.constant 0 : i32
    return %c0_i32, %c0_i32_0, %c0_i32_1 : i32, i32, i32
  }
  func.func @transform_6(%arg0: i32) -> (i32, i32, i32) {
    %c0_i32 = arith.constant 0 : i32
    %c0_i32_0 = arith.constant 0 : i32
    %c0_i32_1 = arith.constant 0 : i32
    %c0_i32_2 = arith.constant 0 : i32
    return %c0_i32, %c0_i32_0, %c0_i32_1 : i32, i32, i32
  }
  func.func @transform_7(%arg0: i32) -> (i32, i32, i32) {
    %c0_i32 = arith.constant 0 : i32
    %c0_i32_0 = arith.constant 0 : i32
    %c0_i32_1 = arith.constant 0 : i32
    %c0_i32_2 = arith.constant 0 : i32
    return %c0_i32, %c0_i32_0, %c0_i32_1 : i32, i32, i32
  }
  func.func @transform_8(%arg0: i32) -> (i32, i32, i32) {
    %c0_i32 = arith.constant 0 : i32
    %c0_i32_0 = arith.constant 0 : i32
    %c0_i32_1 = arith.constant 0 : i32
    %c0_i32_2 = arith.constant 0 : i32
    return %c0_i32, %c0_i32_0, %c0_i32_1 : i32, i32, i32
  }
  func.func @transform_9(%arg0: i32) -> (i32, i32, i32) {
    %c0_i32 = arith.constant 0 : i32
    %c0_i32_0 = arith.constant 0 : i32
    %c0_i32_1 = arith.constant 0 : i32
    %c0_i32_2 = arith.constant 0 : i32
    return %c0_i32, %c0_i32_0, %c0_i32_1 : i32, i32, i32
  }
  func.func @transform_10(%arg0: i32) -> (i32, i32, i32) {
    %c0_i32 = arith.constant 0 : i32
    %c0_i32_0 = arith.constant 0 : i32
    %c0_i32_1 = arith.constant 0 : i32
    %c0_i32_2 = arith.constant 0 : i32
    return %c0_i32, %c0_i32_0, %c0_i32_1 : i32, i32, i32
  }
  func.func @transform_11(%arg0: i32) -> (i32, i32, i32) {
    %c0_i32 = arith.constant 0 : i32
    %c0_i32_0 = arith.constant 0 : i32
    %c0_i32_1 = arith.constant 0 : i32
    %c0_i32_2 = arith.constant 0 : i32
    return %c0_i32, %c0_i32_0, %c0_i32_1 : i32, i32, i32
  }
  func.func @transform_12(%arg0: i32) -> (i32, i32, i32) {
    %c0_i32 = arith.constant 0 : i32
    %c0_i32_0 = arith.constant 0 : i32
    %c0_i32_1 = arith.constant 0 : i32
    %c0_i32_2 = arith.constant 0 : i32
    return %c0_i32, %c0_i32_0, %c0_i32_1 : i32, i32, i32
  }
  func.func @transform_13(%arg0: i32) -> (i32, i32, i32) {
    %c0_i32 = arith.constant 0 : i32
    %c0_i32_0 = arith.constant 0 : i32
    %c0_i32_1 = arith.constant 0 : i32
    %c0_i32_2 = arith.constant 0 : i32
    return %c0_i32, %c0_i32_0, %c0_i32_1 : i32, i32, i32
  }
  func.func @transform_14(%arg0: i32) -> (i32, i32, i32) {
    %c0_i32 = arith.constant 0 : i32
    %c0_i32_0 = arith.constant 0 : i32
    %c0_i32_1 = arith.constant 0 : i32
    %c0_i32_2 = arith.constant 0 : i32
    return %c0_i32, %c0_i32_0, %c0_i32_1 : i32, i32, i32
  }
  func.func @transform_15(%arg0: i32) -> (i32, i32, i32) {
    %c0_i32 = arith.constant 0 : i32
    %c0_i32_0 = arith.constant 0 : i32
    %c0_i32_1 = arith.constant 0 : i32
    %c0_i32_2 = arith.constant 0 : i32
    return %c0_i32, %c0_i32_0, %c0_i32_1 : i32, i32, i32
  }
  func.func @transform_16(%arg0: i32) -> (i32, i32, i32) {
    %c0_i32 = arith.constant 0 : i32
    %c0_i32_0 = arith.constant 0 : i32
    %c0_i32_1 = arith.constant 0 : i32
    return %arg0, %c0_i32, %c0_i32_0 : i32, i32, i32
  }
}

</mosaic_0001>

<bundles_post_ra>
// kernel: tpu_custom_call.1
= control target key start
LH: loop header
LB: loop body
LE: loop exit
PB: predicated region body
PF: predicated region fallthrough
CT: control target
= control target key end

     0   :  { %s8716_s0 = inlined_call_operand.vmem [shape: f32[2,16,16], index: 0, kind: input, shape index: {}]   ;;  %s8717_s1 = inlined_call_operand.vmem [shape: f32[2,8,16,16], index: 1, kind: input, shape index: {}]   ;;  %s8718_s2 = inlined_call_operand.vmem [shape: f32[8,8], index: 2, kind: input, shape index: {}]   ;;  %s8719_s3 = inlined_call_operand.vmem [shape: f32[16,32], index: 3, kind: input, shape index: {}]   ;;  %s8720_s4 = inlined_call_operand.vmem [shape: f32[1,32], index: 4, kind: input, shape index: {}]   ;;  %s8721_s5 = inlined_call_operand.vmem [shape: f32[8,32,8], index: 5, kind: input, shape index: {}]   ;;  %s8722_s6 = inlined_call_operand.vmem [shape: f32[8,32,8], index: 6, kind: input, shape index: {}]   ;;  %s8723_s7 = inlined_call_operand.vmem [shape: f32[8,32,8], index: 7, kind: input, shape index: {}]   ;;  %s8724_s8 = inlined_call_operand.vmem [shape: f32[8,8,32], index: 8, kind: input, shape index: {}]   ;;  %s8725_s9 = inlined_call_operand.vmem [shape: f32[2,1,32], index: 9, kind: input, shape index: {}]   ;;  %s8726_s10 = inlined_call_operand.vmem [shape: f32[2,32,32], index: 10, kind: input, shape index: {}]   ;;  %s8727_s11 = inlined_call_operand.vmem [shape: f32[2,1,32], index: 11, kind: input, shape index: {}]   ;;  %s8728_s12 = inlined_call_operand.vmem [shape: f32[2,32,32], index: 12, kind: input, shape index: {}]   ;;  %s8729_s13 = inlined_call_operand.vmem [shape: f32[2,1,32], index: 13, kind: input, shape index: {}]   ;;  %s8730_s14 = inlined_call_operand.vmem [shape: f32[2,32,32], index: 14, kind: input, shape index: {}]   ;;  %s8731_s15 = inlined_call_operand.vmem [shape: f32[2,1,32], index: 15, kind: input, shape index: {}]   ;;  %s8732_s16 = inlined_call_operand.hbm [shape: f32[2,16,32], index: 16, kind: output, shape index: {}]  }
   0x1   :  { %8736 = sst [smem:[#allocation11_spill]] %s8716_s0 }
   0x2   :  { %8737 = sst [smem:[#allocation12_spill]] %s8718_s2 }
   0x3   :  { %8738 = sst [smem:[#allocation13_spill]] %s8719_s3 }
   0x4   :  { %21 = vsyncpa [#allocation4], 0 }
   0x5   :  { %22 = vsyncpa [#allocation3], 0 }
   0x6   :  { %24 = vsyncpa [#allocation3 + $0x1], 0  ;;  %s7605_s21 = smov 0   ;;  %s7607_s22 = smov 0  }
   0x7   :  { %s7609_s23 = smov 0   ;;  %s7611_s24 = smov 0  }
   0x8 LB: > { %8739 = sst [smem:[#allocation8_spill]] %s7510_s23  ;;  %s7626_s25 = sadd.s32 4294967295, %s7514_s24   ;;  %s7514_s24 = sphi %s7611_s24, %s8750_s24   ;;  %s7510_s23 = sphi %s7609_s23, %s8752_s23   ;;  %s7506_s22 = sphi %s7607_s22, %s8754_s22   ;;  %s7502_s21 = sphi %s7605_s21, %s8753_s21  }
   0x9   : > { %s5880_s26 = sadd.s32 4294967294, %s7514_s24   ;;  %s7630_s27 = sadd.s32 1, %s7514_s24  }
   0xa   : > { %8740 = sst [smem:[#allocation9_spill]] %s7630_s27  ;;  %s383_s28 = sadd.s32 1, %s7510_s23 }
   0xb   : > { %s380_s29 = ssub.s32 %s7514_s24, %s7630_s27  ;;  %p393_p0 = scmp.ne.s32.totalorder %s7510_s23, %s7506_s22 }
   0xc   : > { %p381_p1 = scmp.eq.s32.totalorder %s380_s29, 0  ;;  %p394_p2 = scmp.eq.s32.totalorder %s7626_s25, 1 }
   0xd   : > { %p399_p3 = scmp.ne.s32.totalorder %s7506_s22, %s7502_s21  ;;  %p400_p4 = scmp.eq.s32.totalorder %s5880_s26, 1 }
   0xe   : > { %s7641_s30 = scalar_select %p381_p1, %s7510_s23, %s383_s28  }
   0xf   : > { %p7643_p5 = por %p394_p2, %p393_p0  ;;  %p7647_p6 = por %p400_p4, %p399_p3 }
  0x10   : > { %8741 = sst [smem:[#allocation10_spill]] %s7641_s30  ;;  %p5881_p7 = scmp.ge.s32.totalorder %s7514_s24, 1 }
  0x11   : > { %p407_p8 = scmp.lt.s32.totalorder %s7514_s24, 3  ;;  %p7315_p9 = scmp.eq.s32.totalorder %s7626_s25, 0 }
  0x12   : > { %s8745_s2 = sld [smem:[#allocation12_spill]] }
  0x13   : > { %p7654_p10 = pnand %p5881_p7, %p407_p8 }
  0x15   : > { %p7307_p11 = pneg %p7654_p10 }
  0x17   : > { %p7308_p12 = pnand %p7315_p9, %p7307_p11 }
  0x18   : > { %s420_s26 = sshll.u32 %s8745_s2, 4  ;;  %s421_s26 = int_to_ptr.vmem [resolvable:$true] %s420_s26 }
  0x19   : > { %s7433_s28 = scalar_lea.vmem %s421_s26, 128  ;;  %p7435_p0 = pneg %p7308_p12 }
  0x1a   : > { %p7434_p13 = scmp.ne.s32.totalorder %s421_s26, %s7433_s28  ;;  %p7441_p3 = scmp.lt.s32.totalorder %s421_s26, %s421_s26 }
  0x1b   : > { %p7442_p4 = scmp.lt.s32.totalorder %s7433_s28, %s7433_s28 }
  0x1c   : > { %p7436_p1 = pnand %p7435_p0, %p7434_p13 }
  0x1d   : > { %p7443_p7 = por %p7442_p4, %p7441_p3 }
  0x1e   : > { %p7437_p2 = pneg %p7436_p1 }
  0x20   : > { %p7444_p8 = pnand %p7443_p7, %p7437_p2 }
  0x22   : > { %7447 = shalt.err (!%p7444_p8)
}
  0x23   : > { %s7516_s29 = smov [#allocation2]   ;;  %488 = sbr.rel (%p7654_p10) target bundleno = 9535 (0x253f), region = 84 }
  0x24   : > { %7310 = dma.vmem_to_smem (!%p7308_p12), %s421_s26, 128, %s7516_s29, [#allocation4]  }
  0x2a   : > { %7493 = dma.done.wait (%p7315_p9), [#allocation4], 128  }
  0x2b   : > { %7495 = vsyncadd (%p7315_p9), [#allocation4], 4294967168 }
  0x2c   : > { %494 = sfence }
  0x2d   : > { %s8746_s3 = sld [smem:[#allocation13_spill]]  ;;  %p544_p11 = scmp.lt.s32.totalorder %s7626_s25, 1  ;;  %v663_v2 = vld [vmem:[%s8721_s5] sm:$0xff]  ;;  %v664_v4 = vld [vmem:[%s8721_s5 + $0x8] sm:$0xff]  ;;  %vm581_vm0 = vcmask 130048   ;;  %v665_v11 = vld [vmem:[%s8721_s5 + $0x10] sm:$0xff] }
  0x2e   : > { %v749_v5 = vld [vmem:[%s8722_s6] sm:$0xff]  ;;  %v750_v6 = vld [vmem:[%s8722_s6 + $0x8] sm:$0xff]  ;;  %v6969_v7 = vpack.c.bf16 %v664_v4, %v663_v2  ;;  %s8747_s26 = sld [smem:[#allocation11_spill]]  ;;  %v666_v12 = vld [vmem:[%s8721_s5 + $0x18] sm:$0xff]  ;;  %vm667_vm1 = vcmask 261120   ;;  %vm907_vm2 = vcmask 64512  }
  0x2f   : > { %s7691_s2 = scalar_select %p544_p11, %s7626_s25, 1  ;;  %v6977_v8 = vpack.c.bf16 %v750_v6, %v749_v5  ;;  %v6973_v13 = vpack.c.bf16 %v666_v12, %v665_v11  ;;  %v751_v14 = vld [vmem:[%s8722_s6 + $0x10] sm:$0xff]  ;;  %v752_v15 = vld [vmem:[%s8722_s6 + $0x18] sm:$0xff]  ;;  %v828_v17 = vld [vmem:[%s8723_s7] sm:$0xff] }
  0x30   : > { %6970 = vmatprep.subr.bf16.mxu1 %v6969_v7  ;;  %v6981_v16 = vpack.c.bf16 %v752_v15, %v751_v14  ;;  %v829_v18 = vld [vmem:[%s8723_s7 + $0x8] sm:$0xff]  ;;  %v5891_v20 = vld [vmem:[%s8720_s4] ss:$0 sm:$0xff]  ;;  %v830_v22 = vld [vmem:[%s8723_s7 + $0x10] sm:$0xff]  ;;  %s997_s30 = sld [smem:[#allocation2]]  ;;  %s5904_s18 = sld [smem:[#allocation2 + $0x1]] }
  0x31   : > { %s6201_s28 = sshll.u32 %s7691_s2, 4  ;;  %6972 = vmatpush3.bf16.msra.mxu1 %v6969_v7  ;;  %v6985_v19 = vpack.c.bf16 %v829_v18, %v828_v17  ;;  %v831_v23 = vld [vmem:[%s8723_s7 + $0x18] sm:$0xff]  ;;  %v5913_v28 = vld [vmem:[%s8721_s5 + $0x20] sm:$0xff]  ;;  %v5914_v29 = vld [vmem:[%s8721_s5 + $0x28] sm:$0xff]  ;;  %s7792_s27 = sld [smem:[#allocation2 + $0x3]] }
  0x32   : > { %6974 = vmatprep.subr.bf16.mxu1 %v6973_v13  ;;  %v6989_v27 = vpack.c.bf16 %v831_v23, %v830_v22  ;;  %vm7750_vm3 = vmpackc.low %vm907_vm2, %vm907_vm2  ;;  %v7003_v36 = vpack.c.bf16 %v5914_v29, %v5913_v28  ;;  %v5915_v37 = vld [vmem:[%s8721_s5 + $0x30] sm:$0xff]  ;;  %v5916_v38 = vld [vmem:[%s8721_s5 + $0x38] sm:$0xff]  ;;  %s7797_s19 = sld [smem:[#allocation2 + $0x4]]  ;;  %s7819_s20 = sld [smem:[#allocation2 + $0x6]] }
  0x33   : > { %v572_v0 = vld [vmem:[%s8746_s3] sm:$0xff]  ;;  %v573_v1 = vld [vmem:[%s8746_s3 + $0x8] sm:$0xff]  ;;  %v7007_v42 = vpack.c.bf16 %v5916_v38, %v5915_v37  ;;  %v5927_v46 = vld [vmem:[%s8723_s7 + $0x30] sm:$0xff]  ;;  %s7909_s3 = sld [smem:[#allocation2 + $0x85]] }
  0x34   : > { %v6965_v3 = vpack.c.bf16 %v573_v1, %v572_v0  ;;  %s548_s29 = scalar_lea.vmem %s8747_s26, %s6201_s28  ;;  %v5925_v43 = vld [vmem:[%s8723_s7 + $0x20] sm:$0xff]  ;;  %v5926_v44 = vld [vmem:[%s8723_s7 + $0x28] sm:$0xff]  ;;  %v5928_v47 = vld [vmem:[%s8723_s7 + $0x38] sm:$0xff]  ;;  %s6202_s28 = sshll.u32 %s7691_s2, 7 }
  0x35   : > { %v554_v9 = vld [vmem:[%s548_s29] sm:$0xff]  ;;  %v555_v10 = vld [vmem:[%s548_s29 + $0x8] sm:$0xff]  ;;  %6976 = vmatpush3.bf16.msra.mxu1 %v6973_v13  ;;  %v7019_v45 = vpack.c.bf16 %v5926_v44, %v5925_v43  ;;  %v7023_v48 = vpack.c.bf16 %v5928_v47, %v5927_v46  ;;  %s5905_s26 = sld [smem:[#allocation2 + $0x2]]  ;;  %s7790_s23 = scalar_lea.vmem %s8717_s1, %s6202_s28 }
  0x36   : > { %6966 = vmatprep.subr.bf16.mxu0 %v6965_v3  ;;  %6480 = vmatprep.mubr.msk.f32.mxu0 %vm581_vm0, %v554_v9  ;;  %v7795_v49 = vld [vmem:[%s7790_s23 + $0x8] sm:$0xff]  ;;  %v998_v50 = vstv %s997_s30  ;;  %v7800_v51 = vld [vmem:[%s7790_s23] sm:$0xff]  ;;  %v7803_v52 = vld [vmem:[%s7790_s23 + $0x18] sm:$0xff]  ;;  %s7805_s2 = sld [smem:[#allocation2 + $0x5]]  ;;  %s7830_s30 = sld [smem:[#allocation2 + $0x7]] }
  0x37   : > { %6968 = vmatpush3.bf16.msra.mxu0 %v6965_v3  ;;  %6986 = vmatprep.subr.bf16.mxu1 %v6985_v19  ;;  %v1004_v53 = vstv %s5904_s18  ;;  %v1000_v54 = vmul.f32 %v998_v50, %v7795_v49  ;;  %v7809_v55 = vld [vmem:[%s7790_s23 + $0x10] sm:$0xff]  ;;  %v7812_v56 = vld [vmem:[%s7790_s23 + $0x28] sm:$0xff]  ;;  %v999_v59 = vmul.f32 %v998_v50, %v7800_v51  ;;  %v7817_v62 = vld [vmem:[%s7790_s23 + $0x20] sm:$0xff]  ;;  %s5937_s28 = sld [smem:[#allocation2 + $0x82]]  ;;  %s5938_s18 = sld [smem:[#allocation2 + $0x83]] }
  0x38   : > { %6978 = vmatprep.subr.bf16.mxu0 %v6977_v8  ;;  %v1006_v61 = vmul.f32 %v1004_v53, %v7803_v52  ;;  %v7822_v0 = vld [vmem:[%s7790_s23 + $0x38] sm:$0xff]  ;;  %v1016_v1 = vstv %s7792_s27  ;;  %v1005_v3 = vmul.f32 %v1004_v53, %v7809_v55  ;;  %v7828_v6 = vld [vmem:[%s7790_s23 + $0x30] sm:$0xff]  ;;  %v1022_v9 = vstv %s7797_s19  ;;  %s7913_s29 = sld [smem:[#allocation2 + $0x86]]  ;;  %s5942_s27 = sld [smem:[#allocation2 + $0x87]] }
  0x39   : > { %v1018_v12 = vmul.f32 %v1016_v1, %v7822_v0  ;;  %v7839_v13 = vld [vmem:[%s7790_s23 + $0x40] sm:$0xff]  ;;  %v1017_v15 = vmul.f32 %v1016_v1, %v7828_v6  ;;  %v7844_v17 = vld [vmem:[%s7790_s23 + $0x58] sm:$0xff]  ;;  %v1034_v29 = vstv %s7819_s20  ;;  %s5935_s20 = sld [smem:[#allocation2 + $0x80]]  ;;  %s5974_s19 = sld [smem:[#allocation2 + $0x102]] }
  0x3a   : > { %6481 = vmatmul.mubr.msk.f32.vlgmr.msra.gmra.mrb[0].mxu0 %vm581_vm0, %v555_v10  ;;  %v7835_v10 = vld [vmem:[%s7790_s23 + $0x48] sm:$0xff]  ;;  %v1023_v23 = vmul.f32 %v1022_v9, %v7839_v13  ;;  %v7856_v28 = vld [vmem:[%s7790_s23 + $0x60] sm:$0xff] }
  0x3b   : > { %6980 = vmatpush3.bf16.msra.mxu0 %v6977_v8  ;;  %v1010_v58 = vstv %s5905_s26  ;;  %s5939_s26 = sld [smem:[#allocation2 + $0x84]] }
  0x3c   : > { %6982 = vmatprep.subr.bf16.mxu0 %v6981_v16  ;;  %v1012_v5 = vmul.f32 %v1010_v58, %v7812_v56  ;;  %v1011_v8 = vmul.f32 %v1010_v58, %v7817_v62 }
  0x3f   : > { %6984 = vmatpush3.bf16.msra.mxu0 %v6981_v16  ;;  %v1028_v16 = vstv %s7805_s2  ;;  %s5975_s2 = sld [smem:[#allocation2 + $0x103]] }
 0x10d   : > { %v6482_v21 = vpop.f32.mrb[0].mxu0 }
 0x10e   : > { %v654_v24 = vpop.f32.mrb[1].mxu0  ;;  %v7728_v26 = vadd.f32 %v6482_v21, %v5891_v20 }
 0x10f   : > { %v7726_v25 = vadd.f32 %v5891_v20, %v654_v24  ;;  %v1024_v20 = vmul.f32 %v1022_v9, %v7835_v10  ;;  %v5919_v9 = vld [vmem:[%s8722_s6 + $0x20] sm:$0xff] }
 0x111   : > { %6491 = vmatprep.mubr.msk.f32.mxu1 %vm667_vm1, %v7726_v25  ;;  %6502 = vmatprep.mubr.msk.f32.mxu0 %vm667_vm1, %v7726_v25 }
 0x112   : > { %6492 = vmatmul.mubr.msk.f32.vlgmr.msra.gmra.mrb[0].mxu1 %vm667_vm1, %v7728_v26  ;;  %6503 = vmatmul.mubr.msk.f32.vlgmr.msra.gmra.mrb[2].mxu0 %vm667_vm1, %v7728_v26 }
 0x113   : > { %6988 = vmatpush3.bf16.msra.mxu1 %v6985_v19  ;;  %6513 = vmatprep.mubr.msk.f32.mxu1 %vm667_vm1, %v7726_v25  ;;  %v7847_v19 = vld [vmem:[%s7790_s23 + $0x50] sm:$0xff] }
 0x114   : > { %6990 = vmatprep.subr.bf16.mxu1 %v6989_v27 }
 0x117   : > { %6992 = vmatpush3.bf16.msra.mxu1 %v6989_v27 }
 0x11a   : > { %6514 = vmatmul.mubr.msk.f32.vlgmr.msra.gmra.mrb[2].mxu1 %vm667_vm1, %v7728_v26 }
 0x1e5   : > { %v6493_v30 = vpop.f32.mrb[0].mxu1  ;;  %v6504_v31 = vpop.f32.mrb[2].mxu0 }
 0x1e6   : > { %v740_v32 = vpop.f32.mrb[1].mxu1  ;;  %v819_v33 = vpop.f32.mrb[3].mxu0 }
 0x1e7   : > { %v6993_v35 = vpack.c.bf16 %v6504_v31, %v819_v33  ;;  %6520 = vmatprep.mubr.msk.f32.mxu0 %vm907_vm2, %v740_v32  ;;  %v1030_v31 = vmul.f32 %v1028_v16, %v7844_v17  ;;  %v1029_v33 = vmul.f32 %v1028_v16, %v7847_v19 }
 0x1e9   : > { %6995 = vmatprep.subr.msk.bf16.mxu0 %vm7750_vm3, %v6993_v35 }
 0x1ea   : > { %6998 = vmatpush3.bf16.xpose.msk.msra.mxu0 %vm7750_vm3, %v6993_v35  ;;  %v7865_v35 = vld [vmem:[%s7790_s23 + $0x70] sm:$0xff] }
 0x1eb   : > { %7004 = vmatprep.subr.bf16.mxu0 %v7003_v36 }
 0x1ed   : > { %v6515_v39 = vpop.f32.mrb[2].mxu1 }
 0x1ee   : > { %v898_v40 = vpop.f32.mrb[3].mxu1 }
 0x1ef   : > { %v6999_v41 = vpack.c.bf16 %v6515_v39, %v898_v40  ;;  %v1035_v39 = vmul.f32 %v1034_v29, %v7856_v28 }
 0x1f1   : > { %7000 = vmatprep.subr.bf16.mxu1 %v6999_v41  ;;  %6521 = vmatmul.mubr.msk.f32.vlgmr.msra.gmra.mrb[4].mxu0 %vm907_vm2, %v6493_v30  ;;  %v7860_v30 = vld [vmem:[%s7790_s23 + $0x68] sm:$0xff] }
 0x1f2   : > { %7002 = vmatpush3.bf16.msra.mxu1 %v6999_v41  ;;  %7006 = vmatpush3.bf16.msra.mxu0 %v7003_v36  ;;  %v1040_v36 = vstv %s7830_s30  ;;  %v1036_v40 = vmul.f32 %v1034_v29, %v7860_v30  ;;  %v7871_v41 = vld [vmem:[%s7790_s23 + $0x78] sm:$0xff]  ;;  %s5936_s30 = sld [smem:[#allocation2 + $0x81]] }
 0x1f3   : > { %6538 = vmatprep.mubr.msk.f32.mxu0 %vm667_vm1, %v7726_v25  ;;  %7008 = vmatprep.subr.bf16.mxu0 %v7007_v42  ;;  %v1041_v44 = vmul.f32 %v1040_v36, %v7865_v35 }
 0x1f6   : > { %7010 = vmatpush3.bf16.msra.mxu0 %v7007_v42 }
 0x1f7   : > { %7020 = vmatprep.subr.bf16.mxu0 %v7019_v45 }
 0x1f9   : > { %6539 = vmatmul.mubr.msk.f32.vlgmr.msra.gmra.mrb[6].mxu0 %vm667_vm1, %v7728_v26 }
 0x1fa   : > { %7022 = vmatpush3.bf16.msra.mxu0 %v7019_v45  ;;  %6560 = vmatprep.mubr.msk.f32.mxu0 %vm667_vm1, %v7726_v25 }
 0x1fb   : > { %7024 = vmatprep.subr.bf16.mxu0 %v7023_v48 }
 0x1fe   : > { %7026 = vmatpush3.bf16.msra.mxu0 %v7023_v48  ;;  %v1042_v48 = vmul.f32 %v1040_v36, %v7871_v41 }
 0x201   : > { %6561 = vmatmul.mubr.msk.f32.vlgmr.msra.gmra.mrb[8].mxu0 %vm667_vm1, %v7728_v26 }
 0x2c4   : > { %v6522_v57 = vpop.f32.mrb[4].mxu0 }
 0x2c5   : > { %v996_v60 = vmul.f32 0.35355338, %v6522_v57  ;;  %v986_v63 = vpop.f32.mrb[5].mxu0 }
 0x2c6   : > { %v995_v2 = vmul.f32 0.35355338, %v986_v63 }
 0x2c7   : > { %v1002_v4 = vadd.f32 %v1000_v54, %v996_v60 }
 0x2c8   : > { %v1001_v7 = vadd.f32 %v999_v59, %v995_v2 }
 0x2c9   : > { %v1008_v11 = vadd.f32 %v1006_v61, %v1002_v4 }
 0x2ca   : > { %v1007_v14 = vadd.f32 %v1005_v3, %v1001_v7 }
 0x2cb   : > { %v1014_v18 = vadd.f32 %v1012_v5, %v1008_v11  ;;  %v5920_v11 = vld [vmem:[%s8722_s6 + $0x28] sm:$0xff] }
 0x2cc   : > { %v1013_v21 = vadd.f32 %v1011_v8, %v1007_v14  ;;  %v7850_v22 = vpop.f32.mrb[6].mxu0 }
 0x2cd   : > { %v1020_v24 = vadd.f32 %v1018_v12, %v1014_v18  ;;  %v7853_v27 = vpop.f32.mrb[7].mxu0  ;;  %v7011_v12 = vpack.c.bf16 %v5920_v11, %v5919_v9 }
 0x2ce   : > { %v1019_v32 = vadd.f32 %v1017_v15, %v1013_v21  ;;  %v5922_v21 = vld [vmem:[%s8722_s6 + $0x38] sm:$0xff] }
 0x2cf   : > { %v1026_v37 = vadd.f32 %v1024_v20, %v1020_v24  ;;  %7012 = vmatprep.subr.bf16.mxu1 %v7011_v12  ;;  %v5921_v20 = vld [vmem:[%s8722_s6 + $0x30] sm:$0xff] }
 0x2d0   : > { %v1025_v38 = vadd.f32 %v1023_v23, %v1019_v32  ;;  %v7015_v29 = vpack.c.bf16 %v5922_v21, %v5921_v20 }
 0x2d1   : > { %v1032_v42 = vadd.f32 %v1030_v31, %v1026_v37 }
 0x2d2   : > { %v1031_v43 = vadd.f32 %v1029_v33, %v1025_v38  ;;  %v1485_v38 = vstv %s5936_s30  ;;  %s8003_s30 = sld [smem:[#allocation2 + $0x105]] }
 0x2d3   : > { %v1038_v47 = vadd.f32 %v1036_v40, %v1032_v42  ;;  %v1491_v42 = vstv %s5937_s28  ;;  %s8007_s28 = sld [smem:[#allocation2 + $0x106]] }
 0x2d4   : > { %v6562_v45 = vpop.f32.mrb[8].mxu0  ;;  %v1037_v46 = vadd.f32 %v1035_v39, %v1031_v43 }
 0x2d5   : > { %v1380_v50 = vpop.f32.mrb[9].mxu0  ;;  %v1044_v58 = vadd.f32 %v1042_v48, %v1038_v47  ;;  %v1486_v48 = vmul.f32 %v1485_v38, %v7809_v55 }
 0x2d6   : > { %v7033_v53 = vpack.c.bf16 %v6562_v45, %v1380_v50  ;;  %v1043_v54 = vadd.f32 %v1041_v44, %v1037_v46  ;;  %v1497_v46 = vstv %s5938_s18  ;;  %s5979_s18 = sld [smem:[#allocation2 + $0x107]] }
 0x2d7   : > { %v1048_v59 = vsel %vm581_vm0, %v1044_v58, -inf }
 0x2d8   : > { %7034 = vmatprep.subr.bf16.mxu0 %v7033_v53  ;;  %v1045_v57 = vsel %vm581_vm0, %v1043_v54, -inf }
 0x2d9   : > { %7036 = vmatpush3.bf16.msra.mxu0 %v7033_v53  ;;  %1046 = vmax.xlane.f32.xlu0 %v1045_v57  ;;  %v1493_v53 = vmul.f32 %v1491_v42, %v7812_v56  ;;  %v1492_v57 = vmul.f32 %v1491_v42, %v7817_v62 }
 0x2dd   : > { %1049 = vmax.xlane.f32.xlu0 %v1048_v59 }
 0x366   : > { %v1047_v60 = vpop.xlane.xlu0 %1046 }
 0x367   : > { %v1051_v61 = vsub.f32 %v1043_v54, %v1047_v60  ;;  %v1499_v60 = vmul.f32 %v1497_v46, %v7822_v0 }
 0x369   : > { %v1053_v63 = vmul.f32 1.442695, %v1051_v61 }
 0x36a   : > { %v1050_v1 = vpop.xlane.xlu0 %1049 }
 0x36b   : > { %7353 = vpow2.f32 %v1053_v63  ;;  %v1052_v2 = vsub.f32 %v1044_v58, %v1050_v1  ;;  %v1503_v58 = vstv %s5939_s26  ;;  %v1498_v63 = vmul.f32 %v1497_v46, %v7828_v6  ;;  %s6011_s26 = sld [smem:[#allocation2 + $0x184]] }
 0x36c   : > { %v1509_v1 = vstv %s7909_s3  ;;  %s8090_s3 = sld [smem:[#allocation2 + $0x185]] }
 0x36d   : > { %v1055_v3 = vmul.f32 1.442695, %v1052_v2  ;;  %v1511_v9 = vmul.f32 %v1509_v1, %v7844_v17 }
 0x36f   : > { %7355 = vpow2.f32 %v1055_v3  ;;  %v1505_v3 = vmul.f32 %v1503_v58, %v7835_v10 }
 0x375   : > { %v7354_v4 = vpop.eup %7353 }
 0x376   : > { %v1057_v5 = vsel %vm581_vm0, %v7354_v4, 0.0 }
 0x377   : > { %1058 = vadd.xlane.f32.xlu1 %v1057_v5  ;;  %v1515_v5 = vstv %s7913_s29  ;;  %s5972_s29 = sld [smem:[#allocation2 + $0x100]] }
 0x378   : > { %v1516_v20 = vmul.f32 %v1515_v5, %v7856_v28 }
 0x379   : > { %v7356_v7 = vpop.eup %7355 }
 0x37a   : > { %v1060_v8 = vsel %vm581_vm0, %v7356_v7, 0.0 }
 0x37b   : > { %1061 = vadd.xlane.f32.xlu1 %v1060_v8 }
 0x404   : > { %v1059_v14 = vpop.xlane.xlu1 %1058 }
 0x405   : > { %7357 = vrcp.f32 %v1059_v14  ;;  %v1510_v14 = vmul.f32 %v1509_v1, %v7847_v19  ;;  %v5953_v1 = vld [vmem:[%s8721_s5 + $0x58] sm:$0xff] }
 0x408   : > { %v1062_v15 = vpop.xlane.xlu1 %1061 }
 0x409   : > { %7359 = vrcp.f32 %v1062_v15 }
 0x40f   : > { %v7358_v16 = vpop.eup %7357 }
 0x410   : > { %v1065_v18 = vmul.f32 %v7358_v16, %v7354_v4  ;;  %v1517_v16 = vmul.f32 %v1515_v5, %v7860_v30 }
 0x412   : > { %6527 = vmatprep.mubr.msk.f32.mxu1 %vm581_vm0, %v1065_v18 }
 0x413   : > { %v7360_v23 = vpop.eup %7359 }
 0x414   : > { %v1066_v24 = vmul.f32 %v7360_v23, %v7356_v7  ;;  %v1504_v7 = vmul.f32 %v1503_v58, %v7839_v13  ;;  %v5945_v58 = vld [vmem:[%s8724_s8 + $0x8] sm:$0xff] }
 0x416   : > { %6528 = vmatmul.mubr.msk.f32.vlgmr.msra.gmra.mrb[4].mxu1 %vm581_vm0, %v1066_v24 }
 0x417   : > { %7014 = vmatpush3.bf16.msra.mxu1 %v7011_v12  ;;  %6549 = vmatprep.mubr.msk.f32.mxu1 %vm667_vm1, %v7726_v25  ;;  %v1521_v12 = vstv %s5942_s27  ;;  %s5973_s27 = sld [smem:[#allocation2 + $0x101]] }
 0x418   : > { %7016 = vmatprep.subr.bf16.mxu1 %v7015_v29  ;;  %v1523_v23 = vmul.f32 %v1521_v12, %v7871_v41 }
 0x41b   : > { %7018 = vmatpush3.bf16.msra.mxu1 %v7015_v29  ;;  %v1522_v29 = vmul.f32 %v1521_v12, %v7865_v35  ;;  %v5965_v12 = vld [vmem:[%s8723_s7 + $0x58] sm:$0xff] }
 0x41e   : > { %6550 = vmatmul.mubr.msk.f32.vlgmr.msra.gmra.mrb[6].mxu1 %vm667_vm1, %v7728_v26 }
 0x41f   : > { %6567 = vmatprep.mubr.msk.f32.mxu1 %vm907_vm2, %v7853_v27  ;;  %v1479_v27 = vstv %s5935_s20  ;;  %s5976_s20 = sld [smem:[#allocation2 + $0x104]] }
 0x420   : > { %v1481_v39 = vmul.f32 %v1479_v27, %v7795_v49  ;;  %v1480_v43 = vmul.f32 %v1479_v27, %v7800_v51 }
 0x4e9   : > { %v7899_v31 = vpop.f32.mrb[4].mxu1 }
 0x4ea   : > { %v7901_v32 = vpop.f32.mrb[5].mxu1 }
 0x4f1   : > { %v6551_v33 = vpop.f32.mrb[6].mxu1 }
 0x4f2   : > { %v1300_v36 = vpop.f32.mrb[7].mxu1 }
 0x4f3   : > { %v7027_v37 = vpack.c.bf16 %v6551_v33, %v1300_v36 }
 0x4f5   : > { %7029 = vmatprep.subr.msk.bf16.mxu1 %vm7750_vm3, %v7027_v37 }
 0x4f6   : > { %7032 = vmatpush3.bf16.xpose.msk.msra.mxu1 %vm7750_vm3, %v7027_v37 }
 0x4f7   : > { %6577 = vmatprep.subr.mxu1 %v5945_v58 }
 0x4fd   : > { %6568 = vmatmul.mubr.msk.f32.vlgmr.msra.gmra.mrb[8].mxu1 %vm907_vm2, %v7850_v22  ;;  %v1487_v22 = vmul.f32 %v1485_v38, %v7803_v52 }
 0x4fe   : > { %6578 = vmatpush3.msra.mxu1 %v5945_v58 }
 0x5d0   : > { %v6569_v40 = vpop.f32.mrb[8].mxu1 }
 0x5d1   : > { %v1477_v44 = vmul.f32 0.35355338, %v6569_v40  ;;  %v1467_v45 = vpop.f32.mrb[9].mxu1 }
 0x5d2   : > { %v1476_v47 = vmul.f32 0.35355338, %v1467_v45 }
 0x5d3   : > { %v1483_v50 = vadd.f32 %v1481_v39, %v1477_v44 }
 0x5d4   : > { %v1482_v54 = vadd.f32 %v1480_v43, %v1476_v47 }
 0x5d5   : > { %v1489_v59 = vadd.f32 %v1487_v22, %v1483_v50 }
 0x5d6   : > { %v1488_v61 = vadd.f32 %v1486_v48, %v1482_v54  ;;  %v5951_v54 = vld [vmem:[%s8721_s5 + $0x48] sm:$0xff] }
 0x5d7   : > { %v1495_v2 = vadd.f32 %v1493_v53, %v1489_v59  ;;  %v5950_v53 = vld [vmem:[%s8721_s5 + $0x40] sm:$0xff] }
 0x5d8   : > { %v1494_v4 = vadd.f32 %v1492_v57, %v1488_v61  ;;  %v7037_v57 = vpack.c.bf16 %v5951_v54, %v5950_v53  ;;  %v2141_v53 = vstv %s5975_s2  ;;  %s8302_s2 = sld [smem:[#allocation2 + $0x207]] }
 0x5d9   : > { %v1501_v8 = vadd.f32 %v1499_v60, %v1495_v2 }
 0x5da   : > { %v1500_v11 = vadd.f32 %v1498_v63, %v1494_v4  ;;  %7038 = vmatprep.subr.bf16.mxu0 %v7037_v57  ;;  %v5952_v63 = vld [vmem:[%s8721_s5 + $0x50] sm:$0xff] }
 0x5db   : > { %v1507_v15 = vadd.f32 %v1505_v3, %v1501_v8  ;;  %v7041_v5 = vpack.c.bf16 %v5953_v1, %v5952_v63  ;;  %v5963_v8 = vld [vmem:[%s8723_s7 + $0x48] sm:$0xff]  ;;  %v2147_v63 = vstv %s5976_s20  ;;  %s6007_s20 = sld [smem:[#allocation2 + $0x180]] }
 0x5dc   : > { %v1506_v18 = vadd.f32 %v1504_v7, %v1500_v11  ;;  %v5962_v7 = vld [vmem:[%s8723_s7 + $0x40] sm:$0xff]  ;;  %v5964_v11 = vld [vmem:[%s8723_s7 + $0x50] sm:$0xff] }
 0x5dd   : > { %v1513_v21 = vadd.f32 %v1511_v9, %v1507_v15  ;;  %v7053_v9 = vpack.c.bf16 %v5963_v8, %v5962_v7  ;;  %v1148_v15 = vld [vmem:[%s8724_s8] sm:$0xff]  ;;  %v2149_v8 = vmul.f32 %v2147_v63, %v7835_v10 }
 0x5de   : > { %v1512_v24 = vadd.f32 %v1510_v14, %v1506_v18  ;;  %v7057_v14 = vpack.c.bf16 %v5965_v12, %v5964_v11  ;;  %6582 = vmatprep.subr.mxu1 %v1148_v15  ;;  %v5957_v18 = vld [vmem:[%s8722_s6 + $0x48] sm:$0xff]  ;;  %v2159_v11 = vstv %s8007_s28  ;;  %v2148_v12 = vmul.f32 %v2147_v63, %v7839_v13  ;;  %s6009_s28 = sld [smem:[#allocation2 + $0x182]] }
 0x5df   : > { %v1519_v33 = vadd.f32 %v1517_v16, %v1513_v21  ;;  %v5956_v16 = vld [vmem:[%s8722_s6 + $0x40] sm:$0xff] }
 0x5e0   : > { %v1518_v36 = vadd.f32 %v1516_v20, %v1512_v24  ;;  %v5958_v24 = vld [vmem:[%s8722_s6 + $0x50] sm:$0xff] }
 0x5e1   : > { %v1525_v37 = vadd.f32 %v1523_v23, %v1519_v33  ;;  %v7045_v23 = vpack.c.bf16 %v5957_v18, %v5956_v16  ;;  %v2165_v18 = vstv %s5979_s18  ;;  %s6010_s18 = sld [smem:[#allocation2 + $0x183]] }
 0x5e2   : > { %v1524_v27 = vadd.f32 %v1522_v29, %v1518_v36  ;;  %v5959_v29 = vld [vmem:[%s8722_s6 + $0x58] sm:$0xff] }
 0x5e3   : > { %v1529_v38 = vsel %vm581_vm0, %v1525_v37, -inf }
 0x5e4   : > { %1530 = vmax.xlane.f32.xlu1 %v1529_v38  ;;  %v1526_v39 = vsel %vm581_vm0, %v1524_v27, -inf }
 0x5e5   : > { %1527 = vmax.xlane.f32.xlu0 %v1526_v39 }
 0x671   : > { %v1531_v40 = vpop.xlane.xlu1 %1530 }
 0x672   : > { %v1533_v42 = vsub.f32 %v1525_v37, %v1531_v40  ;;  %v1528_v43 = vpop.xlane.xlu0 %1527  ;;  %v7049_v37 = vpack.c.bf16 %v5959_v29, %v5958_v24  ;;  %v2160_v29 = vmul.f32 %v2159_v11, %v7856_v28 }
 0x673   : > { %v1532_v44 = vsub.f32 %v1524_v27, %v1528_v43  ;;  %v2129_v43 = vstv %s5973_s27  ;;  %s6014_s27 = sld [smem:[#allocation2 + $0x187]] }
 0x674   : > { %v1536_v22 = vmul.f32 1.442695, %v1533_v42 }
 0x675   : > { %v1534_v45 = vmul.f32 1.442695, %v1532_v44 }
 0x676   : > { %7361 = vpow2.f32 %v1536_v22 }
 0x677   : > { %7363 = vpow2.f32 %v1534_v45  ;;  %v2135_v45 = vstv %s5974_s19  ;;  %s8291_s19 = sld [smem:[#allocation2 + $0x206]] }
 0x680   : > { %v7362_v46 = vpop.eup %7361 }
 0x681   : > { %v7364_v47 = vpop.eup %7363  ;;  %v1541_v48 = vsel %vm581_vm0, %v7362_v46, 0.0 }
 0x682   : > { %1542 = vadd.xlane.f32.xlu1 %v1541_v48  ;;  %v1538_v50 = vsel %vm581_vm0, %v7364_v47, 0.0  ;;  %v2131_v48 = vmul.f32 %v2129_v43, %v7803_v52 }
 0x683   : > { %1539 = vadd.xlane.f32.xlu0 %v1538_v50 }
 0x70f   : > { %v1543_v59 = vpop.xlane.xlu1 %1542 }
 0x710   : > { %7365 = vrcp.f32 %v1543_v59  ;;  %v1540_v60 = vpop.xlane.xlu0 %1539  ;;  %v2137_v59 = vmul.f32 %v2135_v45, %v7812_v56 }
 0x711   : > { %7367 = vrcp.f32 %v1540_v60 }
 0x71a   : > { %v7366_v61 = vpop.eup %7365 }
 0x71b   : > { %v7368_v2 = vpop.eup %7367  ;;  %v1547_v4 = vmul.f32 %v7366_v61, %v7362_v46  ;;  %v2136_v61 = vmul.f32 %v2135_v45, %v7817_v62 }
 0x71c   : > { %v1546_v3 = vmul.f32 %v7368_v2, %v7364_v47  ;;  %v2143_v2 = vmul.f32 %v2141_v53, %v7822_v0 }
 0x71e   : > { %6574 = vmatprep.mubr.msk.f32.mxu0 %vm581_vm0, %v1546_v3 }
 0x71f   : > { %6575 = vmatmul.mubr.msk.f32.vlgmr.msra.gmra.mrb[10].mxu0 %vm581_vm0, %v1547_v4  ;;  %v2142_v4 = vmul.f32 %v2141_v53, %v7828_v6 }
 0x720   : > { %7040 = vmatpush3.bf16.msra.mxu0 %v7037_v57  ;;  %6595 = vmatprep.mubr.msk.f32.mxu0 %vm667_vm1, %v7726_v25  ;;  %v2130_v57 = vmul.f32 %v2129_v43, %v7809_v55 }
 0x721   : > { %7042 = vmatprep.subr.bf16.mxu0 %v7041_v5 }
 0x724   : > { %7044 = vmatpush3.bf16.msra.mxu0 %v7041_v5  ;;  %v2153_v5 = vstv %s8003_s30  ;;  %s6008_s30 = sld [smem:[#allocation2 + $0x181]] }
 0x725   : > { %7054 = vmatprep.subr.bf16.mxu0 %v7053_v9 }
 0x727   : > { %6596 = vmatmul.mubr.msk.f32.vlgmr.msra.gmra.mrb[12].mxu0 %vm667_vm1, %v7728_v26 }
 0x728   : > { %7056 = vmatpush3.bf16.msra.mxu0 %v7053_v9  ;;  %6617 = vmatprep.mubr.msk.f32.mxu0 %vm667_vm1, %v7726_v25 }
 0x729   : > { %7058 = vmatprep.subr.bf16.mxu0 %v7057_v14 }
 0x72c   : > { %7060 = vmatpush3.bf16.msra.mxu0 %v7057_v14 }
 0x72f   : > { %6618 = vmatmul.mubr.msk.f32.vlgmr.msra.gmra.mrb[14].mxu0 %vm667_vm1, %v7728_v26 }
 0x7f2   : > { %v6576_v20 = vpop.f32.mrb[10].mxu0 }
 0x7f3   : > { %v1620_v21 = vpop.f32.mrb[11].mxu0 }
 0x7f4   : > { %6579 = vmatprep.mubr.msk.f32.mxu1 %vm907_vm2, %v1620_v21 }
 0x7f5   : > { %6580 = vmatmul.mubr.msk.f32.vlgmr.msra.gmra.mrb[10].mxu1 %vm907_vm2, %v6576_v20  ;;  %v2154_v20 = vmul.f32 %v2153_v5, %v7847_v19 }
 0x7f6   : > { %6583 = vmatpush3.msra.mxu1 %v1148_v15  ;;  %6584 = vmatprep.mubr.msk.f32.mxu1 %vm907_vm2, %v7901_v32  ;;  %v2155_v15 = vmul.f32 %v2153_v5, %v7844_v17 }
 0x7f7   : > { %7046 = vmatprep.subr.bf16.mxu1 %v7045_v23 }
 0x7fa   : > { %v6597_v33 = vpop.f32.mrb[12].mxu0 }
 0x7fb   : > { %v1864_v36 = vpop.f32.mrb[13].mxu0 }
 0x7fd   : > { %6585 = vmatmul.mubr.msk.f32.vlgmr.msra.gmra.mrb[10].mxu1 %vm907_vm2, %v7899_v31  ;;  %v2123_v31 = vstv %s5972_s29  ;;  %s8094_s29 = sld [smem:[#allocation2 + $0x186]] }
 0x7fe   : > { %7048 = vmatpush3.bf16.msra.mxu1 %v7045_v23  ;;  %6606 = vmatprep.mubr.msk.f32.mxu1 %vm667_vm1, %v7726_v25  ;;  %v2125_v44 = vmul.f32 %v2123_v31, %v7795_v49  ;;  %v2124_v46 = vmul.f32 %v2123_v31, %v7800_v51  ;;  %v2161_v23 = vmul.f32 %v2159_v11, %v7860_v30  ;;  %v5998_v11 = vld [vmem:[%s8723_s7 + $0x68] sm:$0xff] }
 0x7ff   : > { %7050 = vmatprep.subr.bf16.mxu1 %v7049_v37 }
 0x802   : > { %7052 = vmatpush3.bf16.msra.mxu1 %v7049_v37  ;;  %v6619_v32 = vpop.f32.mrb[14].mxu0 }
 0x803   : > { %v2024_v27 = vpop.f32.mrb[15].mxu0 }
 0x804   : > { %v7067_v38 = vpack.c.bf16 %v6619_v32, %v2024_v27  ;;  %v2166_v32 = vmul.f32 %v2165_v18, %v7865_v35 }
 0x805   : > { %6607 = vmatmul.mubr.msk.f32.vlgmr.msra.gmra.mrb[12].mxu1 %vm667_vm1, %v7728_v26 }
 0x806   : > { %6624 = vmatprep.mubr.msk.f32.mxu1 %vm907_vm2, %v1864_v36  ;;  %7068 = vmatprep.subr.bf16.mxu0 %v7067_v38  ;;  %v2167_v36 = vmul.f32 %v2165_v18, %v7871_v41  ;;  %v5991_v18 = vld [vmem:[%s8722_s6 + $0x60] sm:$0xff] }
 0x807   : > { %7070 = vmatpush3.bf16.msra.mxu0 %v7067_v38 }
 0x8d8   : > { %v6608_v39 = vpop.f32.mrb[12].mxu1 }
 0x8d9   : > { %v1944_v40 = vpop.f32.mrb[13].mxu1 }
 0x8da   : > { %v7061_v42 = vpack.c.bf16 %v6608_v39, %v1944_v40 }
 0x8dc   : > { %7063 = vmatprep.subr.msk.bf16.mxu1 %vm7750_vm3, %v7061_v42 }
 0x8dd   : > { %7066 = vmatpush3.bf16.xpose.msk.msra.mxu1 %vm7750_vm3, %v7061_v42 }
 0x8e4   : > { %6625 = vmatmul.mubr.msk.f32.vlgmr.msra.gmra.mrb[14].mxu1 %vm907_vm2, %v6597_v33 }
 0x9b7   : > { %v6626_v22 = vpop.f32.mrb[14].mxu1 }
 0x9b8   : > { %v2121_v47 = vmul.f32 0.35355338, %v6626_v22  ;;  %v2111_v50 = vpop.f32.mrb[15].mxu1 }
 0x9b9   : > { %v2120_v54 = vmul.f32 0.35355338, %v2111_v50 }
 0x9ba   : > { %v2127_v58 = vadd.f32 %v2125_v44, %v2121_v47 }
 0x9bb   : > { %v2126_v60 = vadd.f32 %v2124_v46, %v2120_v54 }
 0x9bc   : > { %v2133_v1 = vadd.f32 %v2131_v48, %v2127_v58  ;;  %v5986_v58 = vld [vmem:[%s8721_s5 + $0x68] sm:$0xff] }
 0x9bd   : > { %v2132_v3 = vadd.f32 %v2130_v57, %v2126_v60  ;;  %v5985_v57 = vld [vmem:[%s8721_s5 + $0x60] sm:$0xff]  ;;  %v5982_v60 = vld [vmem:[%s8724_s8 + $0x10] sm:$0xff] }
 0x9be   : > { %v2139_v7 = vadd.f32 %v2137_v59, %v2133_v1  ;;  %v7071_v59 = vpack.c.bf16 %v5986_v58, %v5985_v57  ;;  %6634 = vmatprep.subr.mxu1 %v5982_v60 }
 0x9bf   : > { %v2138_v9 = vadd.f32 %v2136_v61, %v2132_v3  ;;  %6635 = vmatpush3.msra.mxu1 %v5982_v60  ;;  %v5988_v3 = vld [vmem:[%s8721_s5 + $0x78] sm:$0xff] }
 0x9c0   : > { %v2145_v14 = vadd.f32 %v2143_v2, %v2139_v7  ;;  %7072 = vmatprep.subr.bf16.mxu0 %v7071_v59  ;;  %v5987_v2 = vld [vmem:[%s8721_s5 + $0x70] sm:$0xff] }
 0x9c1   : > { %v2144_v16 = vadd.f32 %v2142_v4, %v2138_v9  ;;  %v5997_v9 = vld [vmem:[%s8723_s7 + $0x60] sm:$0xff] }
 0x9c2   : > { %v2151_v21 = vadd.f32 %v2149_v8, %v2145_v14  ;;  %v7075_v8 = vpack.c.bf16 %v5988_v3, %v5987_v2  ;;  %v5999_v14 = vld [vmem:[%s8723_s7 + $0x70] sm:$0xff]  ;;  %v2718_v3 = vstv %s8090_s3  ;;  %s8277_s3 = sld [smem:[#allocation2 + $0x203]] }
 0x9c3   : > { %v2150_v24 = vadd.f32 %v2148_v12, %v2144_v16  ;;  %v7087_v12 = vpack.c.bf16 %v5998_v11, %v5997_v9 }
 0x9c4   : > { %v2157_v33 = vadd.f32 %v2155_v15, %v2151_v21  ;;  %v6000_v15 = vld [vmem:[%s8723_s7 + $0x78] sm:$0xff] }
 0x9c5   : > { %v2156_v37 = vadd.f32 %v2154_v20, %v2150_v24  ;;  %v7091_v16 = vpack.c.bf16 %v6000_v15, %v5999_v14  ;;  %v5992_v20 = vld [vmem:[%s8722_s6 + $0x68] sm:$0xff]  ;;  %v5994_v24 = vld [vmem:[%s8722_s6 + $0x78] sm:$0xff] }
 0x9c6   : > { %v2163_v27 = vadd.f32 %v2161_v23, %v2157_v33  ;;  %v7079_v21 = vpack.c.bf16 %v5992_v20, %v5991_v18  ;;  %v5993_v23 = vld [vmem:[%s8722_s6 + $0x70] sm:$0xff] }
 0x9c7   : > { %v2162_v38 = vadd.f32 %v2160_v29, %v2156_v37 }
 0x9c8   : > { %v2169_v39 = vadd.f32 %v2167_v36, %v2163_v27  ;;  %7080 = vmatprep.subr.bf16.mxu1 %v7079_v21  ;;  %v7083_v36 = vpack.c.bf16 %v5994_v24, %v5993_v23 }
 0x9c9   : > { %v2168_v40 = vadd.f32 %v2166_v32, %v2162_v38 }
 0x9ca   : > { %v2173_v42 = vsel %vm581_vm0, %v2169_v39, -inf }
 0x9cb   : > { %2174 = vmax.xlane.f32.xlu1 %v2173_v42  ;;  %v2170_v31 = vsel %vm581_vm0, %v2168_v40, -inf }
 0x9cc   : > { %2171 = vmax.xlane.f32.xlu0 %v2170_v31 }
 0xa58   : > { %v2175_v43 = vpop.xlane.xlu1 %2174 }
 0xa59   : > { %v2177_v44 = vsub.f32 %v2169_v39, %v2175_v43  ;;  %v2172_v22 = vpop.xlane.xlu0 %2171  ;;  %v2688_v43 = vstv %s6007_s20  ;;  %s6089_s20 = sld [smem:[#allocation2 + $0x284]] }
 0xa5a   : > { %v2176_v45 = vsub.f32 %v2168_v40, %v2172_v22  ;;  %v2690_v22 = vmul.f32 %v2688_v43, %v7795_v49 }
 0xa5b   : > { %v2180_v46 = vmul.f32 1.442695, %v2177_v44  ;;  %v2694_v44 = vstv %s6008_s30  ;;  %s8394_s30 = sld [smem:[#allocation2 + $0x285]] }
 0xa5c   : > { %v2178_v47 = vmul.f32 1.442695, %v2176_v45  ;;  %v2695_v58 = vmul.f32 %v2694_v44, %v7809_v55  ;;  %v2724_v55 = vstv %s8094_s29  ;;  %s8279_s29 = sld [smem:[#allocation2 + $0x204]] }
 0xa5d   : > { %7369 = vpow2.f32 %v2180_v46  ;;  %v2700_v46 = vstv %s6009_s28  ;;  %s6052_s28 = sld [smem:[#allocation2 + $0x200]] }
 0xa5e   : > { %7371 = vpow2.f32 %v2178_v47  ;;  %v2689_v47 = vmul.f32 %v2688_v43, %v7800_v51  ;;  %v2702_v49 = vmul.f32 %v2700_v46, %v7812_v56  ;;  %v2712_v51 = vstv %s6011_s26  ;;  %s6054_s26 = sld [smem:[#allocation2 + $0x202]] }
 0xa5f   : > { %v2720_v56 = vmul.f32 %v2718_v3, %v7844_v17 }
 0xa67   : > { %v7370_v48 = vpop.eup %7369 }
 0xa68   : > { %v7372_v50 = vpop.eup %7371  ;;  %v2185_v53 = vsel %vm581_vm0, %v7370_v48, 0.0 }
 0xa69   : > { %2186 = vadd.xlane.f32.xlu1 %v2185_v53  ;;  %v2182_v54 = vsel %vm581_vm0, %v7372_v50, 0.0 }
 0xa6a   : > { %2183 = vadd.xlane.f32.xlu0 %v2182_v54  ;;  %v2706_v54 = vstv %s6010_s18  ;;  %s6053_s18 = sld [smem:[#allocation2 + $0x201]] }
 0xaf6   : > { %v2187_v61 = vpop.xlane.xlu1 %2186 }
 0xaf7   : > { %7373 = vrcp.f32 %v2187_v61  ;;  %v2184_v63 = vpop.xlane.xlu0 %2183  ;;  %v2701_v61 = vmul.f32 %v2700_v46, %v7817_v62  ;;  %v2730_v62 = vstv %s6014_s27  ;;  %s8281_s27 = sld [smem:[#allocation2 + $0x205]] }
 0xaf8   : > { %7375 = vrcp.f32 %v2184_v63  ;;  %v2731_v20 = vmul.f32 %v2730_v62, %v7865_v35 }
 0xb01   : > { %v7374_v1 = vpop.eup %7373 }
 0xb02   : > { %v7376_v4 = vpop.eup %7375  ;;  %v2191_v7 = vmul.f32 %v7374_v1, %v7370_v48  ;;  %v2708_v1 = vmul.f32 %v2706_v54, %v7822_v0  ;;  %v2726_v0 = vmul.f32 %v2724_v55, %v7860_v30 }
 0xb03   : > { %v2190_v5 = vmul.f32 %v7376_v4, %v7372_v50  ;;  %v2696_v50 = vmul.f32 %v2694_v44, %v7803_v52  ;;  %v2707_v52 = vmul.f32 %v2706_v54, %v7828_v6  ;;  %v2725_v6 = vmul.f32 %v2724_v55, %v7856_v28 }
 0xb05   : > { %6631 = vmatprep.mubr.msk.f32.mxu0 %vm581_vm0, %v2190_v5  ;;  %v2714_v5 = vmul.f32 %v2712_v51, %v7835_v10  ;;  %v2732_v10 = vmul.f32 %v2730_v62, %v7871_v41 }
 0xb06   : > { %6632 = vmatmul.mubr.msk.f32.vlgmr.msra.gmra.mrb[16].mxu0 %vm581_vm0, %v2191_v7 }
 0xb07   : > { %7074 = vmatpush3.bf16.msra.mxu0 %v7071_v59  ;;  %6647 = vmatprep.mubr.msk.f32.mxu0 %vm667_vm1, %v7726_v25 }
 0xb08   : > { %7076 = vmatprep.subr.bf16.mxu0 %v7075_v8 }
 0xb0b   : > { %7078 = vmatpush3.bf16.msra.mxu0 %v7075_v8  ;;  %v2713_v8 = vmul.f32 %v2712_v51, %v7839_v13 }
 0xb0c   : > { %7088 = vmatprep.subr.bf16.mxu0 %v7087_v12 }
 0xb0e   : > { %6648 = vmatmul.mubr.msk.f32.vlgmr.msra.gmra.mrb[18].mxu0 %vm667_vm1, %v7728_v26 }
 0xb0f   : > { %7090 = vmatpush3.bf16.msra.mxu0 %v7087_v12  ;;  %6669 = vmatprep.mubr.msk.f32.mxu0 %vm667_vm1, %v7726_v25  ;;  %v2719_v12 = vmul.f32 %v2718_v3, %v7847_v19 }
 0xb10   : > { %7092 = vmatprep.subr.bf16.mxu0 %v7091_v16 }
 0xb13   : > { %7094 = vmatpush3.bf16.msra.mxu0 %v7091_v16 }
 0xb16   : > { %6670 = vmatmul.mubr.msk.f32.vlgmr.msra.gmra.mrb[20].mxu0 %vm667_vm1, %v7728_v26 }
 0xbd9   : > { %v6633_v29 = vpop.f32.mrb[16].mxu0 }
 0xbda   : > { %v2264_v33 = vpop.f32.mrb[17].mxu0 }
 0xbdb   : > { %6636 = vmatprep.mubr.msk.f32.mxu1 %vm907_vm2, %v2264_v33 }
 0xbdc   : > { %6637 = vmatmul.mubr.msk.f32.vlgmr.msra.gmra.mrb[10].mxu1 %vm907_vm2, %v6633_v29 }
 0xbdd   : > { %7082 = vmatpush3.bf16.msra.mxu1 %v7079_v21  ;;  %6658 = vmatprep.mubr.msk.f32.mxu1 %vm667_vm1, %v7726_v25 }
 0xbde   : > { %7084 = vmatprep.subr.bf16.mxu1 %v7083_v36 }
 0xbe1   : > { %v6649_v37 = vpop.f32.mrb[18].mxu0  ;;  %7086 = vmatpush3.bf16.msra.mxu1 %v7083_v36 }
 0xbe2   : > { %v2429_v32 = vpop.f32.mrb[19].mxu0 }
 0xbe4   : > { %6659 = vmatmul.mubr.msk.f32.vlgmr.msra.gmra.mrb[16].mxu1 %vm667_vm1, %v7728_v26 }
 0xbe5   : > { %6676 = vmatprep.mubr.msk.f32.mxu1 %vm907_vm2, %v2429_v32 }
 0xbe9   : > { %v6671_v27 = vpop.f32.mrb[20].mxu0 }
 0xbea   : > { %v2589_v38 = vpop.f32.mrb[21].mxu0 }
 0xbeb   : > { %v7101_v39 = vpack.c.bf16 %v6671_v27, %v2589_v38  ;;  %v6017_v38 = vld [vmem:[%s8724_s8 + $0x18] sm:$0xff] }
 0xbed   : > { %7102 = vmatprep.subr.bf16.mxu0 %v7101_v39 }
 0xbee   : > { %7104 = vmatpush3.bf16.msra.mxu0 %v7101_v39 }
 0xcb7   : > { %v6660_v40 = vpop.f32.mrb[16].mxu1 }
 0xcb8   : > { %v2509_v42 = vpop.f32.mrb[17].mxu1 }
 0xcb9   : > { %v7095_v31 = vpack.c.bf16 %v6660_v40, %v2509_v42 }
 0xcbb   : > { %7097 = vmatprep.subr.msk.bf16.mxu1 %vm7750_vm3, %v7095_v31 }
 0xcbc   : > { %7100 = vmatpush3.bf16.xpose.msk.msra.mxu1 %vm7750_vm3, %v7095_v31 }
 0xcbd   : > { %6686 = vmatprep.subr.mxu1 %v6017_v38 }
 0xcc3   : > { %6677 = vmatmul.mubr.msk.f32.vlgmr.msra.gmra.mrb[18].mxu1 %vm907_vm2, %v6649_v37 }
 0xcc4   : > { %6687 = vmatpush3.msra.mxu1 %v6017_v38  ;;  %v6027_v38 = vld [vmem:[%s8731_s15] ss:$0 sm:$0xff] }
 0xd96   : > { %v6678_v45 = vpop.f32.mrb[18].mxu1 }
 0xd97   : > { %v2686_v48 = vmul.f32 0.35355338, %v6678_v45  ;;  %v2676_v53 = vpop.f32.mrb[19].mxu1  ;;  %v2935_v45 = vld [vmem:[%s8726_s10 + $0x8] sm:$0xff] }
 0xd98   : > { %v2685_v57 = vmul.f32 0.35355338, %v2676_v53  ;;  %v2937_v53 = vld [vmem:[%s8726_s10 + $0x18] sm:$0xff] }
 0xd99   : > { %v2692_v59 = vadd.f32 %v2690_v22, %v2686_v48  ;;  %v2934_v22 = vld [vmem:[%s8726_s10] sm:$0xff] }
 0xd9a   : > { %v2691_v60 = vadd.f32 %v2689_v47, %v2685_v57  ;;  %v7105_v46 = vpack.c.bf16 %v2935_v45, %v2934_v22  ;;  %v3028_v57 = vld [vmem:[%s8728_s12] sm:$0xff] }
 0xd9b   : > { %v2698_v63 = vadd.f32 %v2696_v50, %v2692_v59  ;;  %v2936_v50 = vld [vmem:[%s8726_s10 + $0x10] sm:$0xff] }
 0xd9c   : > { %v2697_v2 = vadd.f32 %v2695_v58, %v2691_v60  ;;  %7106 = vmatprep.subr.bf16.mxu0 %v7105_v46  ;;  %v7109_v54 = vpack.c.bf16 %v2937_v53, %v2936_v50  ;;  %v3029_v58 = vld [vmem:[%s8728_s12 + $0x8] sm:$0xff] }
 0xd9d   : > { %v2704_v4 = vadd.f32 %v2702_v49, %v2698_v63  ;;  %v7113_v59 = vpack.c.bf16 %v3029_v58, %v3028_v57 }
 0xd9e   : > { %v2703_v7 = vadd.f32 %v2701_v61, %v2697_v2  ;;  %v6020_v61 = vld [vmem:[%s8725_s9] ss:$0 sm:$0xff] }
 0xd9f   : > { %v2710_v9 = vadd.f32 %v2708_v1, %v2704_v4  ;;  %7114 = vmatprep.subr.bf16.mxu1 %v7113_v59  ;;  %v3123_v4 = vld [vmem:[%s8730_s14 + $0x8] sm:$0xff] }
 0xda0   : > { %v2709_v11 = vadd.f32 %v2707_v52, %v2703_v7  ;;  %v3031_v52 = vld [vmem:[%s8728_s12 + $0x18] sm:$0xff]  ;;  %v6021_v7 = vld [vmem:[%s8727_s11] ss:$0 sm:$0xff] }
 0xda1   : > { %v2716_v14 = vadd.f32 %v2714_v5, %v2710_v9 }
 0xda2   : > { %v2715_v15 = vadd.f32 %v2713_v8, %v2709_v11 }
 0xda3   : > { %v2722_v16 = vadd.f32 %v2720_v56, %v2716_v14  ;;  %v3125_v14 = vld [vmem:[%s8730_s14 + $0x18] sm:$0xff] }
 0xda4   : > { %v2721_v18 = vadd.f32 %v2719_v12, %v2715_v15  ;;  %v3124_v12 = vld [vmem:[%s8730_s14 + $0x10] sm:$0xff]  ;;  %v6030_v15 = vld [vmem:[%s8721_s5 + $0x80] sm:$0xff] }
 0xda5   : > { %v2728_v13 = vadd.f32 %v2726_v0, %v2722_v16  ;;  %v7125_v0 = vpack.c.bf16 %v3125_v14, %v3124_v12  ;;  %v6036_v16 = vld [vmem:[%s8722_s6 + $0x80] sm:$0xff]  ;;  %v8294_v14 = vld [vmem:[%s7790_s23 + $0x18] sm:$0xff] }
 0xda6   : > { %v2727_v21 = vadd.f32 %v2725_v6, %v2721_v18  ;;  %v6031_v6 = vld [vmem:[%s8721_s5 + $0x88] sm:$0xff] }
 0xda7   : > { %v2734_v23 = vadd.f32 %v2732_v10, %v2728_v13  ;;  %v7129_v10 = vpack.c.bf16 %v6031_v6, %v6030_v15  ;;  %v6037_v18 = vld [vmem:[%s8722_s6 + $0x88] sm:$0xff]  ;;  %v6024_v13 = vld [vmem:[%s8729_s13] ss:$0 sm:$0xff]  ;;  %v3570_v6 = vstv %s8277_s3  ;;  %s8492_s3 = sld [smem:[#allocation2 + $0x306]] }
 0xda8   : > { %v2733_v17 = vadd.f32 %v2731_v20, %v2727_v21  ;;  %v7137_v20 = vpack.c.bf16 %v6037_v18, %v6036_v16 }
 0xda9   : > { %v2738_v24 = vsel %vm581_vm0, %v2734_v23, -inf }
 0xdaa   : > { %2739 = vmax.xlane.f32.xlu1 %v2738_v24  ;;  %v2735_v19 = vsel %vm581_vm0, %v2733_v17, -inf }
 0xdab   : > { %2736 = vmax.xlane.f32.xlu0 %v2735_v19 }
 0xe37   : > { %v2740_v30 = vpop.xlane.xlu1 %2739 }
 0xe38   : > { %v2742_v29 = vsub.f32 %v2734_v23, %v2740_v30  ;;  %v2737_v33 = vpop.xlane.xlu0 %2736 }
 0xe39   : > { %v2741_v28 = vsub.f32 %v2733_v17, %v2737_v33  ;;  %v6033_v33 = vld [vmem:[%s8721_s5 + $0x98] sm:$0xff] }
 0xe3a   : > { %v2745_v36 = vmul.f32 1.442695, %v2742_v29  ;;  %v6032_v29 = vld [vmem:[%s8721_s5 + $0x90] sm:$0xff] }
 0xe3b   : > { %v2743_v37 = vmul.f32 1.442695, %v2741_v28  ;;  %v7133_v28 = vpack.c.bf16 %v6033_v33, %v6032_v29  ;;  %v8314_v29 = vld [vmem:[%s7790_s23 + $0x38] sm:$0xff] }
 0xe3c   : > { %7377 = vpow2.f32 %v2745_v36  ;;  %v6038_v36 = vld [vmem:[%s8722_s6 + $0x90] sm:$0xff]  ;;  %v3572_v33 = vmul.f32 %v8314_v29, %v3570_v6 }
 0xe3d   : > { %7379 = vpow2.f32 %v2743_v37  ;;  %v6039_v37 = vld [vmem:[%s8722_s6 + $0x98] sm:$0xff] }
 0xe46   : > { %v7378_v41 = vpop.eup %7377 }
 0xe47   : > { %v7380_v35 = vpop.eup %7379  ;;  %v2750_v32 = vsel %vm581_vm0, %v7378_v41, 0.0 }
 0xe48   : > { %2751 = vadd.xlane.f32.xlu1 %v2750_v32  ;;  %v2747_v27 = vsel %vm581_vm0, %v7380_v35, 0.0  ;;  %v6043_v32 = vld [vmem:[%s8723_s7 + $0x88] sm:$0xff] }
 0xe49   : > { %2748 = vadd.xlane.f32.xlu0 %v2747_v27 }
 0xed5   : > { %v2752_v39 = vpop.xlane.xlu1 %2751 }
 0xed6   : > { %7381 = vrcp.f32 %v2752_v39  ;;  %v2749_v40 = vpop.xlane.xlu0 %2748 }
 0xed7   : > { %7383 = vrcp.f32 %v2749_v40 }
 0xee0   : > { %v7382_v42 = vpop.eup %7381 }
 0xee1   : > { %v7384_v31 = vpop.eup %7383  ;;  %v2756_v44 = vmul.f32 %v7382_v42, %v7378_v41  ;;  %v7141_v41 = vpack.c.bf16 %v6039_v37, %v6038_v36  ;;  %v8318_v36 = vld [vmem:[%s7790_s23 + $0x30] sm:$0xff] }
 0xee2   : > { %v2755_v43 = vmul.f32 %v7384_v31, %v7380_v35  ;;  %v6042_v35 = vld [vmem:[%s8723_s7 + $0x80] sm:$0xff]  ;;  %v3571_v37 = vmul.f32 %v8318_v36, %v3570_v6 }
 0xee3   : > { %v7145_v27 = vpack.c.bf16 %v6043_v32, %v6042_v35  ;;  %v8323_v32 = vld [vmem:[%s7790_s23 + $0x48] sm:$0xff] }
 0xee4   : > { %6683 = vmatprep.mubr.msk.f32.mxu0 %vm581_vm0, %v2755_v43  ;;  %v6044_v43 = vld [vmem:[%s8723_s7 + $0x90] sm:$0xff] }
 0xee5   : > { %6684 = vmatmul.mubr.msk.f32.vlgmr.msra.gmra.mrb[22].mxu0 %vm581_vm0, %v2756_v44  ;;  %v6045_v44 = vld [vmem:[%s8723_s7 + $0x98] sm:$0xff] }
 0xee6   : > { %7108 = vmatpush3.bf16.msra.mxu0 %v7105_v46  ;;  %v7149_v46 = vpack.c.bf16 %v6045_v44, %v6044_v43 }
 0xee7   : > { %7110 = vmatprep.subr.bf16.mxu0 %v7109_v54 }
 0xeea   : > { %7112 = vmatpush3.bf16.msra.mxu0 %v7109_v54 }
 0xfb8   : > { %v6685_v47 = vpop.f32.mrb[22].mxu0 }
 0xfb9   : > { %v2829_v48 = vpop.f32.mrb[23].mxu0 }
 0xfba   : > { %6688 = vmatprep.mubr.msk.f32.mxu1 %vm907_vm2, %v2829_v48  ;;  %v6064_v48 = vld [vmem:[%s8721_s5 + $0xa8] sm:$0xff] }
 0xfbb   : > { %6689 = vmatmul.mubr.msk.f32.vlgmr.msra.gmra.mrb[10].mxu1 %vm907_vm2, %v6685_v47  ;;  %v6063_v47 = vld [vmem:[%s8721_s5 + $0xa0] sm:$0xff] }
 0xfbc   : > { %7116 = vmatpush3.bf16.msra.mxu1 %v7113_v59  ;;  %v7163_v59 = vpack.c.bf16 %v6064_v48, %v6063_v47 }
0x108e   : > { %v6690_v49 = vpop.f32.mrb[10].mxu1 }
0x108f   : > { %v2924_v60 = vadd.f32 %v6690_v49, %v7728_v26  ;;  %v2912_v51 = vpop.f32.mrb[11].mxu1  ;;  %v3030_v26 = vld [vmem:[%s8728_s12 + $0x10] sm:$0xff] }
0x1090   : > { %v2923_v63 = vadd.f32 %v2912_v51, %v7726_v25  ;;  %v7117_v3 = vpack.c.bf16 %v3031_v52, %v3030_v26  ;;  %v3122_v25 = vld [vmem:[%s8730_s14] sm:$0xff]  ;;  %v6065_v49 = vld [vmem:[%s8721_s5 + $0xb0] sm:$0xff]  ;;  %v6076_v26 = vld [vmem:[%s8723_s7 + $0xa8] sm:$0xff] }
0x1091   : > { %v8148_v2 = vadd.f32 %v6020_v61, %v2924_v60  ;;  %v7121_v5 = vpack.c.bf16 %v3123_v4, %v3122_v25  ;;  %v6066_v60 = vld [vmem:[%s8721_s5 + $0xb8] sm:$0xff] }
0x1092   : > { %v8146_v1 = vadd.f32 %v6020_v61, %v2923_v63  ;;  %7118 = vmatprep.subr.bf16.mxu1 %v7117_v3  ;;  %v6078_v25 = vld [vmem:[%s8723_s7 + $0xb8] sm:$0xff] }
0x1093   : > { %7120 = vmatpush3.bf16.msra.mxu1 %v7117_v3  ;;  %7122 = vmatprep.subr.bf16.mxu0 %v7121_v5  ;;  %v6077_v3 = vld [vmem:[%s8723_s7 + $0xb0] sm:$0xff] }
0x1094   : > { %6699 = vmatprep.mubr.msk.f32.mxu0 %vm667_vm1, %v8146_v1  ;;  %7130 = vmatprep.subr.bf16.mxu1 %v7129_v10  ;;  %v7183_v4 = vpack.c.bf16 %v6078_v25, %v6077_v3 }
0x1095   : > { %6700 = vmatmul.mubr.msk.f32.vlgmr.msra.gmra.mrb[24].mxu0 %vm667_vm1, %v8148_v2 }
0x1096   : > { %7124 = vmatpush3.bf16.msra.mxu0 %v7121_v5  ;;  %v3552_v5 = vstv %s6052_s28  ;;  %s8398_s28 = sld [smem:[#allocation2 + $0x286]] }
0x1097   : > { %7126 = vmatprep.subr.bf16.mxu0 %v7125_v0 }
0x109a   : > { %7128 = vmatpush3.bf16.msra.mxu0 %v7125_v0 }
0x109b   : > { %7138 = vmatprep.subr.bf16.mxu0 %v7137_v20 }
0x1168   : > { %v6701_v55 = vpop.f32.mrb[24].mxu0 }
0x1169   : > { %v3023_v8 = vadd.f32 %v6701_v55, %v6021_v7  ;;  %v3017_v9 = vpop.f32.mrb[25].mxu0  ;;  %v8284_v55 = vld [vmem:[%s7790_s23 + $0x8] sm:$0xff] }
0x116a   : > { %v3018_v56 = vadd.f32 %v6021_v7, %v3017_v9  ;;  %v3558_v7 = vstv %s6053_s18  ;;  %s6092_s18 = sld [smem:[#allocation2 + $0x287]] }
0x116b   : > { %v3027_v62 = vmax.f32 %v3023_v8, 0.0  ;;  %v3554_v8 = vmul.f32 %v8284_v55, %v3552_v5  ;;  %v3560_v0 = vmul.f32 %v8294_v14, %v3558_v7 }
0x116c   : > { %v3026_v11 = vmax.f32 %v3018_v56, 0.0  ;;  %v3564_v56 = vstv %s6054_s26  ;;  %s8488_s26 = sld [smem:[#allocation2 + $0x305]] }
0x116e   : > { %6710 = vmatprep.mubr.msk.f32.mxu1 %vm667_vm1, %v3026_v11  ;;  %v8288_v11 = vld [vmem:[%s7790_s23] sm:$0xff] }
0x116f   : > { %6711 = vmatmul.mubr.msk.f32.vlgmr.msra.gmra.mrb[20].mxu1 %vm667_vm1, %v3027_v62  ;;  %v3553_v62 = vmul.f32 %v8288_v11, %v3552_v5 }
0x1170   : > { %7132 = vmatpush3.bf16.msra.mxu1 %v7129_v10  ;;  %v8299_v10 = vld [vmem:[%s7790_s23 + $0x10] sm:$0xff] }
0x1171   : > { %7134 = vmatprep.subr.bf16.mxu1 %v7133_v28  ;;  %v3559_v18 = vmul.f32 %v8299_v10, %v3558_v7 }
0x1174   : > { %7136 = vmatpush3.bf16.msra.mxu1 %v7133_v28 }
0x1175   : > { %7146 = vmatprep.subr.bf16.mxu1 %v7145_v27 }
0x1242   : > { %v6712_v21 = vpop.f32.mrb[20].mxu1 }
0x1243   : > { %v3117_v23 = vadd.f32 %v6712_v21, %v6024_v13  ;;  %v3111_v17 = vpop.f32.mrb[21].mxu1 }
0x1244   : > { %v3112_v24 = vadd.f32 %v6024_v13, %v3111_v17  ;;  %v8305_v13 = vld [vmem:[%s7790_s23 + $0x28] sm:$0xff]  ;;  %v8309_v17 = vld [vmem:[%s7790_s23 + $0x20] sm:$0xff] }
0x1245   : > { %v3121_v30 = vmax.f32 %v3117_v23, 0.0  ;;  %v3566_v21 = vmul.f32 %v8305_v13, %v3564_v56 }
0x1246   : > { %v3120_v19 = vmax.f32 %v3112_v24, 0.0  ;;  %v3565_v24 = vmul.f32 %v8309_v17, %v3564_v56 }
0x1248   : > { %6721 = vmatprep.mubr.msk.f32.mxu0 %vm667_vm1, %v3120_v19  ;;  %v3576_v19 = vstv %s8279_s29  ;;  %s6129_s29 = sld [smem:[#allocation2 + $0x307]] }
0x1249   : > { %6722 = vmatmul.mubr.msk.f32.vlgmr.msra.gmra.mrb[26].mxu0 %vm667_vm1, %v3121_v30 }
0x124a   : > { %7140 = vmatpush3.bf16.msra.mxu0 %v7137_v20 }
0x124b   : > { %7142 = vmatprep.subr.bf16.mxu0 %v7141_v41 }
0x124e   : > { %7144 = vmatpush3.bf16.msra.mxu0 %v7141_v41  ;;  %v3582_v41 = vstv %s8281_s27  ;;  %s6085_s27 = sld [smem:[#allocation2 + $0x280]] }
0x131c   : > { %v6723_v39 = vpop.f32.mrb[26].mxu0 }
0x131d   : > { %v3211_v40 = vadd.f32 %v6723_v39, %v6027_v38  ;;  %v3205_v42 = vpop.f32.mrb[27].mxu0 }
0x131e   : > { %v3206_v31 = vadd.f32 %v6027_v38, %v3205_v42  ;;  %v8330_v42 = vld [vmem:[%s7790_s23 + $0x40] sm:$0xff] }
0x131f   : > { %v8225_v45 = vadd.f32 %v3211_v40, %v8148_v2  ;;  %v6075_v2 = vld [vmem:[%s8723_s7 + $0xa0] sm:$0xff]  ;;  %v3588_v40 = vstv %s8291_s19  ;;  %s6086_s19 = sld [smem:[#allocation2 + $0x281]] }
0x1320   : > { %v8222_v22 = vadd.f32 %v3206_v31, %v8146_v1  ;;  %v7167_v1 = vpack.c.bf16 %v6066_v60, %v6065_v49  ;;  %v7179_v52 = vpack.c.bf16 %v6076_v26, %v6075_v2  ;;  %v3577_v31 = vmul.f32 %v8330_v42, %v3576_v19  ;;  %v8349_v60 = vld [vmem:[%s7790_s23 + $0x60] sm:$0xff]  ;;  %v8357_v26 = vld [vmem:[%s7790_s23 + $0x70] sm:$0xff] }
0x1322   : > { %6732 = vmatprep.mubr.msk.f32.mxu1 %vm667_vm1, %v8222_v22  ;;  %6743 = vmatprep.mubr.msk.f32.mxu0 %vm667_vm1, %v8222_v22 }
0x1323   : > { %6733 = vmatmul.mubr.msk.f32.vlgmr.msra.gmra.mrb[22].mxu1 %vm667_vm1, %v8225_v45  ;;  %6744 = vmatmul.mubr.msk.f32.vlgmr.msra.gmra.mrb[28].mxu0 %vm667_vm1, %v8225_v45 }
0x1324   : > { %7148 = vmatpush3.bf16.msra.mxu1 %v7145_v27  ;;  %6754 = vmatprep.mubr.msk.f32.mxu1 %vm667_vm1, %v8222_v22  ;;  %v3578_v27 = vmul.f32 %v8323_v32, %v3576_v19  ;;  %v6069_v19 = vld [vmem:[%s8722_s6 + $0xa0] sm:$0xff] }
0x1325   : > { %7150 = vmatprep.subr.bf16.mxu1 %v7149_v46 }
0x1328   : > { %7152 = vmatpush3.bf16.msra.mxu1 %v7149_v46  ;;  %v8336_v46 = vld [vmem:[%s7790_s23 + $0x58] sm:$0xff] }
0x1329   : > { %v3584_v47 = vmul.f32 %v8336_v46, %v3582_v41 }
0x132b   : > { %6755 = vmatmul.mubr.msk.f32.vlgmr.msra.gmra.mrb[24].mxu1 %vm667_vm1, %v8225_v45 }
0x13f6   : > { %v6734_v50 = vpop.f32.mrb[22].mxu1  ;;  %v6745_v53 = vpop.f32.mrb[28].mxu0 }
0x13f7   : > { %v3293_v54 = vpop.f32.mrb[23].mxu1  ;;  %v3373_v57 = vpop.f32.mrb[29].mxu0 }
0x13f8   : > { %v7153_v58 = vpack.c.bf16 %v6745_v53, %v3373_v57  ;;  %6761 = vmatprep.mubr.msk.f32.mxu0 %vm907_vm2, %v3293_v54  ;;  %v8341_v53 = vld [vmem:[%s7790_s23 + $0x50] sm:$0xff] }
0x13f9   : > { %v3583_v54 = vmul.f32 %v8341_v53, %v3582_v41 }
0x13fa   : > { %7155 = vmatprep.subr.msk.bf16.mxu0 %vm7750_vm3, %v7153_v58 }
0x13fb   : > { %7158 = vmatpush3.bf16.xpose.msk.msra.mxu0 %vm7750_vm3, %v7153_v58  ;;  %v8345_v58 = vld [vmem:[%s7790_s23 + $0x68] sm:$0xff] }
0x13fc   : > { %7164 = vmatprep.subr.bf16.mxu0 %v7163_v59 }
0x13fe   : > { %v6756_v61 = vpop.f32.mrb[24].mxu1 }
0x13ff   : > { %v3453_v51 = vpop.f32.mrb[25].mxu1 }
0x1400   : > { %v7159_v63 = vpack.c.bf16 %v6756_v61, %v3453_v51  ;;  %v3589_v61 = vmul.f32 %v8349_v60, %v3588_v40 }
0x1402   : > { %7160 = vmatprep.subr.bf16.mxu1 %v7159_v63  ;;  %6762 = vmatmul.mubr.msk.f32.vlgmr.msra.gmra.mrb[30].mxu0 %vm907_vm2, %v6734_v50  ;;  %v3594_v50 = vstv %s8302_s2  ;;  %s6087_s2 = sld [smem:[#allocation2 + $0x282]] }
0x1403   : > { %7162 = vmatpush3.bf16.msra.mxu1 %v7159_v63  ;;  %7166 = vmatpush3.bf16.msra.mxu0 %v7163_v59  ;;  %v3590_v59 = vmul.f32 %v8345_v58, %v3588_v40  ;;  %v8353_v63 = vld [vmem:[%s7790_s23 + $0x78] sm:$0xff]  ;;  %s6088_s23 = sld [smem:[#allocation2 + $0x283]] }
0x1404   : > { %6779 = vmatprep.mubr.msk.f32.mxu0 %vm667_vm1, %v8222_v22  ;;  %7168 = vmatprep.subr.bf16.mxu0 %v7167_v1 }
0x1407   : > { %7170 = vmatpush3.bf16.msra.mxu0 %v7167_v1  ;;  %v3596_v1 = vmul.f32 %v8353_v63, %v3594_v50 }
0x1408   : > { %7180 = vmatprep.subr.bf16.mxu0 %v7179_v52 }
0x140a   : > { %6780 = vmatmul.mubr.msk.f32.vlgmr.msra.gmra.mrb[32].mxu0 %vm667_vm1, %v8225_v45 }
0x140b   : > { %7182 = vmatpush3.bf16.msra.mxu0 %v7179_v52  ;;  %6801 = vmatprep.mubr.msk.f32.mxu0 %vm667_vm1, %v8222_v22  ;;  %v3595_v52 = vmul.f32 %v8357_v26, %v3594_v50 }
0x140c   : > { %7184 = vmatprep.subr.bf16.mxu0 %v7183_v4 }
0x140f   : > { %7186 = vmatpush3.bf16.msra.mxu0 %v7183_v4 }
0x1412   : > { %6802 = vmatmul.mubr.msk.f32.vlgmr.msra.gmra.mrb[34].mxu0 %vm667_vm1, %v8225_v45 }
0x14d5   : > { %v6763_v9 = vpop.f32.mrb[30].mxu0 }
0x14d6   : > { %v3550_v12 = vmul.f32 0.35355338, %v6763_v9  ;;  %v3540_v15 = vpop.f32.mrb[31].mxu0 }
0x14d7   : > { %v3549_v16 = vmul.f32 0.35355338, %v3540_v15 }
0x14d8   : > { %v3556_v20 = vadd.f32 %v3554_v8, %v3550_v12 }
0x14d9   : > { %v3555_v23 = vadd.f32 %v3553_v62, %v3549_v16 }
0x14da   : > { %v3562_v30 = vadd.f32 %v3560_v0, %v3556_v20 }
0x14db   : > { %v3561_v28 = vadd.f32 %v3559_v18, %v3555_v23 }
0x14dc   : > { %v3568_v35 = vadd.f32 %v3566_v21, %v3562_v30  ;;  %v6070_v30 = vld [vmem:[%s8722_s6 + $0xa8] sm:$0xff] }
0x14dd   : > { %v3567_v38 = vadd.f32 %v3565_v24, %v3561_v28  ;;  %v8326_v39 = vpop.f32.mrb[32].mxu0 }
0x14de   : > { %v3574_v43 = vadd.f32 %v3572_v33, %v3568_v35  ;;  %v8333_v44 = vpop.f32.mrb[33].mxu0  ;;  %v7171_v33 = vpack.c.bf16 %v6070_v30, %v6069_v19  ;;  %v6071_v35 = vld [vmem:[%s8722_s6 + $0xb0] sm:$0xff] }
0x14df   : > { %v3573_v48 = vadd.f32 %v3571_v37, %v3567_v38 }
0x14e0   : > { %v3580_v57 = vadd.f32 %v3578_v27, %v3574_v43  ;;  %7172 = vmatprep.subr.bf16.mxu1 %v7171_v33  ;;  %v6072_v27 = vld [vmem:[%s8722_s6 + $0xb8] sm:$0xff] }
0x14e1   : > { %v3579_v49 = vadd.f32 %v3577_v31, %v3573_v48  ;;  %v7175_v43 = vpack.c.bf16 %v6072_v27, %v6071_v35 }
0x14e2   : > { %v3586_v51 = vadd.f32 %v3584_v47, %v3580_v57 }
0x14e3   : > { %v3585_v2 = vadd.f32 %v3583_v54, %v3579_v49 }
0x14e4   : > { %v3592_v3 = vadd.f32 %v3590_v59, %v3586_v51  ;;  %v4040_v59 = vstv %s6086_s19  ;;  %v4046_v51 = vstv %s6087_s2 }
0x14e5   : > { %v6803_v25 = vpop.f32.mrb[34].mxu0  ;;  %v3591_v4 = vadd.f32 %v3589_v61, %v3585_v2 }
0x14e6   : > { %v3935_v5 = vpop.f32.mrb[35].mxu0  ;;  %v3598_v7 = vadd.f32 %v3596_v1, %v3592_v3  ;;  %v4052_v3 = vstv %s6088_s23  ;;  %s6122_s23 = sld [smem:[#allocation2 + $0x300]] }
0x14e7   : > { %v7193_v8 = vpack.c.bf16 %v6803_v25, %v3935_v5  ;;  %v3597_v9 = vadd.f32 %v3595_v52, %v3591_v4  ;;  %v4041_v4 = vmul.f32 %v8299_v10, %v4040_v59 }
0x14e8   : > { %v3602_v56 = vsel %vm581_vm0, %v3598_v7, -inf }
0x14e9   : > { %3603 = vmax.xlane.f32.xlu1 %v3602_v56  ;;  %7194 = vmatprep.subr.bf16.mxu0 %v7193_v8  ;;  %v3599_v62 = vsel %vm581_vm0, %v3597_v9, -inf  ;;  %v4058_v56 = vstv %s6089_s20  ;;  %s6123_s20 = sld [smem:[#allocation2 + $0x301]] }
0x14ea   : > { %7196 = vmatpush3.bf16.msra.mxu0 %v7193_v8  ;;  %3600 = vmax.xlane.f32.xlu0 %v3599_v62 }
0x1576   : > { %v3604_v12 = vpop.xlane.xlu1 %3603 }
0x1577   : > { %v3606_v0 = vsub.f32 %v3598_v7, %v3604_v12  ;;  %v3601_v15 = vpop.xlane.xlu0 %3600  ;;  %v4048_v7 = vmul.f32 %v8305_v13, %v4046_v51  ;;  %v4054_v12 = vmul.f32 %v8314_v29, %v4052_v3 }
0x1578   : > { %v3605_v6 = vsub.f32 %v3597_v9, %v3601_v15  ;;  %v4047_v9 = vmul.f32 %v8309_v17, %v4046_v51  ;;  %v4053_v15 = vmul.f32 %v8318_v36, %v4052_v3 }
0x1579   : > { %v3609_v16 = vmul.f32 1.442695, %v3606_v0 }
0x157a   : > { %v3607_v18 = vmul.f32 1.442695, %v3605_v6  ;;  %v4064_v6 = vstv %s8394_s30  ;;  %s6124_s30 = sld [smem:[#allocation2 + $0x302]] }
0x157b   : > { %7385 = vpow2.f32 %v3609_v16  ;;  %v4066_v19 = vmul.f32 %v8336_v46, %v4064_v6 }
0x157c   : > { %7387 = vpow2.f32 %v3607_v18  ;;  %v4060_v18 = vmul.f32 %v8323_v32, %v4058_v56 }
0x1585   : > { %v7386_v20 = vpop.eup %7385 }
0x1586   : > { %v7388_v21 = vpop.eup %7387  ;;  %v3614_v23 = vsel %vm581_vm0, %v7386_v20, 0.0 }
0x1587   : > { %3615 = vadd.xlane.f32.xlu1 %v3614_v23  ;;  %v3611_v24 = vsel %vm581_vm0, %v7388_v21, 0.0  ;;  %v4059_v23 = vmul.f32 %v8330_v42, %v4058_v56  ;;  %v6095_v56 = vld [vmem:[%s8724_s8 + $0x28] sm:$0xff] }
0x1588   : > { %3612 = vadd.xlane.f32.xlu0 %v3611_v24 }
0x1614   : > { %v3616_v28 = vpop.xlane.xlu1 %3615 }
0x1615   : > { %7389 = vrcp.f32 %v3616_v28  ;;  %v3613_v37 = vpop.xlane.xlu0 %3612  ;;  %v4065_v28 = vmul.f32 %v8341_v53, %v4064_v6  ;;  %v6103_v6 = vld [vmem:[%s8721_s5 + $0xd8] sm:$0xff] }
0x1616   : > { %7391 = vrcp.f32 %v3613_v37 }
0x161f   : > { %v7390_v41 = vpop.eup %7389 }
0x1620   : > { %v7392_v38 = vpop.eup %7391  ;;  %v3620_v31 = vmul.f32 %v7390_v41, %v7386_v20 }
0x1621   : > { %v3619_v40 = vmul.f32 %v7392_v38, %v7388_v21  ;;  %v4070_v21 = vstv %s8398_s28  ;;  %s6125_s28 = sld [smem:[#allocation2 + $0x303]] }
0x1622   : > { %v4072_v41 = vmul.f32 %v8345_v58, %v4070_v21  ;;  %v4071_v27 = vmul.f32 %v8349_v60, %v4070_v21 }
0x1623   : > { %6768 = vmatprep.mubr.msk.f32.mxu1 %vm581_vm0, %v3619_v40 }
0x1624   : > { %6769 = vmatmul.mubr.msk.f32.vlgmr.msra.gmra.mrb[26].mxu1 %vm581_vm0, %v3620_v31 }
0x1625   : > { %7174 = vmatpush3.bf16.msra.mxu1 %v7171_v33  ;;  %6790 = vmatprep.mubr.msk.f32.mxu1 %vm667_vm1, %v8222_v22  ;;  %v4076_v33 = vstv %s6092_s18  ;;  %s6126_s18 = sld [smem:[#allocation2 + $0x304]] }
0x1626   : > { %7176 = vmatprep.subr.bf16.mxu1 %v7175_v43  ;;  %v4078_v40 = vmul.f32 %v8353_v63, %v4076_v33 }
0x1629   : > { %7178 = vmatpush3.bf16.msra.mxu1 %v7175_v43  ;;  %v4077_v43 = vmul.f32 %v8357_v26, %v4076_v33  ;;  %v6115_v33 = vld [vmem:[%s8723_s7 + $0xd8] sm:$0xff] }
0x162c   : > { %6791 = vmatmul.mubr.msk.f32.vlgmr.msra.gmra.mrb[28].mxu1 %vm667_vm1, %v8225_v45 }
0x162d   : > { %6808 = vmatprep.mubr.msk.f32.mxu1 %vm907_vm2, %v8333_v44  ;;  %v4034_v44 = vstv %s6085_s27  ;;  %s6164_s27 = sld [smem:[#allocation2 + $0x387]] }
0x162e   : > { %v4036_v49 = vmul.f32 %v8284_v55, %v4034_v44  ;;  %v4035_v1 = vmul.f32 %v8288_v11, %v4034_v44 }
0x16f7   : > { %v8384_v47 = vpop.f32.mrb[26].mxu1 }
0x16f8   : > { %v8386_v48 = vpop.f32.mrb[27].mxu1 }
0x16ff   : > { %v6792_v50 = vpop.f32.mrb[28].mxu1 }
0x1700   : > { %v3855_v54 = vpop.f32.mrb[29].mxu1 }
0x1701   : > { %v7187_v57 = vpack.c.bf16 %v6792_v50, %v3855_v54 }
0x1703   : > { %7189 = vmatprep.subr.msk.bf16.mxu1 %vm7750_vm3, %v7187_v57 }
0x1704   : > { %7192 = vmatpush3.bf16.xpose.msk.msra.mxu1 %vm7750_vm3, %v7187_v57 }
0x1705   : > { %6818 = vmatprep.subr.mxu1 %v6095_v56 }
0x170b   : > { %6809 = vmatmul.mubr.msk.f32.vlgmr.msra.gmra.mrb[30].mxu1 %vm907_vm2, %v8326_v39  ;;  %v4042_v39 = vmul.f32 %v8294_v14, %v4040_v59 }
0x170c   : > { %6819 = vmatpush3.msra.mxu1 %v6095_v56 }
0x17de   : > { %v6810_v61 = vpop.f32.mrb[30].mxu1 }
0x17df   : > { %v4032_v2 = vmul.f32 0.35355338, %v6810_v61  ;;  %v4022_v52 = vpop.f32.mrb[31].mxu1 }
0x17e0   : > { %v4031_v25 = vmul.f32 0.35355338, %v4022_v52 }
0x17e1   : > { %v4038_v5 = vadd.f32 %v4036_v49, %v4032_v2 }
0x17e2   : > { %v4037_v8 = vadd.f32 %v4035_v1, %v4031_v25 }
0x17e3   : > { %v4044_v62 = vadd.f32 %v4042_v39, %v4038_v5 }
0x17e4   : > { %v4043_v0 = vadd.f32 %v4041_v4, %v4037_v8  ;;  %v6101_v8 = vld [vmem:[%s8721_s5 + $0xc8] sm:$0xff] }
0x17e5   : > { %v4050_v16 = vadd.f32 %v4048_v7, %v4044_v62  ;;  %v6100_v7 = vld [vmem:[%s8721_s5 + $0xc0] sm:$0xff] }
0x17e6   : > { %v4049_v20 = vadd.f32 %v4047_v9, %v4043_v0  ;;  %v7197_v9 = vpack.c.bf16 %v6101_v8, %v6100_v7  ;;  %v4696_v7 = vstv %s6125_s28  ;;  %s6159_s28 = sld [smem:[#allocation2 + $0x382]] }
0x17e7   : > { %v4056_v24 = vadd.f32 %v4054_v12, %v4050_v16 }
0x17e8   : > { %v4055_v30 = vadd.f32 %v4053_v15, %v4049_v20  ;;  %7198 = vmatprep.subr.bf16.mxu0 %v7197_v9  ;;  %v6102_v15 = vld [vmem:[%s8721_s5 + $0xd0] sm:$0xff] }
0x17e9   : > { %v4062_v37 = vadd.f32 %v4060_v18, %v4056_v24  ;;  %v7201_v21 = vpack.c.bf16 %v6103_v6, %v6102_v15  ;;  %v6113_v24 = vld [vmem:[%s8723_s7 + $0xc8] sm:$0xff]  ;;  %v4702_v15 = vstv %s6126_s18  ;;  %s6160_s18 = sld [smem:[#allocation2 + $0x383]] }
0x17ea   : > { %v4061_v35 = vadd.f32 %v4059_v23, %v4055_v30  ;;  %v6112_v23 = vld [vmem:[%s8723_s7 + $0xc0] sm:$0xff]  ;;  %v6114_v30 = vld [vmem:[%s8723_s7 + $0xd0] sm:$0xff] }
0x17eb   : > { %v4068_v38 = vadd.f32 %v4066_v19, %v4062_v37  ;;  %v7213_v19 = vpack.c.bf16 %v6113_v24, %v6112_v23  ;;  %v6062_v37 = vld [vmem:[%s8724_s8 + $0x20] sm:$0xff]  ;;  %v4704_v24 = vmul.f32 %v8323_v32, %v4702_v15 }
0x17ec   : > { %v4067_v31 = vadd.f32 %v4065_v28, %v4061_v35  ;;  %v7217_v28 = vpack.c.bf16 %v6115_v33, %v6114_v30  ;;  %6823 = vmatprep.subr.mxu1 %v6062_v37  ;;  %v6107_v35 = vld [vmem:[%s8722_s6 + $0xc8] sm:$0xff]  ;;  %v4714_v30 = vstv %s8492_s3  ;;  %v4703_v33 = vmul.f32 %v8330_v42, %v4702_v15  ;;  %s8575_s3 = sld [smem:[#allocation2 + $0x385]] }
0x17ed   : > { %v4074_v50 = vadd.f32 %v4072_v41, %v4068_v38  ;;  %v6106_v41 = vld [vmem:[%s8722_s6 + $0xc0] sm:$0xff] }
0x17ee   : > { %v4073_v54 = vadd.f32 %v4071_v27, %v4067_v31  ;;  %v6108_v31 = vld [vmem:[%s8722_s6 + $0xd0] sm:$0xff] }
0x17ef   : > { %v4080_v57 = vadd.f32 %v4078_v40, %v4074_v50  ;;  %v7205_v40 = vpack.c.bf16 %v6107_v35, %v6106_v41  ;;  %v4720_v35 = vstv %s6129_s29  ;;  %s8579_s29 = sld [smem:[#allocation2 + $0x386]] }
0x17f0   : > { %v4079_v44 = vadd.f32 %v4077_v43, %v4073_v54  ;;  %v6109_v43 = vld [vmem:[%s8722_s6 + $0xd8] sm:$0xff] }
0x17f1   : > { %v4084_v59 = vsel %vm581_vm0, %v4080_v57, -inf }
0x17f2   : > { %4085 = vmax.xlane.f32.xlu1 %v4084_v59  ;;  %v4081_v49 = vsel %vm581_vm0, %v4079_v44, -inf }
0x17f3   : > { %4082 = vmax.xlane.f32.xlu0 %v4081_v49 }
0x187f   : > { %v4086_v61 = vpop.xlane.xlu1 %4085 }
0x1880   : > { %v4088_v51 = vsub.f32 %v4080_v57, %v4086_v61  ;;  %v4083_v1 = vpop.xlane.xlu0 %4082  ;;  %v7209_v57 = vpack.c.bf16 %v6109_v43, %v6108_v31  ;;  %v4715_v43 = vmul.f32 %v8349_v60, %v4714_v30 }
0x1881   : > { %v4087_v2 = vsub.f32 %v4079_v44, %v4083_v1  ;;  %v4684_v1 = vstv %s6123_s20  ;;  %s6157_s20 = sld [smem:[#allocation2 + $0x380]] }
0x1882   : > { %v4091_v39 = vmul.f32 1.442695, %v4088_v51 }
0x1883   : > { %v4089_v52 = vmul.f32 1.442695, %v4087_v2 }
0x1884   : > { %7393 = vpow2.f32 %v4091_v39 }
0x1885   : > { %7395 = vpow2.f32 %v4089_v52  ;;  %v4690_v52 = vstv %s6124_s30  ;;  %s6158_s30 = sld [smem:[#allocation2 + $0x381]] }
0x188e   : > { %v7394_v3 = vpop.eup %7393 }
0x188f   : > { %v7396_v25 = vpop.eup %7395  ;;  %v4096_v4 = vsel %vm581_vm0, %v7394_v3, 0.0 }
0x1890   : > { %4097 = vadd.xlane.f32.xlu1 %v4096_v4  ;;  %v4093_v5 = vsel %vm581_vm0, %v7396_v25, 0.0  ;;  %v4686_v4 = vmul.f32 %v8294_v14, %v4684_v1 }
0x1891   : > { %4094 = vadd.xlane.f32.xlu0 %v4093_v5 }
0x191d   : > { %v4098_v62 = vpop.xlane.xlu1 %4097 }
0x191e   : > { %7397 = vrcp.f32 %v4098_v62  ;;  %v4095_v12 = vpop.xlane.xlu0 %4094  ;;  %v4692_v62 = vmul.f32 %v8305_v13, %v4690_v52 }
0x191f   : > { %7399 = vrcp.f32 %v4095_v12 }
0x1928   : > { %v7398_v0 = vpop.eup %7397 }
0x1929   : > { %v7400_v16 = vpop.eup %7399  ;;  %v4102_v20 = vmul.f32 %v7398_v0, %v7394_v3  ;;  %v4691_v0 = vmul.f32 %v8309_v17, %v4690_v52 }
0x192a   : > { %v4101_v18 = vmul.f32 %v7400_v16, %v7396_v25  ;;  %v4698_v16 = vmul.f32 %v8314_v29, %v4696_v7 }
0x192c   : > { %6815 = vmatprep.mubr.msk.f32.mxu0 %vm581_vm0, %v4101_v18 }
0x192d   : > { %6816 = vmatmul.mubr.msk.f32.vlgmr.msra.gmra.mrb[36].mxu0 %vm581_vm0, %v4102_v20  ;;  %v4697_v20 = vmul.f32 %v8318_v36, %v4696_v7 }
0x192e   : > { %7200 = vmatpush3.bf16.msra.mxu0 %v7197_v9  ;;  %6836 = vmatprep.mubr.msk.f32.mxu0 %vm667_vm1, %v8222_v22  ;;  %v4685_v9 = vmul.f32 %v8299_v10, %v4684_v1 }
0x192f   : > { %7202 = vmatprep.subr.bf16.mxu0 %v7201_v21 }
0x1932   : > { %7204 = vmatpush3.bf16.msra.mxu0 %v7201_v21  ;;  %v4708_v21 = vstv %s8488_s26  ;;  %s6161_s26 = sld [smem:[#allocation2 + $0x384]] }
0x1933   : > { %7214 = vmatprep.subr.bf16.mxu0 %v7213_v19 }
0x1935   : > { %6837 = vmatmul.mubr.msk.f32.vlgmr.msra.gmra.mrb[38].mxu0 %vm667_vm1, %v8225_v45 }
0x1936   : > { %7216 = vmatpush3.bf16.msra.mxu0 %v7213_v19  ;;  %6858 = vmatprep.mubr.msk.f32.mxu0 %vm667_vm1, %v8222_v22 }
0x1937   : > { %7218 = vmatprep.subr.bf16.mxu0 %v7217_v28 }
0x193a   : > { %7220 = vmatpush3.bf16.msra.mxu0 %v7217_v28 }
0x193d   : > { %6859 = vmatmul.mubr.msk.f32.vlgmr.msra.gmra.mrb[40].mxu0 %vm667_vm1, %v8225_v45 }
0x1a00   : > { %v6817_v27 = vpop.f32.mrb[36].mxu0 }
0x1a01   : > { %v4175_v38 = vpop.f32.mrb[37].mxu0 }
0x1a02   : > { %6820 = vmatprep.mubr.msk.f32.mxu1 %vm907_vm2, %v4175_v38 }
0x1a03   : > { %6821 = vmatmul.mubr.msk.f32.vlgmr.msra.gmra.mrb[32].mxu1 %vm907_vm2, %v6817_v27  ;;  %v4709_v27 = vmul.f32 %v8341_v53, %v4708_v21 }
0x1a04   : > { %6824 = vmatpush3.msra.mxu1 %v6062_v37  ;;  %6825 = vmatprep.mubr.msk.f32.mxu1 %vm907_vm2, %v8386_v48  ;;  %v4710_v37 = vmul.f32 %v8336_v46, %v4708_v21 }
0x1a05   : > { %7206 = vmatprep.subr.bf16.mxu1 %v7205_v40 }
0x1a08   : > { %v6838_v50 = vpop.f32.mrb[38].mxu0 }
0x1a09   : > { %v4419_v54 = vpop.f32.mrb[39].mxu0 }
0x1a0b   : > { %6826 = vmatmul.mubr.msk.f32.vlgmr.msra.gmra.mrb[32].mxu1 %vm907_vm2, %v8384_v47  ;;  %v4678_v47 = vstv %s6122_s23 }
0x1a0c   : > { %7208 = vmatpush3.bf16.msra.mxu1 %v7205_v40  ;;  %6847 = vmatprep.mubr.msk.f32.mxu1 %vm667_vm1, %v8222_v22  ;;  %v4680_v2 = vmul.f32 %v8284_v55, %v4678_v47  ;;  %v4679_v3 = vmul.f32 %v8288_v11, %v4678_v47  ;;  %v4716_v40 = vmul.f32 %v8345_v58, %v4714_v30  ;;  %v6148_v30 = vld [vmem:[%s8723_s7 + $0xe8] sm:$0xff] }
0x1a0d   : > { %7210 = vmatprep.subr.bf16.mxu1 %v7209_v57 }
0x1a10   : > { %7212 = vmatpush3.bf16.msra.mxu1 %v7209_v57  ;;  %v6860_v48 = vpop.f32.mrb[40].mxu0 }
0x1a11   : > { %v4579_v44 = vpop.f32.mrb[41].mxu0 }
0x1a12   : > { %v7227_v59 = vpack.c.bf16 %v6860_v48, %v4579_v44  ;;  %v4721_v48 = vmul.f32 %v8357_v26, %v4720_v35 }
0x1a13   : > { %6848 = vmatmul.mubr.msk.f32.vlgmr.msra.gmra.mrb[34].mxu1 %vm667_vm1, %v8225_v45 }
0x1a14   : > { %6865 = vmatprep.mubr.msk.f32.mxu1 %vm907_vm2, %v4419_v54  ;;  %7228 = vmatprep.subr.bf16.mxu0 %v7227_v59  ;;  %v4722_v54 = vmul.f32 %v8353_v63, %v4720_v35  ;;  %v6141_v35 = vld [vmem:[%s8722_s6 + $0xe0] sm:$0xff] }
0x1a15   : > { %7230 = vmatpush3.bf16.msra.mxu0 %v7227_v59 }
0x1ae6   : > { %v6849_v49 = vpop.f32.mrb[34].mxu1 }
0x1ae7   : > { %v4499_v61 = vpop.f32.mrb[35].mxu1 }
0x1ae8   : > { %v7221_v51 = vpack.c.bf16 %v6849_v49, %v4499_v61 }
0x1aea   : > { %7223 = vmatprep.subr.msk.bf16.mxu1 %vm7750_vm3, %v7221_v51 }
0x1aeb   : > { %7226 = vmatpush3.bf16.xpose.msk.msra.mxu1 %vm7750_vm3, %v7221_v51 }
0x1af2   : > { %6866 = vmatmul.mubr.msk.f32.vlgmr.msra.gmra.mrb[36].mxu1 %vm907_vm2, %v6838_v50 }
0x1bc5   : > { %v6867_v39 = vpop.f32.mrb[36].mxu1 }
0x1bc6   : > { %v4676_v25 = vmul.f32 0.35355338, %v6867_v39  ;;  %v4666_v5 = vpop.f32.mrb[37].mxu1 }
0x1bc7   : > { %v4675_v8 = vmul.f32 0.35355338, %v4666_v5 }
0x1bc8   : > { %v4682_v56 = vadd.f32 %v4680_v2, %v4676_v25 }
0x1bc9   : > { %v4681_v12 = vadd.f32 %v4679_v3, %v4675_v8 }
0x1bca   : > { %v4688_v6 = vadd.f32 %v4686_v4, %v4682_v56  ;;  %v6136_v56 = vld [vmem:[%s8721_s5 + $0xe8] sm:$0xff] }
0x1bcb   : > { %v4687_v18 = vadd.f32 %v4685_v9, %v4681_v12  ;;  %v6135_v9 = vld [vmem:[%s8721_s5 + $0xe0] sm:$0xff]  ;;  %v6132_v12 = vld [vmem:[%s8724_s8 + $0x30] sm:$0xff] }
0x1bcc   : > { %v4694_v23 = vadd.f32 %v4692_v62, %v4688_v6  ;;  %v7231_v62 = vpack.c.bf16 %v6136_v56, %v6135_v9  ;;  %6875 = vmatprep.subr.mxu1 %v6132_v12 }
0x1bcd   : > { %v4693_v19 = vadd.f32 %v4691_v0, %v4687_v18  ;;  %6876 = vmatpush3.msra.mxu1 %v6132_v12  ;;  %v6138_v18 = vld [vmem:[%s8721_s5 + $0xf8] sm:$0xff] }
0x1bce   : > { %v4700_v28 = vadd.f32 %v4698_v16, %v4694_v23  ;;  %7232 = vmatprep.subr.bf16.mxu0 %v7231_v62  ;;  %v6137_v16 = vld [vmem:[%s8721_s5 + $0xf0] sm:$0xff] }
0x1bcf   : > { %v4699_v41 = vadd.f32 %v4697_v20, %v4693_v19  ;;  %v6147_v19 = vld [vmem:[%s8723_s7 + $0xe0] sm:$0xff] }
0x1bd0   : > { %v4706_v38 = vadd.f32 %v4704_v24, %v4700_v28  ;;  %v7235_v24 = vpack.c.bf16 %v6138_v18, %v6137_v16  ;;  %v6149_v28 = vld [vmem:[%s8723_s7 + $0xf0] sm:$0xff]  ;;  %v5273_v16 = vstv %s8575_s3 }
0x1bd1   : > { %v4705_v31 = vadd.f32 %v4703_v33, %v4699_v41  ;;  %v7247_v33 = vpack.c.bf16 %v6148_v30, %v6147_v19  ;;  %v5274_v30 = vmul.f32 %v8341_v53, %v5273_v16 }
0x1bd2   : > { %v4712_v50 = vadd.f32 %v4710_v37, %v4706_v38  ;;  %v6150_v37 = vld [vmem:[%s8723_s7 + $0xf8] sm:$0xff] }
0x1bd3   : > { %v4711_v57 = vadd.f32 %v4709_v27, %v4705_v31  ;;  %v7251_v41 = vpack.c.bf16 %v6150_v37, %v6149_v28  ;;  %v6142_v27 = vld [vmem:[%s8722_s6 + $0xe8] sm:$0xff]  ;;  %v6144_v31 = vld [vmem:[%s8722_s6 + $0xf8] sm:$0xff] }
0x1bd4   : > { %v4718_v44 = vadd.f32 %v4716_v40, %v4712_v50  ;;  %v7239_v38 = vpack.c.bf16 %v6142_v27, %v6141_v35  ;;  %v6143_v40 = vld [vmem:[%s8722_s6 + $0xf0] sm:$0xff] }
0x1bd5   : > { %v4717_v59 = vadd.f32 %v4715_v43, %v4711_v57 }
0x1bd6   : > { %v4724_v49 = vadd.f32 %v4722_v54, %v4718_v44  ;;  %7240 = vmatprep.subr.bf16.mxu1 %v7239_v38  ;;  %v7243_v54 = vpack.c.bf16 %v6144_v31, %v6143_v40 }
0x1bd7   : > { %v4723_v61 = vadd.f32 %v4721_v48, %v4717_v59 }
0x1bd8   : > { %v4728_v51 = vsel %vm581_vm0, %v4724_v49, -inf }
0x1bd9   : > { %4729 = vmax.xlane.f32.xlu1 %v4728_v51  ;;  %v4725_v47 = vsel %vm581_vm0, %v4723_v61, -inf }
0x1bda   : > { %4726 = vmax.xlane.f32.xlu0 %v4725_v47 }
0x1c66   : > { %v4730_v1 = vpop.xlane.xlu1 %4729 }
0x1c67   : > { %v4732_v2 = vsub.f32 %v4724_v49, %v4730_v1  ;;  %v4727_v39 = vpop.xlane.xlu0 %4726  ;;  %v5243_v1 = vstv %s6157_s20 }
0x1c68   : > { %v4731_v52 = vsub.f32 %v4723_v61, %v4727_v39  ;;  %v5245_v39 = vmul.f32 %v8284_v55, %v5243_v1 }
0x1c69   : > { %v4735_v3 = vmul.f32 1.442695, %v4732_v2  ;;  %v5249_v2 = vstv %s6158_s30 }
0x1c6a   : > { %v4733_v25 = vmul.f32 1.442695, %v4731_v52  ;;  %v5250_v9 = vmul.f32 %v8299_v10, %v5249_v2  ;;  %v5279_v10 = vstv %s8579_s29 }
0x1c6b   : > { %7401 = vpow2.f32 %v4735_v3  ;;  %v5255_v3 = vstv %s6159_s28  ;;  %s6203_s28 = sshll.u32 %s7626_s25, 8 }
0x1c6c   : > { %7403 = vpow2.f32 %v4733_v25  ;;  %v5244_v25 = vmul.f32 %v8288_v11, %v5243_v1  ;;  %v5257_v55 = vmul.f32 %v8305_v13, %v5255_v3  ;;  %v5256_v12 = vmul.f32 %v8309_v17, %v5255_v3  ;;  %s8669_s3 = scalar_lea.hbm %s8732_s16, %s6203_s28 }
0x1c6d   : > { %v5267_v11 = vstv %s6161_s26  ;;  %v5275_v13 = vmul.f32 %v8336_v46, %v5273_v16  ;;  %v5285_v17 = vstv %s6164_s27  ;;  %v6189_v16 = vld [vmem:[%s8730_s14 + $0x28] sm:$0xff]  ;;  %s541_s27 = sand.u32 1, %s7506_s22  }
0x1c6e   : > { %v5286_v35 = vmul.f32 %v8357_v26, %v5285_v17  ;;  %s5886_s19 = sshll.u32 %s541_s27, 4  ;;  %s8675_s25 = scalar_lea.sflag [#allocation3], %s541_s27 }
0x1c6f   : > { %s543_s20 = scalar_lea.vmem [#allocation5], %s5886_s19  ;;  %s7517_s19 = smov [#allocation5]  }
0x1c70   : > { %s5794_s30 = sshll.u32 %s543_s20, 4  ;;  %s7452_s2 = sshll.u32 %s7517_s19, 4  ;;  %s8671_s30 = int_to_ptr.vmem [resolvable:$true] %s5794_s30  ;;  %s7453_s2 = int_to_ptr.vmem [resolvable:$false] %s7452_s2 }
0x1c71   : > { %s7448_s29 = scalar_lea.vmem %s8671_s30, 256  ;;  %s7454_s23 = scalar_lea.vmem %s7453_s2, 512 }
0x1c72   : > { %p7449_p9 = scmp.ne.s32.totalorder %s8671_s30, %s7448_s29  ;;  %p7455_p13 = scmp.lt.s32.totalorder %s8671_s30, %s7453_s2 }
0x1c73   : > { %p7456_p0 = scmp.lt.s32.totalorder %s7454_s23, %s7448_s29 }
0x1c74   : > { %p7450_p10 = pnand %p7449_p9, %p7643_p5 }
0x1c75   : > { %v7402_v4 = vpop.eup %7401  ;;  %p7457_p1 = por %p7456_p0, %p7455_p13 }
0x1c76   : > { %v7404_v5 = vpop.eup %7403  ;;  %v4740_v7 = vsel %vm581_vm0, %v7402_v4, 0.0  ;;  %p7451_p12 = pneg %p7450_p10 }
0x1c77   : > { %4741 = vadd.xlane.f32.xlu1 %v4740_v7  ;;  %v4737_v8 = vsel %vm581_vm0, %v7404_v5, 0.0  ;;  %v5261_v7 = vstv %s6160_s18 }
0x1c78   : > { %4738 = vadd.xlane.f32.xlu0 %v4737_v8  ;;  %p7458_p2 = pnand %p7457_p1, %p7451_p12 }
0x1d04   : > { %v4742_v0 = vpop.xlane.xlu1 %4741 }
0x1d05   : > { %7405 = vrcp.f32 %v4742_v0  ;;  %v4739_v15 = vpop.xlane.xlu0 %4738 }
0x1d06   : > { %7407 = vrcp.f32 %v4739_v15  ;;  %v5263_v15 = vmul.f32 %v8314_v29, %v5261_v7  ;;  %v5281_v29 = vmul.f32 %v8345_v58, %v5279_v10 }
0x1d0f   : > { %v7406_v6 = vpop.eup %7405 }
0x1d10   : > { %v7408_v20 = vpop.eup %7407  ;;  %v4746_v23 = vmul.f32 %v7406_v6, %v7402_v4  ;;  %v5251_v4 = vmul.f32 %v8294_v14, %v5249_v2  ;;  %v5262_v14 = vmul.f32 %v8318_v36, %v5261_v7  ;;  %v5280_v36 = vmul.f32 %v8349_v60, %v5279_v10  ;;  %v6172_v2 = vld [vmem:[%s8726_s10 + $0x20] sm:$0xff] }
0x1d11   : > { %v4745_v21 = vmul.f32 %v7408_v20, %v7404_v5  ;;  %v5269_v20 = vmul.f32 %v8323_v32, %v5267_v11  ;;  %v5287_v32 = vmul.f32 %v8353_v63, %v5285_v17  ;;  %v6180_v7 = vld [vmem:[%s8728_s12 + $0x20] sm:$0xff]  ;;  %v6190_v17 = vld [vmem:[%s8730_s14 + $0x30] sm:$0xff] }
0x1d13   : > { %6872 = vmatprep.mubr.msk.f32.mxu0 %vm581_vm0, %v4745_v21 }
0x1d14   : > { %6873 = vmatmul.mubr.msk.f32.vlgmr.msra.gmra.mrb[42].mxu0 %vm581_vm0, %v4746_v23  ;;  %v5268_v23 = vmul.f32 %v8330_v42, %v5267_v11 }
0x1d15   : > { %7234 = vmatpush3.bf16.msra.mxu0 %v7231_v62  ;;  %6888 = vmatprep.mubr.msk.f32.mxu0 %vm667_vm1, %v8222_v22 }
0x1d16   : > { %7236 = vmatprep.subr.bf16.mxu0 %v7235_v24 }
0x1d19   : > { %7238 = vmatpush3.bf16.msra.mxu0 %v7235_v24 }
0x1d1a   : > { %7248 = vmatprep.subr.bf16.mxu0 %v7247_v33 }
0x1d1c   : > { %6889 = vmatmul.mubr.msk.f32.vlgmr.msra.gmra.mrb[44].mxu0 %vm667_vm1, %v8225_v45 }
0x1d1d   : > { %7250 = vmatpush3.bf16.msra.mxu0 %v7247_v33  ;;  %6910 = vmatprep.mubr.msk.f32.mxu0 %vm667_vm1, %v8222_v22 }
0x1d1e   : > { %7252 = vmatprep.subr.bf16.mxu0 %v7251_v41 }
0x1d21   : > { %7254 = vmatpush3.bf16.msra.mxu0 %v7251_v41 }
0x1d24   : > { %6911 = vmatmul.mubr.msk.f32.vlgmr.msra.gmra.mrb[46].mxu0 %vm667_vm1, %v8225_v45 }
0x1de7   : > { %v6874_v43 = vpop.f32.mrb[42].mxu0 }
0x1de8   : > { %v4819_v50 = vpop.f32.mrb[43].mxu0 }
0x1de9   : > { %6877 = vmatprep.mubr.msk.f32.mxu1 %vm907_vm2, %v4819_v50 }
0x1dea   : > { %6878 = vmatmul.mubr.msk.f32.vlgmr.msra.gmra.mrb[32].mxu1 %vm907_vm2, %v6874_v43 }
0x1deb   : > { %7242 = vmatpush3.bf16.msra.mxu1 %v7239_v38  ;;  %6899 = vmatprep.mubr.msk.f32.mxu1 %vm667_vm1, %v8222_v22 }
0x1dec   : > { %7244 = vmatprep.subr.bf16.mxu1 %v7243_v54 }
0x1def   : > { %v6890_v57 = vpop.f32.mrb[44].mxu0  ;;  %7246 = vmatpush3.bf16.msra.mxu1 %v7243_v54 }
0x1df0   : > { %v4984_v48 = vpop.f32.mrb[45].mxu0 }
0x1df2   : > { %6900 = vmatmul.mubr.msk.f32.vlgmr.msra.gmra.mrb[38].mxu1 %vm667_vm1, %v8225_v45 }
0x1df3   : > { %6917 = vmatprep.mubr.msk.f32.mxu1 %vm907_vm2, %v4984_v48 }
0x1df7   : > { %v6912_v44 = vpop.f32.mrb[46].mxu0 }
0x1df8   : > { %v5144_v59 = vpop.f32.mrb[47].mxu0 }
0x1df9   : > { %v7261_v49 = vpack.c.bf16 %v6912_v44, %v5144_v59  ;;  %v6167_v44 = vld [vmem:[%s8724_s8 + $0x38] sm:$0xff] }
0x1dfb   : > { %7262 = vmatprep.subr.bf16.mxu0 %v7261_v49 }
0x1dfc   : > { %7264 = vmatpush3.bf16.msra.mxu0 %v7261_v49 }
0x1ec5   : > { %v6901_v61 = vpop.f32.mrb[38].mxu1 }
0x1ec6   : > { %v5064_v51 = vpop.f32.mrb[39].mxu1 }
0x1ec7   : > { %v7255_v47 = vpack.c.bf16 %v6901_v61, %v5064_v51 }
0x1ec9   : > { %7257 = vmatprep.subr.msk.bf16.mxu1 %vm7750_vm3, %v7255_v47 }
0x1eca   : > { %7260 = vmatpush3.bf16.xpose.msk.msra.mxu1 %vm7750_vm3, %v7255_v47 }
0x1ecb   : > { %6927 = vmatprep.subr.mxu1 %v6167_v44 }
0x1ed1   : > { %6918 = vmatmul.mubr.msk.f32.vlgmr.msra.gmra.mrb[40].mxu1 %vm907_vm2, %v6890_v57 }
0x1ed2   : > { %6928 = vmatpush3.msra.mxu1 %v6167_v44 }
0x1fa4   : > { %v6919_v52 = vpop.f32.mrb[40].mxu1 }
0x1fa5   : > { %v5241_v34 = vmul.f32 0.35355338, %v6919_v52  ;;  %v5231_v5 = vpop.f32.mrb[41].mxu1 }
0x1fa6   : > { %v5240_v8 = vmul.f32 0.35355338, %v5231_v5 }
0x1fa7   : > { %v5247_v56 = vadd.f32 %v5245_v39, %v5241_v34  ;;  %v6173_v39 = vld [vmem:[%s8726_s10 + $0x28] sm:$0xff]  ;;  %v6174_v34 = vld [vmem:[%s8726_s10 + $0x30] sm:$0xff] }
0x1fa8   : > { %v5246_v62 = vadd.f32 %v5244_v25, %v5240_v8  ;;  %v7265_v52 = vpack.c.bf16 %v6173_v39, %v6172_v2  ;;  %v6181_v8 = vld [vmem:[%s8728_s12 + $0x28] sm:$0xff] }
0x1fa9   : > { %v5253_v0 = vadd.f32 %v5251_v4, %v5247_v56  ;;  %v6175_v4 = vld [vmem:[%s8726_s10 + $0x38] sm:$0xff] }
0x1faa   : > { %v5252_v6 = vadd.f32 %v5250_v9, %v5246_v62  ;;  %7266 = vmatprep.subr.bf16.mxu0 %v7265_v52  ;;  %v7269_v5 = vpack.c.bf16 %v6175_v4, %v6174_v34  ;;  %v7273_v9 = vpack.c.bf16 %v6181_v8, %v6180_v7  ;;  %v6171_v62 = vld [vmem:[%s8725_s9 + $0x1] ss:$0 sm:$0xff] }
0x1fab   : > { %v5259_v18 = vadd.f32 %v5257_v55, %v5253_v0 }
0x1fac   : > { %v5258_v21 = vadd.f32 %v5256_v12, %v5252_v6  ;;  %7274 = vmatprep.subr.bf16.mxu1 %v7273_v9  ;;  %v6182_v6 = vld [vmem:[%s8728_s12 + $0x30] sm:$0xff] }
0x1fad   : > { %v5265_v24 = vadd.f32 %v5263_v15, %v5259_v18 }
0x1fae   : > { %v5264_v19 = vadd.f32 %v5262_v14, %v5258_v21 }
0x1faf   : > { %v5271_v33 = vadd.f32 %v5269_v20, %v5265_v24  ;;  %v6177_v20 = vld [vmem:[%s8727_s11 + $0x1] ss:$0 sm:$0xff] }
0x1fb0   : > { %v5270_v28 = vadd.f32 %v5268_v23, %v5264_v19 }
0x1fb1   : > { %v5277_v37 = vadd.f32 %v5275_v13, %v5271_v33 }
0x1fb2   : > { %v5276_v41 = vadd.f32 %v5274_v30, %v5270_v28  ;;  %v6191_v30 = vld [vmem:[%s8730_s14 + $0x38] sm:$0xff] }
0x1fb3   : > { %v5283_v42 = vadd.f32 %v5281_v29, %v5277_v37  ;;  %v7285_v33 = vpack.c.bf16 %v6191_v30, %v6190_v17  ;;  %v6185_v29 = vld [vmem:[%s8729_s13 + $0x1] ss:$0 sm:$0xff] }
0x1fb4   : > { %v5282_v27 = vadd.f32 %v5280_v36, %v5276_v41 }
0x1fb5   : > { %v5289_v38 = vadd.f32 %v5287_v32, %v5283_v42  ;;  %v6193_v42 = vld [vmem:[%s8731_s15 + $0x1] ss:$0 sm:$0xff] }
0x1fb6   : > { %v5288_v46 = vadd.f32 %v5286_v35, %v5282_v27 }
0x1fb7   : > { %v5293_v40 = vsel %vm581_vm0, %v5289_v38, -inf }
0x1fb8   : > { %5294 = vmax.xlane.f32.xlu1 %v5293_v40  ;;  %v5290_v53 = vsel %vm581_vm0, %v5288_v46, -inf }
0x1fb9   : > { %5291 = vmax.xlane.f32.xlu0 %v5290_v53 }
0x2045   : > { %v5295_v58 = vpop.xlane.xlu1 %5294 }
0x2046   : > { %v5297_v31 = vsub.f32 %v5289_v38, %v5295_v58  ;;  %v5292_v43 = vpop.xlane.xlu0 %5291 }
0x2047   : > { %v5296_v60 = vsub.f32 %v5288_v46, %v5292_v43 }
0x2048   : > { %v5300_v50 = vmul.f32 1.442695, %v5297_v31 }
0x2049   : > { %v5298_v54 = vmul.f32 1.442695, %v5296_v60 }
0x204a   : > { %7409 = vpow2.f32 %v5300_v50 }
0x204b   : > { %7411 = vpow2.f32 %v5298_v54 }
0x2054   : > { %v7410_v63 = vpop.eup %7409 }
0x2055   : > { %v7412_v26 = vpop.eup %7411  ;;  %v5305_v57 = vsel %vm581_vm0, %v7410_v63, 0.0 }
0x2056   : > { %5306 = vadd.xlane.f32.xlu1 %v5305_v57  ;;  %v5302_v48 = vsel %vm581_vm0, %v7412_v26, 0.0 }
0x2057   : > { %5303 = vadd.xlane.f32.xlu0 %v5302_v48 }
0x20e3   : > { %v5307_v59 = vpop.xlane.xlu1 %5306 }
0x20e4   : > { %7413 = vrcp.f32 %v5307_v59  ;;  %v5304_v49 = vpop.xlane.xlu0 %5303 }
0x20e5   : > { %7415 = vrcp.f32 %v5304_v49 }
0x20ee   : > { %v7414_v61 = vpop.eup %7413 }
0x20ef   : > { %v7416_v51 = vpop.eup %7415  ;;  %v5311_v1 = vmul.f32 %v7414_v61, %v7410_v63 }
0x20f0   : > { %v5310_v47 = vmul.f32 %v7416_v51, %v7412_v26 }
0x20f2   : > { %6924 = vmatprep.mubr.msk.f32.mxu0 %vm581_vm0, %v5310_v47 }
0x20f3   : > { %6925 = vmatmul.mubr.msk.f32.vlgmr.msra.gmra.mrb[48].mxu0 %vm581_vm0, %v5311_v1 }
0x20f4   : > { %7268 = vmatpush3.bf16.msra.mxu0 %v7265_v52 }
0x20f5   : > { %7270 = vmatprep.subr.bf16.mxu0 %v7269_v5 }
0x20f8   : > { %7272 = vmatpush3.bf16.msra.mxu0 %v7269_v5 }
0x21c6   : > { %v6926_v3 = vpop.f32.mrb[48].mxu0 }
0x21c7   : > { %v5384_v25 = vpop.f32.mrb[49].mxu0 }
0x21c8   : > { %6929 = vmatprep.mubr.msk.f32.mxu1 %vm907_vm2, %v5384_v25 }
0x21c9   : > { %6930 = vmatmul.mubr.msk.f32.vlgmr.msra.gmra.mrb[32].mxu1 %vm907_vm2, %v6926_v3 }
0x21ca   : > { %7276 = vmatpush3.bf16.msra.mxu1 %v7273_v9 }
0x229c   : > { %v6931_v56 = vpop.f32.mrb[32].mxu1 }
0x229d   : > { %v5479_v55 = vadd.f32 %v6931_v56, %v8225_v45  ;;  %v5467_v12 = vpop.f32.mrb[33].mxu1  ;;  %v6183_v45 = vld [vmem:[%s8728_s12 + $0x38] sm:$0xff] }
0x229e   : > { %v5478_v11 = vadd.f32 %v5467_v12, %v8222_v22  ;;  %v7277_v14 = vpack.c.bf16 %v6183_v45, %v6182_v6  ;;  %v6188_v22 = vld [vmem:[%s8730_s14 + $0x20] sm:$0xff] }
0x229f   : > { %v5489_v15 = vadd.f32 %v6171_v62, %v5479_v55  ;;  %v7281_v18 = vpack.c.bf16 %v6189_v16, %v6188_v22 }
0x22a0   : > { %v5488_v0 = vadd.f32 %v6171_v62, %v5478_v11  ;;  %7278 = vmatprep.subr.bf16.mxu1 %v7277_v14 }
0x22a1   : > { %7280 = vmatpush3.bf16.msra.mxu1 %v7277_v14  ;;  %7282 = vmatprep.subr.bf16.mxu0 %v7281_v18 }
0x22a2   : > { %6940 = vmatprep.mubr.msk.f32.mxu0 %vm667_vm1, %v5488_v0 }
0x22a3   : > { %6941 = vmatmul.mubr.msk.f32.vlgmr.msra.gmra.mrb[50].mxu0 %vm667_vm1, %v5489_v15 }
0x22a4   : > { %7284 = vmatpush3.bf16.msra.mxu0 %v7281_v18 }
0x22a5   : > { %7286 = vmatprep.subr.bf16.mxu0 %v7285_v33 }
0x22a8   : > { %7288 = vmatpush3.bf16.msra.mxu0 %v7285_v33 }
0x2376   : > { %v6942_v21 = vpop.f32.mrb[50].mxu0 }
0x2377   : > { %v5581_v10 = vadd.f32 %v6942_v21, %v6177_v20  ;;  %v5575_v23 = vpop.f32.mrb[51].mxu0 }
0x2378   : > { %v5576_v24 = vadd.f32 %v6177_v20, %v5575_v23 }
0x2379   : > { %v5585_v19 = vmax.f32 %v5581_v10, 0.0 }
0x237a   : > { %v5584_v13 = vmax.f32 %v5576_v24, 0.0 }
0x237c   : > { %6951 = vmatprep.mubr.msk.f32.mxu1 %vm667_vm1, %v5584_v13 }
0x237d   : > { %6952 = vmatmul.mubr.msk.f32.vlgmr.msra.gmra.mrb[42].mxu1 %vm667_vm1, %v5585_v19 }
0x2450   : > { %v6953_v28 = vpop.f32.mrb[42].mxu1 }
0x2451   : > { %v5677_v36 = vadd.f32 %v6953_v28, %v6185_v29  ;;  %v5671_v37 = vpop.f32.mrb[43].mxu1 }
0x2452   : > { %v5672_v32 = vadd.f32 %v6185_v29, %v5671_v37 }
0x2453   : > { %v5681_v35 = vmax.f32 %v5677_v36, 0.0 }
0x2454   : > { %v5680_v41 = vmax.f32 %v5672_v32, 0.0 }
0x2456   : > { %6962 = vmatprep.mubr.msk.f32.mxu0 %vm667_vm1, %v5680_v41 }
0x2457   : > { %6963 = vmatmul.mubr.msk.f32.vlgmr.msra.gmra.mrb[52].mxu0 %vm667_vm1, %v5681_v35 }
0x252a   : > { %v6964_v27 = vpop.f32.mrb[52].mxu0 }
0x252b   : > { %v5773_v38 = vadd.f32 %v6964_v27, %v6193_v42  ;;  %v5767_v46 = vpop.f32.mrb[53].mxu0 }
0x252c   : > { %v5768_v40 = vadd.f32 %v6193_v42, %v5767_v46 }
0x252d   : > { %v5777_v53 = vadd.f32 %v5773_v38, %v5489_v15 }
0x252e   : > { %v5776_v58 = vadd.f32 %v5768_v40, %v5488_v0 }
0x252f   : > { %5779 = vst.msk [vmem:[%s543_s20 + $0x8] sm:$0xff] %vm667_vm1, %v5777_v53 }
0x2530   : > { %5778 = vst.msk [vmem:[%s543_s20] sm:$0xff] %vm667_vm1, %v5776_v58 }
0x2531   : > { %7461 = shalt.err (!%p7458_p2)
}
0x2532   : > { %s7462_s27 = scalar_lea.hbm %s8669_s3, 256  ;;  %s7466_s18 = scalar_lea.hbm %s8732_s16, 512 }
0x2533   : > { %p7463_p3 = scmp.ne.s32.totalorder %s8669_s3, %s7462_s27  ;;  %p7467_p8 = scmp.lt.u32.totalorder %s8669_s3, %s8732_s16 }
0x2534   : > { %p7468_p11 = scmp.lt.u32.totalorder %s7466_s18, %s7462_s27  ;;  %p7470_p10 = scmp.lt.u32.totalorder %s7462_s27, %s8669_s3 }
0x2535   : > { %p7464_p4 = pnand %p7463_p3, %p7643_p5 }
0x2536   : > { %p7469_p9 = por %p7468_p11, %p7467_p8 }
0x2537   : > { %p7465_p7 = pneg %p7464_p4 }
0x2538   : > { %p7471_p12 = por %p7470_p10, %p7469_p9 }
0x253a   : > { %p7472_p13 = pnand %p7471_p12, %p7465_p7 }
0x253c   : > { %7475 = shalt.err (!%p7472_p13)
}
0x253d   : > { %s7518_s29 = smov 128   ;;  %s7519_s2 = smov 8  }
0x253e   : > { %7305 = dma.vmem_to_hbm [thread:$0]  (%p7643_p5), %s8671_s30, 256, %s8669_s3, %s8675_s25, %s7518_s29, %s7518_s29, %s7519_s2  }
0x253f PF: > { %p7317_p0 = scmp.ge.s32.totalorder %s7514_s24, 2  ;;  %s5809_s23 = sand.u32 1, %s7502_s21  }
0x2540   : > { %s5810_s27 = scalar_lea.sflag [#allocation3], %s5809_s23 }
0x2541   : > { %p7312_p1 = pnand %p7317_p0, %p7647_p6 }
0x2543   : > { %7497 = dma.done.wait (!%p7312_p1), %s5810_s27, 256  }
0x2544   : > { %7499 = vsyncadd (!%p7312_p1), %s5810_s27, 4294967040  ;;  %s8750_s24 = sld [smem:[#allocation9_spill]]  ;;  %s8751_s20 = sld [smem:[#allocation8_spill]] }
0x2545   : > { %s8752_s23 = sld [smem:[#allocation10_spill]]  ;;  %s8753_s21 = smov %s7506_s22 }
0x254a   : > { %p27_p2 = scmp.ge.s32.totalorder %s8750_s24, 4   ;;  %s8754_s22 = smov %s8751_s20 }
0x254c   :  { %29 = sbr.rel (!%p27_p2) target bundleno = 8 (0x8), region = 162 }
0x2553   :  { %5815 = vsyncpa [#allocation3], 1 }
0x2554   :  { %5817 = vsyncpa [#allocation3 + $0x1], 1 }
0x2555   :  { %5818 = vsyncpa [#allocation4], 1 }
0x2556   :  { %5820 = vsyncpa [#allocation4 + $0x1], 1 }

</bundles_post_ra>
